<compile_context>
chip_gen: v7x
topology: tpu7x:2x2x1
jax: 0.10.0
libtpu: 0.0.40
codegen_flags: <defaults>
</compile_context>

<pallas_src>
import jax
import jax.numpy as jnp
from jax.experimental import pallas as pl
from jax.experimental.pallas import tpu as pltpu

NEG_SLOPE = 0.01     # PyTorch leaky_relu default
BN_EPS = 1e-5
FP = 128             # padded (lane-dense) feature width


def _leaky_relu(x):
    # 2 VALU ops (mul + max) instead of cmp + select + mul.
    return jnp.maximum(x, NEG_SLOPE * x)


# ----------------------------------------------------------------------------
# Kernel: one grid step = one (graph, layer) pair
# ----------------------------------------------------------------------------
def egnn_diffusion_kernel(
    # per-graph data (leading graph axis squeezed by BlockSpec, resident per b)
    h0_ref, c0_ref, gcat_ref, dcat_ref, sbf_ref, sf32_ref, ea_ref,
    # per-layer weights (leading layer axis squeezed, streamed per l)
    wnode_ref, wd2_ref, wea_ref, be1_ref, we2_ref, be2_ref,
    wc1_ref, bc1_ref, wc2_ref, bc2_ref,
    wn1a_ref, bn1_ref, wn2_ref, bn2_ref, gamma_ref, beta_ref,
    # readout (resident)
    wread_ref, bread_ref,
    # output slab (N, 128): lanes [cx, cy, noise_x, noise_y, 0, ...]
    out_ref,
    # VMEM accumulators carried across the layer axis
    h_scr, c_scr,
):
    li = pl.program_id(1)
    num_layers = pl.num_programs(1)
    N, F = h_scr.shape

    @pl.when(li == 0)
    def _init():
        h_scr[...] = h0_ref[...]
        c_scr[...] = c0_ref[...]

    h = h_scr[...]                                   # (N, F) f32
    coords = c_scr[...]                              # (N, 2) f32

    # fused node-level projections: [edge-dst | edge-src | node-mlp | root]
    proj = jnp.dot(h.astype(jnp.bfloat16), wnode_ref[...],
                   preferred_element_type=jnp.float32)           # (N, 4F)
    p_d = proj[:, 0:F]
    p_s = proj[:, F:2 * F]
    n1h = proj[:, 2 * F:3 * F]
    root = proj[:, 3 * F:4 * F]

    # single fused block gather: [gdst | gsrc] @ [p_d ; p_s]   (K = 2N)
    pcat = jnp.concatenate([p_d, p_s], axis=0).astype(jnp.bfloat16)   # (2N, F)
    gsum = jnp.dot(gcat_ref[...], pcat,
                   preferred_element_type=jnp.float32)           # (E, F)

    # exact f32 coordinate diffs: (gdst - gsrc) @ coords
    dxy = jnp.dot(dcat_ref[...], coords,
                  preferred_element_type=jnp.float32)            # (E, 2)
    dx = dxy[:, 0:1]
    dy = dxy[:, 1:2]
    dist2 = dx * dx + dy * dy                                    # (E, 1)
    inv_norm = 1.0 / (jnp.sqrt(dist2) + 1.0)                     # norm=True, exact

    # edge MLP (K=2 edge_attr term as VPU broadcasts)
    ea = ea_ref[...]
    wea = wea_ref[...]
    m = _leaky_relu(gsum + dist2 * wd2_ref[...]
                    + ea[:, 0:1] * wea[0:1, :] + ea[:, 1:2] * wea[1:2, :]
                    + be1_ref[...])
    m = _leaky_relu(jnp.dot(m.astype(jnp.bfloat16), we2_ref[...],
                            preferred_element_type=jnp.float32) + be2_ref[...])

    # coord-weight MLP ((F,1) final matmul done as a lane reduction)
    cw = _leaky_relu(jnp.dot(m.astype(jnp.bfloat16), wc1_ref[...],
                             preferred_element_type=jnp.float32) + bc1_ref[...])
    cwt = jnp.sum(cw * wc2_ref[...], axis=-1, keepdims=True) + bc2_ref[...]   # (E,1)

    # coordinate update: f32 mean aggregation (2-lane matvec)
    uxy = dxy * (inv_norm * cwt)                                 # (E, 2)
    coords_new = coords + jnp.dot(sf32_ref[...], uxy,
                                  preferred_element_type=jnp.float32)
    c_scr[...] = coords_new

    # message mean aggregation (bf16 MXU)
    agg = jnp.dot(sbf_ref[...], m.astype(jnp.bfloat16),
                  preferred_element_type=jnp.float32)            # (N, F)

    # node MLP + root weight
    out = _leaky_relu(n1h + jnp.dot(agg.astype(jnp.bfloat16), wn1a_ref[...],
                                    preferred_element_type=jnp.float32)
                      + bn1_ref[...])
    out = (jnp.dot(out.astype(jnp.bfloat16), wn2_ref[...],
                   preferred_element_type=jnp.float32)
           + bn2_ref[...] + root)

    # pyg-style batch norm, two-pass stats (no E[x^2]-E[x]^2 cancellation).
    # TODO(synk): training-mode global statistics; batch_index / running stats
    # ignored (EGNNBasicLayer source not provided).
    mu = jnp.mean(out, axis=0, keepdims=True)
    var = jnp.mean((out - mu) * (out - mu), axis=0, keepdims=True)
    out = (out - mu) * jax.lax.rsqrt(var + BN_EPS) * gamma_ref[...] + beta_ref[...]
    h_new = _leaky_relu(out)
    h_scr[...] = h_new

    # readout + lane-dense output slab, last layer only
    @pl.when(li == num_layers - 1)
    def _readout():
        p0 = (jnp.sum(h_new * wread_ref[0:1, :], axis=-1, keepdims=True)
              + bread_ref[:, 0:1])
        p1 = (jnp.sum(h_new * wread_ref[1:2, :], axis=-1, keepdims=True)
              + bread_ref[:, 1:2])
        lane = jax.lax.broadcasted_iota(jnp.int32, (N, F), 1)
        out_ref[...] = (coords_new[:, 0:1] * (lane == 0).astype(jnp.float32)
                        + coords_new[:, 1:2] * (lane == 1).astype(jnp.float32)
                        + p0 * (lane == 2).astype(jnp.float32)
                        + p1 * (lane == 3).astype(jnp.float32))


# ----------------------------------------------------------------------------
# Graph operators / params
# ----------------------------------------------------------------------------
def build_graph_operators(edge_index, num_nodes):
    """Dense graph operators for one graph (built once, reused per forward).
      gcat : (E, 2N) bf16 = [one_hot(dst) | one_hot(src)]   (fused gather)
      dcat : (E, N)  f32  = one_hot(dst) - one_hot(src)     (exact coord diff)
      s_bf : (N, E)  bf16 mean-scatter (messages)
      s_f32: (N, E)  f32  mean-scatter (coordinate updates)
    """
    src, dst = edge_index[0], edge_index[1]
    E = src.shape[0]
    eidx = jnp.arange(E)
    gsrc = jnp.zeros((E, num_nodes), jnp.float32).at[eidx, src].set(1.0)
    gdst = jnp.zeros((E, num_nodes), jnp.float32).at[eidx, dst].set(1.0)
    gcat = jnp.concatenate([gdst, gsrc], axis=1).astype(jnp.bfloat16)
    dcat = gdst - gsrc
    deg = jnp.maximum(jnp.zeros((num_nodes,), jnp.float32).at[dst].add(1.0), 1.0)
    s_f32 = jnp.zeros((num_nodes, E), jnp.float32).at[dst, eidx].set(1.0 / deg[dst])
    return gcat, dcat, s_f32.astype(jnp.bfloat16), s_f32


def _pad_to(a, shape):
    out = jnp.zeros(shape, jnp.float32)
    return out.at[tuple(slice(0, d) for d in a.shape)].set(a)


def init_params(key, in_dim, out_dim, num_layers, edge_feat_dim=2, timesteps=100):
    """Returns (time_embed, packed params): weights padded to 128 lanes,
    stacked over layers, MXU operands pre-cast to bf16."""
    assert edge_feat_dim == 2, "kernel hard-codes edge_feat_dim=2 (spec default)"
    F = in_dim * 2
    assert F <= FP and out_dim <= FP
    keys = jax.random.split(key, 2 + num_layers)

    def lin(k, fan_in, shape):
        bound = 1.0 / (fan_in ** 0.5)
        return jax.random.uniform(k, shape, jnp.float32, -bound, bound)

    time_embed = jax.random.normal(keys[0], (timesteps, in_dim), jnp.float32)

    raw = []
    for li in range(num_layers):
        lk = jax.random.split(keys[1 + li], 17)
        ein = 2 * F + 1 + edge_feat_dim
        raw.append(dict(
            w_e1_hd=lin(lk[0], ein, (F, F)),
            w_e1_hs=lin(lk[1], ein, (F, F)),
            w_e1_d2=lin(lk[2], ein, (1, F)),
            w_e1_ea=lin(lk[3], ein, (edge_feat_dim, F)),
            b_e1=lin(lk[4], ein, (1, F)),
            w_e2=lin(lk[5], F, (F, F)),
            b_e2=lin(lk[6], F, (1, F)),
            w_c1=lin(lk[7], F, (F, F)),
            b_c1=lin(lk[8], F, (1, F)),
            w_c2=lin(lk[9], F, (F, 1)),
            b_c2=lin(lk[10], F, (1, 1)),
            w_n1_h=lin(lk[11], 2 * F, (F, F)),
            w_n1_a=lin(lk[12], 2 * F, (F, F)),
            b_n1=lin(lk[13], 2 * F, (1, F)),
            w_n2=lin(lk[14], F, (F, F)),
            b_n2=lin(lk[15], F, (1, F)),
            w_root=lin(lk[16], F, (F, F)),
            gamma=jnp.ones((1, F), jnp.float32),
            beta=jnp.zeros((1, F), jnp.float32),
        ))

    rk = jax.random.split(keys[-1], 2)
    w_read = lin(rk[0], out_dim, (out_dim, 2))
    b_read = lin(rk[1], out_dim, (1, 2))

    def stack(name, shape, dtype=jnp.float32):
        return jnp.stack([_pad_to(l[name], shape) for l in raw]).astype(dtype)

    # fuse the four h-projections into one (128, 512) RHS per layer
    w_node = jnp.stack([
        jnp.concatenate([_pad_to(l['w_e1_hd'], (FP, FP)),
                         _pad_to(l['w_e1_hs'], (FP, FP)),
                         _pad_to(l['w_n1_h'], (FP, FP)),
                         _pad_to(l['w_root'], (FP, FP))], axis=1)
        for l in raw]).astype(jnp.bfloat16)

    packed = dict(
        w_node=w_node,
        wd2=stack('w_e1_d2', (1, FP)),
        wea=stack('w_e1_ea', (edge_feat_dim, FP)),
        be1=stack('b_e1', (1, FP)),
        we2=stack('w_e2', (FP, FP), jnp.bfloat16),
        be2=stack('b_e2', (1, FP)),
        wc1=stack('w_c1', (FP, FP), jnp.bfloat16),
        bc1=stack('b_c1', (1, FP)),
        wc2=jnp.stack([_pad_to(l['w_c2'].T, (1, FP)) for l in raw]),
        bc2=jnp.stack([l['b_c2'] for l in raw]),
        wn1a=stack('w_n1_a', (FP, FP), jnp.bfloat16),
        bn1=stack('b_n1', (1, FP)),
        wn2=stack('w_n2', (FP, FP), jnp.bfloat16),
        bn2=stack('b_n2', (1, FP)),
        gamma=stack('gamma', (1, FP)),
        beta=stack('beta', (1, FP)),
        w_read=_pad_to(w_read.T, (2, FP)),
        b_read=b_read,
    )
    return time_embed, packed


# ----------------------------------------------------------------------------
# Forward wrappers
# ----------------------------------------------------------------------------
_LAYER_KEYS = ('w_node', 'wd2', 'wea', 'be1', 'we2', 'be2',
               'wc1', 'bc1', 'wc2', 'bc2',
               'wn1a', 'bn1', 'wn2', 'bn2', 'gamma', 'beta')


def _spec_data(a):     # (B, r, c): resident per graph
    return pl.BlockSpec((None, a.shape[1], a.shape[2]), lambda b, l: (b, 0, 0))


def _spec_layer(a):    # (L, r, c): streamed per layer (auto double-buffered)
    return pl.BlockSpec((None, a.shape[1], a.shape[2]), lambda b, l: (l, 0, 0))


def _spec_global(a):   # small resident 2-D params
    return pl.BlockSpec(a.shape, lambda b, l: (0, 0))


def diffusion_forward_batched(params, coords, node_feat, edge_index, edge_attr,
                              batch_index, t, graph_ops=None):
    """coords (B,N,2), node_feat (B,N,in_dim), edge_index (B,2,E) int,
    edge_attr (B,E,2), t scalar or (B,).  Returns (coords, pred_noise) each
    (B,N,2).  batch_index accepted for signature parity (BN uses global stats)."""
    time_embed, p = params
    B, N, _ = coords.shape
    L = p['w_node'].shape[0]

    if graph_ops is None:
        graph_ops = [build_graph_operators(edge_index[b], N) for b in range(B)]
    gcat = jnp.stack([g[0] for g in graph_ops])
    dcat = jnp.stack([g[1] for g in graph_ops])
    s_bf = jnp.stack([g[2] for g in graph_ops])
    s_f32 = jnp.stack([g[3] for g in graph_ops])

    # time embedding lookup + concat (glue), then lane-pad to FP=128
    t_arr = jnp.broadcast_to(jnp.atleast_1d(jnp.asarray(t, jnp.int32)), (B,))
    t_embed = jnp.broadcast_to(time_embed[t_arr][:, None, :],
                               (B, N, time_embed.shape[1]))
    h_real = jnp.concatenate([node_feat.astype(jnp.float32), t_embed], axis=-1)
    h0 = jnp.zeros((B, N, FP), jnp.float32).at[:, :, :h_real.shape[-1]].set(h_real)

    data = (h0, coords.astype(jnp.float32), gcat, dcat, s_bf, s_f32,
            edge_attr.astype(jnp.float32))
    layer = tuple(p[k] for k in _LAYER_KEYS)
    glob = (p['w_read'], p['b_read'])

    in_specs = ([_spec_data(a) for a in data]
                + [_spec_layer(a) for a in layer]
                + [_spec_global(a) for a in glob])
    out_spec = pl.BlockSpec((None, N, FP), lambda b, l: (b, 0, 0))
    scratch = [pltpu.VMEM((N, FP), jnp.float32),     # h accumulator
               pltpu.VMEM((N, 2), jnp.float32)]      # coords accumulator

    # vmem limit derived from the resident blocks (double-buffered) + headroom
    out_block = N * FP * 4
    per_graph = sum(int(a.nbytes) // B for a in data) + out_block
    per_layer = sum(int(a.nbytes) // L for a in layer)
    glob_b = sum(int(a.nbytes) for a in glob)
    scratch_b = N * FP * 4 + N * 2 * 4
    need = 2 * per_graph + 2 * per_layer + glob_b + scratch_b
    vmem_limit = int(min(max(4 * need, 16 << 20), 32 << 20))

    out = pl.pallas_call(
        egnn_diffusion_kernel,
        out_shape=jax.ShapeDtypeStruct((B, N, FP), jnp.float32),
        grid_spec=pltpu.PrefetchScalarGridSpec(
            num_scalar_prefetch=0,
            grid=(B, L),
            in_specs=in_specs,
            out_specs=out_spec,
            scratch_shapes=scratch),
        compiler_params=pltpu.CompilerParams(
            dimension_semantics=("parallel", "arbitrary"),
            vmem_limit_bytes=vmem_limit),
    )(*data, *layer, *glob)

    return out[:, :, 0:2], out[:, :, 2:4]


def diffusion_forward(params, coords, node_feat, edge_index, edge_attr,
                      batch_index, t, graph_ops=None):
    """Single-graph API mirroring DiffusionModel.forward → (coords, pred_noise)."""
    ops = None if graph_ops is None else [graph_ops]
    bi = None if batch_index is None else batch_index[None]
    c, n = diffusion_forward_batched(
        params, coords[None], node_feat[None], edge_index[None],
        edge_attr[None], bi, t, graph_ops=ops)
    return c[0], n[0]


# ----------------------------------------------------------------------------
if __name__ == "__main__":
    in_dim, out_dim, num_layers = 8, 16, 2      # out_dim == 2*in_dim (readout in)
    edge_feat_dim, timesteps = 2, 100
    N, B = 64, 2                                 # B graphs -> 'parallel' grid axis

    key = jax.random.PRNGKey(0)
    k1, k2, k3, k4 = jax.random.split(key, 4)

    # bidirectional ring graph: every node has in-degree 2, E = 2N = 128
    idx = jnp.arange(N)
    src = jnp.concatenate([idx, (idx + 1) % N])
    dst = jnp.concatenate([(idx + 1) % N, idx])
    edge_index = jnp.stack([src, dst]).astype(jnp.int32)        # (2, E)
    E = edge_index.shape[1]

    coords = jax.random.normal(k1, (B, N, 2), jnp.float32)
    node_feat = jax.random.normal(k2, (B, N, in_dim), jnp.float32)
    edge_attr = jax.random.normal(k3, (B, E, edge_feat_dim), jnp.float32)
    edge_index_b = jnp.broadcast_to(edge_index[None], (B, 2, E))
    batch_index = jnp.zeros((B, N), jnp.int32)

    params = init_params(k4, in_dim, out_dim, num_layers, edge_feat_dim,
                         timesteps)
    t = 7

    # batched call: grid=(B, L), graph axis 'parallel' (v7x: both TensorCores)
    coords_out, pred_noise = diffusion_forward_batched(
        params, coords, node_feat, edge_index_b, edge_attr, batch_index, t)
    jax.block_until_ready((coords_out, pred_noise))

    assert coords_out.shape == (B, N, 2)
    assert pred_noise.shape == (B, N, 2)
    assert bool(jnp.all(jnp.isfinite(coords_out)))
    assert bool(jnp.all(jnp.isfinite(pred_noise)))

    # cross-check: the single-graph API reproduces graph 0 of the batch
    c0, n0 = diffusion_forward(params, coords[0], node_feat[0], edge_index,
                               edge_attr[0], batch_index[0], t)
    jax.block_until_ready((c0, n0))
    assert bool(jnp.allclose(c0, coords_out[0], atol=1e-5, rtol=1e-5))
    assert bool(jnp.allclose(n0, pred_noise[0], atol=1e-5, rtol=1e-5))

    print("KERNEL_OK")
</pallas_src>

<mosaic_0001>
module attributes {stable_mosaic.version = 11 : i64} {
  func.func @egnn_diffusion_kernel(%arg0: i32, %arg1: i32, %arg2: memref<1x64x128xf32, #tpu.memory_space<vmem>>, %arg3: memref<1x64x2xf32, #tpu.memory_space<vmem>>, %arg4: memref<1x128x128xbf16, #tpu.memory_space<vmem>>, %arg5: memref<1x128x64xf32, #tpu.memory_space<vmem>>, %arg6: memref<1x64x128xbf16, #tpu.memory_space<vmem>>, %arg7: memref<1x64x128xf32, #tpu.memory_space<vmem>>, %arg8: memref<1x128x2xf32, #tpu.memory_space<vmem>>, %arg9: memref<1x128x512xbf16, #tpu.memory_space<vmem>>, %arg10: memref<1x1x128xf32, #tpu.memory_space<vmem>>, %arg11: memref<1x2x128xf32, #tpu.memory_space<vmem>>, %arg12: memref<1x1x128xf32, #tpu.memory_space<vmem>>, %arg13: memref<1x128x128xbf16, #tpu.memory_space<vmem>>, %arg14: memref<1x1x128xf32, #tpu.memory_space<vmem>>, %arg15: memref<1x128x128xbf16, #tpu.memory_space<vmem>>, %arg16: memref<1x1x128xf32, #tpu.memory_space<vmem>>, %arg17: memref<1x1x128xf32, #tpu.memory_space<vmem>>, %arg18: memref<1x1x1xf32, #tpu.memory_space<vmem>>, %arg19: memref<1x128x128xbf16, #tpu.memory_space<vmem>>, %arg20: memref<1x1x128xf32, #tpu.memory_space<vmem>>, %arg21: memref<1x128x128xbf16, #tpu.memory_space<vmem>>, %arg22: memref<1x1x128xf32, #tpu.memory_space<vmem>>, %arg23: memref<1x1x128xf32, #tpu.memory_space<vmem>>, %arg24: memref<1x1x128xf32, #tpu.memory_space<vmem>>, %arg25: memref<2x128xf32, #tpu.memory_space<vmem>>, %arg26: memref<1x2xf32, #tpu.memory_space<vmem>>, %arg27: memref<1x64x128xf32, #tpu.memory_space<vmem>>, %arg28: memref<64x128xf32, #tpu.memory_space<vmem>>, %arg29: memref<64x2xf32, #tpu.memory_space<vmem>>) attributes {dimension_semantics = [#tpu.dimension_semantics<parallel>, #tpu.dimension_semantics<arbitrary>], iteration_bounds = array<i64: 2, 2>, scalar_prefetch = 0 : i64, scratch_operands = 2 : i64, tpu.core_type = #tpu.core_type<tc>, window_params = [{transform_indices = @transform_0, window_bounds = array<i64: 1, 64, 128>}, {transform_indices = @transform_1, window_bounds = array<i64: 1, 64, 2>}, {transform_indices = @transform_2, window_bounds = array<i64: 1, 128, 128>}, {transform_indices = @transform_3, window_bounds = array<i64: 1, 128, 64>}, {transform_indices = @transform_4, window_bounds = array<i64: 1, 64, 128>}, {transform_indices = @transform_5, window_bounds = array<i64: 1, 64, 128>}, {transform_indices = @transform_6, window_bounds = array<i64: 1, 128, 2>}, {transform_indices = @transform_7, window_bounds = array<i64: 1, 128, 512>}, {transform_indices = @transform_8, window_bounds = array<i64: 1, 1, 128>}, {transform_indices = @transform_9, window_bounds = array<i64: 1, 2, 128>}, {transform_indices = @transform_10, window_bounds = array<i64: 1, 1, 128>}, {transform_indices = @transform_11, window_bounds = array<i64: 1, 128, 128>}, {transform_indices = @transform_12, window_bounds = array<i64: 1, 1, 128>}, {transform_indices = @transform_13, window_bounds = array<i64: 1, 128, 128>}, {transform_indices = @transform_14, window_bounds = array<i64: 1, 1, 128>}, {transform_indices = @transform_15, window_bounds = array<i64: 1, 1, 128>}, {transform_indices = @transform_16, window_bounds = array<i64: 1, 1, 1>}, {transform_indices = @transform_17, window_bounds = array<i64: 1, 128, 128>}, {transform_indices = @transform_18, window_bounds = array<i64: 1, 1, 128>}, {transform_indices = @transform_19, window_bounds = array<i64: 1, 128, 128>}, {transform_indices = @transform_20, window_bounds = array<i64: 1, 1, 128>}, {transform_indices = @transform_21, window_bounds = array<i64: 1, 1, 128>}, {transform_indices = @transform_22, window_bounds = array<i64: 1, 1, 128>}, {pipeline_mode = #tpu.pipeline_mode<synchronous>, transform_indices = @transform_23, window_bounds = array<i64: 2, 128>}, {pipeline_mode = #tpu.pipeline_mode<synchronous>, transform_indices = @transform_24, window_bounds = array<i64: 1, 2>}, {transform_indices = @transform_25, window_bounds = array<i64: 1, 64, 128>}]} {
    %c0_i32 = arith.constant 0 : i32
    %0 = arith.cmpi eq, %arg1, %c0_i32 : i32
    %1 = arith.extui %0 : i1 to i32
    %c0_i32_0 = arith.constant 0 : i32
    %2 = arith.cmpi ne, %1, %c0_i32_0 : i32
    scf.if %2 {
      %c0_93 = arith.constant 0 : index
      %c0_94 = arith.constant 0 : index
      %c0_95 = arith.constant 0 : index
      %160 = vector.load %arg2[%c0_93, %c0_94, %c0_95] : memref<1x64x128xf32, #tpu.memory_space<vmem>>, vector<1x64x128xf32>
      %161 = vector.shape_cast %160 : vector<1x64x128xf32> to vector<64x128xf32>
      %c0_96 = arith.constant 0 : index
      %c0_97 = arith.constant 0 : index
      %162 = vector.load %arg28[%c0_96, %c0_97] : memref<64x128xf32, #tpu.memory_space<vmem>>, vector<64x128xf32>
      tpu.vector_store %arg28[%c0_96, %c0_97], %161 {strides = array<i32>} : memref<64x128xf32, #tpu.memory_space<vmem>>, vector<64x128xf32>,
      %c0_98 = arith.constant 0 : index
      %c0_99 = arith.constant 0 : index
      %c0_100 = arith.constant 0 : index
      %163 = vector.load %arg3[%c0_98, %c0_99, %c0_100] : memref<1x64x2xf32, #tpu.memory_space<vmem>>, vector<1x64x2xf32>
      %164 = vector.shape_cast %163 : vector<1x64x2xf32> to vector<64x2xf32>
      %c0_101 = arith.constant 0 : index
      %c0_102 = arith.constant 0 : index
      %165 = vector.load %arg29[%c0_101, %c0_102] : memref<64x2xf32, #tpu.memory_space<vmem>>, vector<64x2xf32>
      tpu.vector_store %arg29[%c0_101, %c0_102], %164 {strides = array<i32>} : memref<64x2xf32, #tpu.memory_space<vmem>>, vector<64x2xf32>,
    } else {
    }
    %c0 = arith.constant 0 : index
    %c0_1 = arith.constant 0 : index
    %3 = vector.load %arg28[%c0, %c0_1] : memref<64x128xf32, #tpu.memory_space<vmem>>, vector<64x128xf32>
    %c0_2 = arith.constant 0 : index
    %c0_3 = arith.constant 0 : index
    %4 = vector.load %arg29[%c0_2, %c0_3] : memref<64x2xf32, #tpu.memory_space<vmem>>, vector<64x2xf32>
    %5 = arith.truncf %3 : vector<64x128xf32> to vector<64x128xbf16>
    %c0_4 = arith.constant 0 : index
    %c0_5 = arith.constant 0 : index
    %c0_6 = arith.constant 0 : index
    %6 = vector.load %arg9[%c0_4, %c0_5, %c0_6] : memref<1x128x512xbf16, #tpu.memory_space<vmem>>, vector<1x128x512xbf16>
    %7 = vector.shape_cast %6 : vector<1x128x512xbf16> to vector<128x512xbf16>
    %cst = arith.constant dense<0.000000e+00> : vector<64x512xf32>
    %8 = tpu.matmul %5, %7, %cst {dimension_numbers = #tpu.dot_dimension_numbers<[1], [0], [0], [1], [0, 0, 1, 1], [], []>} : vector<64x128xbf16>, vector<128x512xbf16>, vector<64x512xf32> -> vector<64x512xf32>
    %9 = vector.extract_strided_slice %8 {offsets = [0, 0], sizes = [64, 128], strides = [1, 1]} : vector<64x512xf32> to vector<64x128xf32>
    %10 = vector.extract_strided_slice %8 {offsets = [0, 128], sizes = [64, 128], strides = [1, 1]} : vector<64x512xf32> to vector<64x128xf32>
    %11 = vector.extract_strided_slice %8 {offsets = [0, 256], sizes = [64, 128], strides = [1, 1]} : vector<64x512xf32> to vector<64x128xf32>
    %12 = vector.extract_strided_slice %8 {offsets = [0, 384], sizes = [64, 128], strides = [1, 1]} : vector<64x512xf32> to vector<64x128xf32>
    %13 = tpu.concatenate %9, %10 in 0 : vector<64x128xf32>, vector<64x128xf32> -> vector<128x128xf32>
    %14 = arith.truncf %13 : vector<128x128xf32> to vector<128x128xbf16>
    %c0_7 = arith.constant 0 : index
    %c0_8 = arith.constant 0 : index
    %c0_9 = arith.constant 0 : index
    %15 = vector.load %arg4[%c0_7, %c0_8, %c0_9] : memref<1x128x128xbf16, #tpu.memory_space<vmem>>, vector<1x128x128xbf16>
    %16 = vector.shape_cast %15 : vector<1x128x128xbf16> to vector<128x128xbf16>
    %cst_10 = arith.constant dense<0.000000e+00> : vector<128x128xf32>
    %17 = tpu.matmul %16, %14, %cst_10 {dimension_numbers = #tpu.dot_dimension_numbers<[1], [0], [0], [1], [0, 0, 1, 1], [], []>} : vector<128x128xbf16>, vector<128x128xbf16>, vector<128x128xf32> -> vector<128x128xf32>
    %c0_11 = arith.constant 0 : index
    %c0_12 = arith.constant 0 : index
    %c0_13 = arith.constant 0 : index
    %18 = vector.load %arg5[%c0_11, %c0_12, %c0_13] : memref<1x128x64xf32, #tpu.memory_space<vmem>>, vector<1x128x64xf32>
    %19 = vector.shape_cast %18 : vector<1x128x64xf32> to vector<128x64xf32>
    %cst_14 = arith.constant dense<0.000000e+00> : vector<128x2xf32>
    %20 = tpu.matmul %19, %4, %cst_14 {dimension_numbers = #tpu.dot_dimension_numbers<[1], [0], [0], [1], [0, 0, 1, 1], [], []>} : vector<128x64xf32>, vector<64x2xf32>, vector<128x2xf32> -> vector<128x2xf32>
    %21 = vector.extract_strided_slice %20 {offsets = [0, 0], sizes = [128, 1], strides = [1, 1]} : vector<128x2xf32> to vector<128x1xf32>
    %22 = vector.extract_strided_slice %20 {offsets = [0, 1], sizes = [128, 1], strides = [1, 1]} : vector<128x2xf32> to vector<128x1xf32>
    %23 = arith.mulf %21, %21 : vector<128x1xf32>
    %24 = arith.mulf %22, %22 : vector<128x1xf32>
    %25 = arith.addf %23, %24 : vector<128x1xf32>
    %26 = math.sqrt %25 : vector<128x1xf32>
    %cst_15 = arith.constant 1.000000e+00 : f32
    %27 = vector.broadcast %cst_15 : f32 to vector<128x1xf32>
    %28 = arith.addf %26, %27 : vector<128x1xf32>
    %cst_16 = arith.constant 1.000000e+00 : f32
    %29 = vector.broadcast %cst_16 : f32 to vector<128x1xf32>
    %30 = arith.divf %29, %28 : vector<128x1xf32>
    %c0_17 = arith.constant 0 : index
    %c0_18 = arith.constant 0 : index
    %c0_19 = arith.constant 0 : index
    %31 = vector.load %arg8[%c0_17, %c0_18, %c0_19] : memref<1x128x2xf32, #tpu.memory_space<vmem>>, vector<1x128x2xf32>
    %32 = vector.shape_cast %31 : vector<1x128x2xf32> to vector<128x2xf32>
    %c0_20 = arith.constant 0 : index
    %c0_21 = arith.constant 0 : index
    %c0_22 = arith.constant 0 : index
    %33 = vector.load %arg11[%c0_20, %c0_21, %c0_22] : memref<1x2x128xf32, #tpu.memory_space<vmem>>, vector<1x2x128xf32>
    %34 = vector.shape_cast %33 : vector<1x2x128xf32> to vector<2x128xf32>
    %c0_23 = arith.constant 0 : index
    %c0_24 = arith.constant 0 : index
    %c0_25 = arith.constant 0 : index
    %35 = vector.load %arg10[%c0_23, %c0_24, %c0_25] : memref<1x1x128xf32, #tpu.memory_space<vmem>>, vector<1x1x128xf32>
    %36 = vector.shape_cast %35 : vector<1x1x128xf32> to vector<1x128xf32>
    %37 = vector.broadcast %25 : vector<128x1xf32> to vector<128x128xf32>
    %38 = vector.broadcast %36 : vector<1x128xf32> to vector<128x128xf32>
    %39 = arith.mulf %37, %38 : vector<128x128xf32>
    %40 = arith.addf %17, %39 : vector<128x128xf32>
    %41 = vector.extract_strided_slice %32 {offsets = [0, 0], sizes = [128, 1], strides = [1, 1]} : vector<128x2xf32> to vector<128x1xf32>
    %42 = vector.extract_strided_slice %34 {offsets = [0, 0], sizes = [1, 128], strides = [1, 1]} : vector<2x128xf32> to vector<1x128xf32>
    %43 = vector.broadcast %41 : vector<128x1xf32> to vector<128x128xf32>
    %44 = vector.broadcast %42 : vector<1x128xf32> to vector<128x128xf32>
    %45 = arith.mulf %43, %44 : vector<128x128xf32>
    %46 = arith.addf %40, %45 : vector<128x128xf32>
    %47 = vector.extract_strided_slice %32 {offsets = [0, 1], sizes = [128, 1], strides = [1, 1]} : vector<128x2xf32> to vector<128x1xf32>
    %48 = vector.extract_strided_slice %34 {offsets = [1, 0], sizes = [1, 128], strides = [1, 1]} : vector<2x128xf32> to vector<1x128xf32>
    %49 = vector.broadcast %47 : vector<128x1xf32> to vector<128x128xf32>
    %50 = vector.broadcast %48 : vector<1x128xf32> to vector<128x128xf32>
    %51 = arith.mulf %49, %50 : vector<128x128xf32>
    %52 = arith.addf %46, %51 : vector<128x128xf32>
    %c0_26 = arith.constant 0 : index
    %c0_27 = arith.constant 0 : index
    %c0_28 = arith.constant 0 : index
    %53 = vector.load %arg12[%c0_26, %c0_27, %c0_28] : memref<1x1x128xf32, #tpu.memory_space<vmem>>, vector<1x1x128xf32>
    %54 = vector.shape_cast %53 : vector<1x1x128xf32> to vector<1x128xf32>
    %55 = vector.broadcast %54 : vector<1x128xf32> to vector<128x128xf32>
    %56 = arith.addf %52, %55 : vector<128x128xf32>
    %cst_29 = arith.constant 0.00999999977 : f32
    %57 = vector.broadcast %cst_29 : f32 to vector<128x128xf32>
    %58 = arith.mulf %57, %56 : vector<128x128xf32>
    %59 = arith.maximumf %56, %58 : vector<128x128xf32>
    %60 = arith.truncf %59 : vector<128x128xf32> to vector<128x128xbf16>
    %c0_30 = arith.constant 0 : index
    %c0_31 = arith.constant 0 : index
    %c0_32 = arith.constant 0 : index
    %61 = vector.load %arg13[%c0_30, %c0_31, %c0_32] : memref<1x128x128xbf16, #tpu.memory_space<vmem>>, vector<1x128x128xbf16>
    %62 = vector.shape_cast %61 : vector<1x128x128xbf16> to vector<128x128xbf16>
    %cst_33 = arith.constant dense<0.000000e+00> : vector<128x128xf32>
    %63 = tpu.matmul %60, %62, %cst_33 {dimension_numbers = #tpu.dot_dimension_numbers<[1], [0], [0], [1], [0, 0, 1, 1], [], []>} : vector<128x128xbf16>, vector<128x128xbf16>, vector<128x128xf32> -> vector<128x128xf32>
    %c0_34 = arith.constant 0 : index
    %c0_35 = arith.constant 0 : index
    %c0_36 = arith.constant 0 : index
    %64 = vector.load %arg14[%c0_34, %c0_35, %c0_36] : memref<1x1x128xf32, #tpu.memory_space<vmem>>, vector<1x1x128xf32>
    %65 = vector.shape_cast %64 : vector<1x1x128xf32> to vector<1x128xf32>
    %66 = vector.broadcast %65 : vector<1x128xf32> to vector<128x128xf32>
    %67 = arith.addf %63, %66 : vector<128x128xf32>
    %cst_37 = arith.constant 0.00999999977 : f32
    %68 = vector.broadcast %cst_37 : f32 to vector<128x128xf32>
    %69 = arith.mulf %68, %67 : vector<128x128xf32>
    %70 = arith.maximumf %67, %69 : vector<128x128xf32>
    %71 = arith.truncf %70 : vector<128x128xf32> to vector<128x128xbf16>
    %c0_38 = arith.constant 0 : index
    %c0_39 = arith.constant 0 : index
    %c0_40 = arith.constant 0 : index
    %72 = vector.load %arg15[%c0_38, %c0_39, %c0_40] : memref<1x128x128xbf16, #tpu.memory_space<vmem>>, vector<1x128x128xbf16>
    %73 = vector.shape_cast %72 : vector<1x128x128xbf16> to vector<128x128xbf16>
    %cst_41 = arith.constant dense<0.000000e+00> : vector<128x128xf32>
    %74 = tpu.matmul %71, %73, %cst_41 {dimension_numbers = #tpu.dot_dimension_numbers<[1], [0], [0], [1], [0, 0, 1, 1], [], []>} : vector<128x128xbf16>, vector<128x128xbf16>, vector<128x128xf32> -> vector<128x128xf32>
    %c0_42 = arith.constant 0 : index
    %c0_43 = arith.constant 0 : index
    %c0_44 = arith.constant 0 : index
    %75 = vector.load %arg16[%c0_42, %c0_43, %c0_44] : memref<1x1x128xf32, #tpu.memory_space<vmem>>, vector<1x1x128xf32>
    %76 = vector.shape_cast %75 : vector<1x1x128xf32> to vector<1x128xf32>
    %77 = vector.broadcast %76 : vector<1x128xf32> to vector<128x128xf32>
    %78 = arith.addf %74, %77 : vector<128x128xf32>
    %cst_45 = arith.constant 0.00999999977 : f32
    %79 = vector.broadcast %cst_45 : f32 to vector<128x128xf32>
    %80 = arith.mulf %79, %78 : vector<128x128xf32>
    %81 = arith.maximumf %78, %80 : vector<128x128xf32>
    %c0_46 = arith.constant 0 : index
    %c0_47 = arith.constant 0 : index
    %c0_48 = arith.constant 0 : index
    %82 = vector.load %arg17[%c0_46, %c0_47, %c0_48] : memref<1x1x128xf32, #tpu.memory_space<vmem>>, vector<1x1x128xf32>
    %83 = vector.shape_cast %82 : vector<1x1x128xf32> to vector<1x128xf32>
    %84 = vector.broadcast %83 : vector<1x128xf32> to vector<128x128xf32>
    %85 = arith.mulf %81, %84 : vector<128x128xf32>
    %cst_49 = arith.constant dense<0.000000e+00> : vector<128xf32>
    %86 = vector.multi_reduction <add>, %85, %cst_49 [1] : vector<128x128xf32> to vector<128xf32>
    %87 = vector.shape_cast %86 : vector<128xf32> to vector<128x1xf32>
    %c0_50 = arith.constant 0 : index
    %c0_51 = arith.constant 0 : index
    %c0_52 = arith.constant 0 : index
    %88 = vector.load %arg18[%c0_50, %c0_51, %c0_52] : memref<1x1x1xf32, #tpu.memory_space<vmem>>, vector<1x1x1xf32>
    %89 = vector.shape_cast %88 : vector<1x1x1xf32> to vector<1x1xf32>
    %90 = vector.broadcast %89 : vector<1x1xf32> to vector<128x1xf32>
    %91 = arith.addf %87, %90 : vector<128x1xf32>
    %92 = arith.mulf %30, %91 : vector<128x1xf32>
    %93 = vector.broadcast %92 : vector<128x1xf32> to vector<128x2xf32>
    %94 = arith.mulf %20, %93 : vector<128x2xf32>
    %c0_53 = arith.constant 0 : index
    %c0_54 = arith.constant 0 : index
    %c0_55 = arith.constant 0 : index
    %95 = vector.load %arg7[%c0_53, %c0_54, %c0_55] : memref<1x64x128xf32, #tpu.memory_space<vmem>>, vector<1x64x128xf32>
    %96 = vector.shape_cast %95 : vector<1x64x128xf32> to vector<64x128xf32>
    %cst_56 = arith.constant dense<0.000000e+00> : vector<64x2xf32>
    %97 = tpu.matmul %96, %94, %cst_56 {dimension_numbers = #tpu.dot_dimension_numbers<[1], [0], [0], [1], [0, 0, 1, 1], [], []>} : vector<64x128xf32>, vector<128x2xf32>, vector<64x2xf32> -> vector<64x2xf32>
    %98 = arith.addf %4, %97 : vector<64x2xf32>
    %c0_57 = arith.constant 0 : index
    %c0_58 = arith.constant 0 : index
    %99 = vector.load %arg29[%c0_57, %c0_58] : memref<64x2xf32, #tpu.memory_space<vmem>>, vector<64x2xf32>
    tpu.vector_store %arg29[%c0_57, %c0_58], %98 {strides = array<i32>} : memref<64x2xf32, #tpu.memory_space<vmem>>, vector<64x2xf32>,
    %c0_59 = arith.constant 0 : index
    %c0_60 = arith.constant 0 : index
    %c0_61 = arith.constant 0 : index
    %100 = vector.load %arg6[%c0_59, %c0_60, %c0_61] : memref<1x64x128xbf16, #tpu.memory_space<vmem>>, vector<1x64x128xbf16>
    %101 = vector.shape_cast %100 : vector<1x64x128xbf16> to vector<64x128xbf16>
    %102 = arith.truncf %70 : vector<128x128xf32> to vector<128x128xbf16>
    %cst_62 = arith.constant dense<0.000000e+00> : vector<64x128xf32>
    %103 = tpu.matmul %101, %102, %cst_62 {dimension_numbers = #tpu.dot_dimension_numbers<[1], [0], [0], [1], [0, 0, 1, 1], [], []>} : vector<64x128xbf16>, vector<128x128xbf16>, vector<64x128xf32> -> vector<64x128xf32>
    %104 = arith.truncf %103 : vector<64x128xf32> to vector<64x128xbf16>
    %c0_63 = arith.constant 0 : index
    %c0_64 = arith.constant 0 : index
    %c0_65 = arith.constant 0 : index
    %105 = vector.load %arg19[%c0_63, %c0_64, %c0_65] : memref<1x128x128xbf16, #tpu.memory_space<vmem>>, vector<1x128x128xbf16>
    %106 = vector.shape_cast %105 : vector<1x128x128xbf16> to vector<128x128xbf16>
    %cst_66 = arith.constant dense<0.000000e+00> : vector<64x128xf32>
    %107 = tpu.matmul %104, %106, %cst_66 {dimension_numbers = #tpu.dot_dimension_numbers<[1], [0], [0], [1], [0, 0, 1, 1], [], []>} : vector<64x128xbf16>, vector<128x128xbf16>, vector<64x128xf32> -> vector<64x128xf32>
    %108 = arith.addf %11, %107 : vector<64x128xf32>
    %c0_67 = arith.constant 0 : index
    %c0_68 = arith.constant 0 : index
    %c0_69 = arith.constant 0 : index
    %109 = vector.load %arg20[%c0_67, %c0_68, %c0_69] : memref<1x1x128xf32, #tpu.memory_space<vmem>>, vector<1x1x128xf32>
    %110 = vector.shape_cast %109 : vector<1x1x128xf32> to vector<1x128xf32>
    %111 = vector.broadcast %110 : vector<1x128xf32> to vector<64x128xf32>
    %112 = arith.addf %108, %111 : vector<64x128xf32>
    %cst_70 = arith.constant 0.00999999977 : f32
    %113 = vector.broadcast %cst_70 : f32 to vector<64x128xf32>
    %114 = arith.mulf %113, %112 : vector<64x128xf32>
    %115 = arith.maximumf %112, %114 : vector<64x128xf32>
    %116 = arith.truncf %115 : vector<64x128xf32> to vector<64x128xbf16>
    %c0_71 = arith.constant 0 : index
    %c0_72 = arith.constant 0 : index
    %c0_73 = arith.constant 0 : index
    %117 = vector.load %arg21[%c0_71, %c0_72, %c0_73] : memref<1x128x128xbf16, #tpu.memory_space<vmem>>, vector<1x128x128xbf16>
    %118 = vector.shape_cast %117 : vector<1x128x128xbf16> to vector<128x128xbf16>
    %cst_74 = arith.constant dense<0.000000e+00> : vector<64x128xf32>
    %119 = tpu.matmul %116, %118, %cst_74 {dimension_numbers = #tpu.dot_dimension_numbers<[1], [0], [0], [1], [0, 0, 1, 1], [], []>} : vector<64x128xbf16>, vector<128x128xbf16>, vector<64x128xf32> -> vector<64x128xf32>
    %c0_75 = arith.constant 0 : index
    %c0_76 = arith.constant 0 : index
    %c0_77 = arith.constant 0 : index
    %120 = vector.load %arg22[%c0_75, %c0_76, %c0_77] : memref<1x1x128xf32, #tpu.memory_space<vmem>>, vector<1x1x128xf32>
    %121 = vector.shape_cast %120 : vector<1x1x128xf32> to vector<1x128xf32>
    %122 = vector.broadcast %121 : vector<1x128xf32> to vector<64x128xf32>
    %123 = arith.addf %119, %122 : vector<64x128xf32>
    %124 = arith.addf %123, %12 : vector<64x128xf32>
    %cst_78 = arith.constant dense<0.000000e+00> : vector<128xf32>
    %125 = vector.multi_reduction <add>, %124, %cst_78 [0] : vector<64x128xf32> to vector<128xf32>
    %126 = vector.shape_cast %125 : vector<128xf32> to vector<1x128xf32>
    %cst_79 = arith.constant 6.400000e+01 : f32
    %127 = vector.broadcast %cst_79 : f32 to vector<1x128xf32>
    %128 = arith.divf %126, %127 : vector<1x128xf32>
    %129 = vector.broadcast %128 : vector<1x128xf32> to vector<64x128xf32>
    %130 = arith.subf %124, %129 : vector<64x128xf32>
    %131 = vector.broadcast %128 : vector<1x128xf32> to vector<64x128xf32>
    %132 = arith.subf %124, %131 : vector<64x128xf32>
    %133 = arith.mulf %130, %132 : vector<64x128xf32>
    %cst_80 = arith.constant dense<0.000000e+00> : vector<128xf32>
    %134 = vector.multi_reduction <add>, %133, %cst_80 [0] : vector<64x128xf32> to vector<128xf32>
    %135 = vector.shape_cast %134 : vector<128xf32> to vector<1x128xf32>
    %cst_81 = arith.constant 6.400000e+01 : f32
    %136 = vector.broadcast %cst_81 : f32 to vector<1x128xf32>
    %137 = arith.divf %135, %136 : vector<1x128xf32>
    %138 = vector.broadcast %128 : vector<1x128xf32> to vector<64x128xf32>
    %139 = arith.subf %124, %138 : vector<64x128xf32>
    %cst_82 = arith.constant 9.99999974E-6 : f32
    %140 = vector.broadcast %cst_82 : f32 to vector<1x128xf32>
    %141 = arith.addf %137, %140 : vector<1x128xf32>
    %142 = math.rsqrt %141 : vector<1x128xf32>
    %143 = vector.broadcast %142 : vector<1x128xf32> to vector<64x128xf32>
    %144 = arith.mulf %139, %143 : vector<64x128xf32>
    %c0_83 = arith.constant 0 : index
    %c0_84 = arith.constant 0 : index
    %c0_85 = arith.constant 0 : index
    %145 = vector.load %arg23[%c0_83, %c0_84, %c0_85] : memref<1x1x128xf32, #tpu.memory_space<vmem>>, vector<1x1x128xf32>
    %146 = vector.shape_cast %145 : vector<1x1x128xf32> to vector<1x128xf32>
    %147 = vector.broadcast %146 : vector<1x128xf32> to vector<64x128xf32>
    %148 = arith.mulf %144, %147 : vector<64x128xf32>
    %c0_86 = arith.constant 0 : index
    %c0_87 = arith.constant 0 : index
    %c0_88 = arith.constant 0 : index
    %149 = vector.load %arg24[%c0_86, %c0_87, %c0_88] : memref<1x1x128xf32, #tpu.memory_space<vmem>>, vector<1x1x128xf32>
    %150 = vector.shape_cast %149 : vector<1x1x128xf32> to vector<1x128xf32>
    %151 = vector.broadcast %150 : vector<1x128xf32> to vector<64x128xf32>
    %152 = arith.addf %148, %151 : vector<64x128xf32>
    %cst_89 = arith.constant 0.00999999977 : f32
    %153 = vector.broadcast %cst_89 : f32 to vector<64x128xf32>
    %154 = arith.mulf %153, %152 : vector<64x128xf32>
    %155 = arith.maximumf %152, %154 : vector<64x128xf32>
    %c0_90 = arith.constant 0 : index
    %c0_91 = arith.constant 0 : index
    %156 = vector.load %arg28[%c0_90, %c0_91] : memref<64x128xf32, #tpu.memory_space<vmem>>, vector<64x128xf32>
    tpu.vector_store %arg28[%c0_90, %c0_91], %155 {strides = array<i32>} : memref<64x128xf32, #tpu.memory_space<vmem>>, vector<64x128xf32>,
    %c1_i32 = arith.constant 1 : i32
    %157 = arith.cmpi eq, %arg1, %c1_i32 : i32
    %158 = arith.extui %157 : i1 to i32
    %c0_i32_92 = arith.constant 0 : i32
    %159 = arith.cmpi ne, %158, %c0_i32_92 : i32
    scf.if %159 {
      %c0_93 = arith.constant 0 : index
      %c0_94 = arith.constant 0 : index
      %160 = vector.load %arg25[%c0_93, %c0_94] : memref<2x128xf32, #tpu.memory_space<vmem>>, vector<1x128xf32>
      %161 = vector.broadcast %160 : vector<1x128xf32> to vector<64x128xf32>
      %162 = arith.mulf %155, %161 : vector<64x128xf32>
      %cst_95 = arith.constant dense<0.000000e+00> : vector<64xf32>
      %163 = vector.multi_reduction <add>, %162, %cst_95 [1] : vector<64x128xf32> to vector<64xf32>
      %164 = vector.shape_cast %163 : vector<64xf32> to vector<64x1xf32>
      %c0_96 = arith.constant 0 : index
      %c0_97 = arith.constant 0 : index
      %165 = vector.load %arg26[%c0_96, %c0_97] : memref<1x2xf32, #tpu.memory_space<vmem>>, vector<1x1xf32>
      %166 = vector.broadcast %165 : vector<1x1xf32> to vector<64x1xf32>
      %167 = arith.addf %164, %166 : vector<64x1xf32>
      %c1 = arith.constant 1 : index
      %c0_98 = arith.constant 0 : index
      %168 = vector.load %arg25[%c1, %c0_98] : memref<2x128xf32, #tpu.memory_space<vmem>>, vector<1x128xf32>
      %169 = vector.broadcast %168 : vector<1x128xf32> to vector<64x128xf32>
      %170 = arith.mulf %155, %169 : vector<64x128xf32>
      %cst_99 = arith.constant dense<0.000000e+00> : vector<64xf32>
      %171 = vector.multi_reduction <add>, %170, %cst_99 [1] : vector<64x128xf32> to vector<64xf32>
      %172 = vector.shape_cast %171 : vector<64xf32> to vector<64x1xf32>
      %c0_100 = arith.constant 0 : index
      %c1_101 = arith.constant 1 : index
      %173 = vector.load %arg26[%c0_100, %c1_101] : memref<1x2xf32, #tpu.memory_space<vmem>>, vector<1x1xf32>
      %174 = vector.broadcast %173 : vector<1x1xf32> to vector<64x1xf32>
      %175 = arith.addf %172, %174 : vector<64x1xf32>
      %176 = tpu.iota {dimensions = array<i32: 1>} : vector<64x128xi32>
      %177 = vector.extract_strided_slice %98 {offsets = [0, 0], sizes = [64, 1], strides = [1, 1]} : vector<64x2xf32> to vector<64x1xf32>
      %c0_i32_102 = arith.constant 0 : i32
      %178 = vector.broadcast %c0_i32_102 : i32 to vector<64x128xi32>
      %179 = arith.cmpi eq, %176, %178 : vector<64x128xi32>
      %180 = arith.extui %179 : vector<64x128xi1> to vector<64x128xi32>
      %181 = arith.sitofp %180 : vector<64x128xi32> to vector<64x128xf32>
      %182 = vector.broadcast %177 : vector<64x1xf32> to vector<64x128xf32>
      %183 = arith.mulf %182, %181 : vector<64x128xf32>
      %184 = vector.extract_strided_slice %98 {offsets = [0, 1], sizes = [64, 1], strides = [1, 1]} : vector<64x2xf32> to vector<64x1xf32>
      %c1_i32_103 = arith.constant 1 : i32
      %185 = vector.broadcast %c1_i32_103 : i32 to vector<64x128xi32>
      %186 = arith.cmpi eq, %176, %185 : vector<64x128xi32>
      %187 = arith.extui %186 : vector<64x128xi1> to vector<64x128xi32>
      %188 = arith.sitofp %187 : vector<64x128xi32> to vector<64x128xf32>
      %189 = vector.broadcast %184 : vector<64x1xf32> to vector<64x128xf32>
      %190 = arith.mulf %189, %188 : vector<64x128xf32>
      %191 = arith.addf %183, %190 : vector<64x128xf32>
      %c2_i32 = arith.constant 2 : i32
      %192 = vector.broadcast %c2_i32 : i32 to vector<64x128xi32>
      %193 = arith.cmpi eq, %176, %192 : vector<64x128xi32>
      %194 = arith.extui %193 : vector<64x128xi1> to vector<64x128xi32>
      %195 = arith.sitofp %194 : vector<64x128xi32> to vector<64x128xf32>
      %196 = vector.broadcast %167 : vector<64x1xf32> to vector<64x128xf32>
      %197 = arith.mulf %196, %195 : vector<64x128xf32>
      %198 = arith.addf %191, %197 : vector<64x128xf32>
      %c3_i32 = arith.constant 3 : i32
      %199 = vector.broadcast %c3_i32 : i32 to vector<64x128xi32>
      %200 = arith.cmpi eq, %176, %199 : vector<64x128xi32>
      %201 = arith.extui %200 : vector<64x128xi1> to vector<64x128xi32>
      %202 = arith.sitofp %201 : vector<64x128xi32> to vector<64x128xf32>
      %203 = vector.broadcast %175 : vector<64x1xf32> to vector<64x128xf32>
      %204 = arith.mulf %203, %202 : vector<64x128xf32>
      %205 = arith.addf %198, %204 : vector<64x128xf32>
      %c0_104 = arith.constant 0 : index
      %c0_105 = arith.constant 0 : index
      %c0_106 = arith.constant 0 : index
      %206 = vector.load %arg27[%c0_104, %c0_105, %c0_106] : memref<1x64x128xf32, #tpu.memory_space<vmem>>, vector<1x64x128xf32>
      %207 = vector.shape_cast %206 : vector<1x64x128xf32> to vector<64x128xf32>
      %208 = vector.shape_cast %205 : vector<64x128xf32> to vector<1x64x128xf32>
      tpu.vector_store %arg27[%c0_104, %c0_105, %c0_106], %208 {strides = array<i32>} : memref<1x64x128xf32, #tpu.memory_space<vmem>>, vector<1x64x128xf32>,
    } else {
    }
    return
  }
  func.func @transform_0(%arg0: i32, %arg1: i32) -> (i32, i32, i32) {
    %c0_i32 = arith.constant 0 : i32
    %c0_i32_0 = arith.constant 0 : i32
    %c0_i32_1 = arith.constant 0 : i32
    return %arg0, %c0_i32, %c0_i32_0 : i32, i32, i32
  }
  func.func @transform_1(%arg0: i32, %arg1: i32) -> (i32, i32, i32) {
    %c0_i32 = arith.constant 0 : i32
    %c0_i32_0 = arith.constant 0 : i32
    %c0_i32_1 = arith.constant 0 : i32
    return %arg0, %c0_i32, %c0_i32_0 : i32, i32, i32
  }
  func.func @transform_2(%arg0: i32, %arg1: i32) -> (i32, i32, i32) {
    %c0_i32 = arith.constant 0 : i32
    %c0_i32_0 = arith.constant 0 : i32
    %c0_i32_1 = arith.constant 0 : i32
    return %arg0, %c0_i32, %c0_i32_0 : i32, i32, i32
  }
  func.func @transform_3(%arg0: i32, %arg1: i32) -> (i32, i32, i32) {
    %c0_i32 = arith.constant 0 : i32
    %c0_i32_0 = arith.constant 0 : i32
    %c0_i32_1 = arith.constant 0 : i32
    return %arg0, %c0_i32, %c0_i32_0 : i32, i32, i32
  }
  func.func @transform_4(%arg0: i32, %arg1: i32) -> (i32, i32, i32) {
    %c0_i32 = arith.constant 0 : i32
    %c0_i32_0 = arith.constant 0 : i32
    %c0_i32_1 = arith.constant 0 : i32
    return %arg0, %c0_i32, %c0_i32_0 : i32, i32, i32
  }
  func.func @transform_5(%arg0: i32, %arg1: i32) -> (i32, i32, i32) {
    %c0_i32 = arith.constant 0 : i32
    %c0_i32_0 = arith.constant 0 : i32
    %c0_i32_1 = arith.constant 0 : i32
    return %arg0, %c0_i32, %c0_i32_0 : i32, i32, i32
  }
  func.func @transform_6(%arg0: i32, %arg1: i32) -> (i32, i32, i32) {
    %c0_i32 = arith.constant 0 : i32
    %c0_i32_0 = arith.constant 0 : i32
    %c0_i32_1 = arith.constant 0 : i32
    return %arg0, %c0_i32, %c0_i32_0 : i32, i32, i32
  }
  func.func @transform_7(%arg0: i32, %arg1: i32) -> (i32, i32, i32) {
    %c0_i32 = arith.constant 0 : i32
    %c0_i32_0 = arith.constant 0 : i32
    %c0_i32_1 = arith.constant 0 : i32
    return %arg1, %c0_i32, %c0_i32_0 : i32, i32, i32
  }
  func.func @transform_8(%arg0: i32, %arg1: i32) -> (i32, i32, i32) {
    %c0_i32 = arith.constant 0 : i32
    %c0_i32_0 = arith.constant 0 : i32
    %c0_i32_1 = arith.constant 0 : i32
    return %arg1, %c0_i32, %c0_i32_0 : i32, i32, i32
  }
  func.func @transform_9(%arg0: i32, %arg1: i32) -> (i32, i32, i32) {
    %c0_i32 = arith.constant 0 : i32
    %c0_i32_0 = arith.constant 0 : i32
    %c0_i32_1 = arith.constant 0 : i32
    return %arg1, %c0_i32, %c0_i32_0 : i32, i32, i32
  }
  func.func @transform_10(%arg0: i32, %arg1: i32) -> (i32, i32, i32) {
    %c0_i32 = arith.constant 0 : i32
    %c0_i32_0 = arith.constant 0 : i32
    %c0_i32_1 = arith.constant 0 : i32
    return %arg1, %c0_i32, %c0_i32_0 : i32, i32, i32
  }
  func.func @transform_11(%arg0: i32, %arg1: i32) -> (i32, i32, i32) {
    %c0_i32 = arith.constant 0 : i32
    %c0_i32_0 = arith.constant 0 : i32
    %c0_i32_1 = arith.constant 0 : i32
    return %arg1, %c0_i32, %c0_i32_0 : i32, i32, i32
  }
  func.func @transform_12(%arg0: i32, %arg1: i32) -> (i32, i32, i32) {
    %c0_i32 = arith.constant 0 : i32
    %c0_i32_0 = arith.constant 0 : i32
    %c0_i32_1 = arith.constant 0 : i32
    return %arg1, %c0_i32, %c0_i32_0 : i32, i32, i32
  }
  func.func @transform_13(%arg0: i32, %arg1: i32) -> (i32, i32, i32) {
    %c0_i32 = arith.constant 0 : i32
    %c0_i32_0 = arith.constant 0 : i32
    %c0_i32_1 = arith.constant 0 : i32
    return %arg1, %c0_i32, %c0_i32_0 : i32, i32, i32
  }
  func.func @transform_14(%arg0: i32, %arg1: i32) -> (i32, i32, i32) {
    %c0_i32 = arith.constant 0 : i32
    %c0_i32_0 = arith.constant 0 : i32
    %c0_i32_1 = arith.constant 0 : i32
    return %arg1, %c0_i32, %c0_i32_0 : i32, i32, i32
  }
  func.func @transform_15(%arg0: i32, %arg1: i32) -> (i32, i32, i32) {
    %c0_i32 = arith.constant 0 : i32
    %c0_i32_0 = arith.constant 0 : i32
    %c0_i32_1 = arith.constant 0 : i32
    return %arg1, %c0_i32, %c0_i32_0 : i32, i32, i32
  }
  func.func @transform_16(%arg0: i32, %arg1: i32) -> (i32, i32, i32) {
    %c0_i32 = arith.constant 0 : i32
    %c0_i32_0 = arith.constant 0 : i32
    %c0_i32_1 = arith.constant 0 : i32
    return %arg1, %c0_i32, %c0_i32_0 : i32, i32, i32
  }
  func.func @transform_17(%arg0: i32, %arg1: i32) -> (i32, i32, i32) {
    %c0_i32 = arith.constant 0 : i32
    %c0_i32_0 = arith.constant 0 : i32
    %c0_i32_1 = arith.constant 0 : i32
    return %arg1, %c0_i32, %c0_i32_0 : i32, i32, i32
  }
  func.func @transform_18(%arg0: i32, %arg1: i32) -> (i32, i32, i32) {
    %c0_i32 = arith.constant 0 : i32
    %c0_i32_0 = arith.constant 0 : i32
    %c0_i32_1 = arith.constant 0 : i32
    return %arg1, %c0_i32, %c0_i32_0 : i32, i32, i32
  }
  func.func @transform_19(%arg0: i32, %arg1: i32) -> (i32, i32, i32) {
    %c0_i32 = arith.constant 0 : i32
    %c0_i32_0 = arith.constant 0 : i32
    %c0_i32_1 = arith.constant 0 : i32
    return %arg1, %c0_i32, %c0_i32_0 : i32, i32, i32
  }
  func.func @transform_20(%arg0: i32, %arg1: i32) -> (i32, i32, i32) {
    %c0_i32 = arith.constant 0 : i32
    %c0_i32_0 = arith.constant 0 : i32
    %c0_i32_1 = arith.constant 0 : i32
    return %arg1, %c0_i32, %c0_i32_0 : i32, i32, i32
  }
  func.func @transform_21(%arg0: i32, %arg1: i32) -> (i32, i32, i32) {
    %c0_i32 = arith.constant 0 : i32
    %c0_i32_0 = arith.constant 0 : i32
    %c0_i32_1 = arith.constant 0 : i32
    return %arg1, %c0_i32, %c0_i32_0 : i32, i32, i32
  }
  func.func @transform_22(%arg0: i32, %arg1: i32) -> (i32, i32, i32) {
    %c0_i32 = arith.constant 0 : i32
    %c0_i32_0 = arith.constant 0 : i32
    %c0_i32_1 = arith.constant 0 : i32
    return %arg1, %c0_i32, %c0_i32_0 : i32, i32, i32
  }
  func.func @transform_23(%arg0: i32, %arg1: i32) -> (i32, i32) {
    %c0_i32 = arith.constant 0 : i32
    %c0_i32_0 = arith.constant 0 : i32
    %c0_i32_1 = arith.constant 0 : i32
    return %c0_i32, %c0_i32_0 : i32, i32
  }
  func.func @transform_24(%arg0: i32, %arg1: i32) -> (i32, i32) {
    %c0_i32 = arith.constant 0 : i32
    %c0_i32_0 = arith.constant 0 : i32
    %c0_i32_1 = arith.constant 0 : i32
    return %c0_i32, %c0_i32_0 : i32, i32
  }
  func.func @transform_25(%arg0: i32, %arg1: i32) -> (i32, i32, i32) {
    %c0_i32 = arith.constant 0 : i32
    %c0_i32_0 = arith.constant 0 : i32
    %c0_i32_1 = arith.constant 0 : i32
    return %arg0, %c0_i32, %c0_i32_0 : i32, i32, i32
  }
}

</mosaic_0001>

<bundles_post_ra>
// kernel: tpu_custom_call.1
= control target key start
LH: loop header
LB: loop body
LE: loop exit
PB: predicated region body
PF: predicated region fallthrough
CT: control target
= control target key end

     0   :  { %s7679_s0 = inlined_call_operand.vmem [shape: f32[2,64,128], index: 0, kind: input, shape index: {}]   ;;  %s7680_s1 = inlined_call_operand.vmem [shape: f32[2,64,2], index: 1, kind: input, shape index: {}]   ;;  %s7681_s2 = inlined_call_operand.vmem [shape: bf16[2,128,128], index: 2, kind: input, shape index: {}]   ;;  %s7682_s3 = inlined_call_operand.vmem [shape: f32[2,128,64], index: 3, kind: input, shape index: {}]   ;;  %s7683_s4 = inlined_call_operand.hbm [shape: bf16[2,64,128], index: 4, kind: input, shape index: {}]   ;;  %s7684_s5 = inlined_call_operand.hbm [shape: f32[2,64,128], index: 5, kind: input, shape index: {}]   ;;  %s7685_s6 = inlined_call_operand.vmem [shape: f32[2,128,2], index: 6, kind: input, shape index: {}]   ;;  %s7686_s7 = inlined_call_operand.vmem [shape: bf16[2,128,512], index: 7, kind: input, shape index: {}]   ;;  %s7687_s8 = inlined_call_operand.vmem [shape: f32[2,1,128], index: 8, kind: input, shape index: {}]   ;;  %s7688_s9 = inlined_call_operand.vmem [shape: f32[2,2,128], index: 9, kind: input, shape index: {}]   ;;  %s7689_s10 = inlined_call_operand.vmem [shape: f32[2,1,128], index: 10, kind: input, shape index: {}]   ;;  %s7690_s11 = inlined_call_operand.hbm [shape: bf16[2,128,128], index: 11, kind: input, shape index: {}]   ;;  %s7691_s12 = inlined_call_operand.vmem [shape: f32[2,1,128], index: 12, kind: input, shape index: {}]   ;;  %s7692_s13 = inlined_call_operand.hbm [shape: bf16[2,128,128], index: 13, kind: input, shape index: {}]   ;;  %s7693_s14 = inlined_call_operand.vmem [shape: f32[2,1,128], index: 14, kind: input, shape index: {}]   ;;  %s7694_s15 = inlined_call_operand.vmem [shape: f32[2,1,128], index: 15, kind: input, shape index: {}]   ;;  %s7695_s16 = inlined_call_operand.vmem [shape: f32[2,1,1], index: 16, kind: input, shape index: {}]   ;;  %s7696_s17 = inlined_call_operand.hbm [shape: bf16[2,128,128], index: 17, kind: input, shape index: {}]   ;;  %s7697_s18 = inlined_call_operand.vmem [shape: f32[2,1,128], index: 18, kind: input, shape index: {}]   ;;  %s7698_s19 = inlined_call_operand.hbm [shape: bf16[2,128,128], index: 19, kind: input, shape index: {}]   ;;  %s7699_s20 = inlined_call_operand.vmem [shape: f32[2,1,128], index: 20, kind: input, shape index: {}]   ;;  %s7700_s21 = inlined_call_operand.vmem [shape: f32[2,1,128], index: 21, kind: input, shape index: {}]   ;;  %s7701_s22 = inlined_call_operand.vmem [shape: f32[2,1,128], index: 22, kind: input, shape index: {}]   ;;  %s7702_s23 = inlined_call_operand.vmem [shape: f32[2,128], index: 23, kind: input, shape index: {}]   ;;  %s7703_s24 = inlined_call_operand.vmem [shape: f32[1,2], index: 24, kind: input, shape index: {}]   ;;  %s7704_s25 = inlined_call_operand.hbm [shape: f32[2,64,128], index: 25, kind: output, shape index: {}]  }
   0x1   :  { %7793 = sst [smem:[#allocation90_spill]] %s7679_s0 }
   0x2   :  { %7794 = sst [smem:[#allocation91_spill]] %s7680_s1 }
   0x3   :  { %7795 = sst [smem:[#allocation92_spill]] %s7681_s2 }
   0x4   :  { %7796 = sst [smem:[#allocation93_spill]] %s7682_s3 }
   0x5   :  { %7797 = sst [smem:[#allocation94_spill]] %s7683_s4 }
   0x6   :  { %7798 = sst [smem:[#allocation95_spill]] %s7684_s5 }
   0x7   :  { %7799 = sst [smem:[#allocation96_spill]] %s7685_s6 }
   0x8   :  { %7800 = sst [smem:[#allocation97_spill]] %s7686_s7 }
   0x9   :  { %7801 = sst [smem:[#allocation98_spill]] %s7687_s8 }
   0xa   :  { %7802 = sst [smem:[#allocation99_spill]] %s7688_s9 }
   0xb   :  { %7803 = sst [smem:[#allocation100_spill]] %s7689_s10 }
   0xc   :  { %7804 = sst [smem:[#allocation101_spill]] %s7690_s11 }
   0xd   :  { %7805 = sst [smem:[#allocation102_spill]] %s7691_s12 }
   0xe   :  { %7806 = sst [smem:[#allocation103_spill]] %s7692_s13 }
   0xf   :  { %7807 = sst [smem:[#allocation104_spill]] %s7693_s14 }
  0x10   :  { %7808 = sst [smem:[#allocation105_spill]] %s7694_s15 }
  0x11   :  { %7809 = sst [smem:[#allocation106_spill]] %s7695_s16 }
  0x12   :  { %7810 = sst [smem:[#allocation107_spill]] %s7696_s17 }
  0x13   :  { %7811 = sst [smem:[#allocation108_spill]] %s7697_s18 }
  0x14   :  { %7812 = sst [smem:[#allocation109_spill]] %s7698_s19 }
  0x15   :  { %7813 = sst [smem:[#allocation110_spill]] %s7699_s20 }
  0x16   :  { %7814 = sst [smem:[#allocation111_spill]] %s7700_s21 }
  0x17   :  { %7815 = sst [smem:[#allocation112_spill]] %s7701_s22 }
  0x18   :  { %7816 = sst [smem:[#allocation113_spill]] %s7702_s23 }
  0x19   :  { %7817 = sst [smem:[#allocation114_spill]] %s7703_s24 }
  0x1a   :  { %7818 = sst [smem:[#allocation115_spill]] %s7704_s25 }
  0x1b   :  { %30 = vsyncpa [#allocation5], 0 }
  0x1c   :  { %32 = vsyncpa [#allocation5 + $0x1], 0 }
  0x1d   :  { %33 = vsyncpa [#allocation8], 0 }
  0x1e   :  { %35 = vsyncpa [#allocation8 + $0x1], 0 }
  0x1f   :  { %36 = vsyncpa [#allocation11], 0 }
  0x20   :  { %38 = vsyncpa [#allocation11 + $0x1], 0 }
  0x21   :  { %39 = vsyncpa [#allocation14], 0 }
  0x22   :  { %41 = vsyncpa [#allocation14 + $0x1], 0 }
  0x23   :  { %42 = vsyncpa [#allocation6], 0 }
  0x24   :  { %44 = vsyncpa [#allocation6 + $0x1], 0  ;;  %s6048_s29 = smov 0   ;;  %s6050_s2 = smov 0  }
  0x25   :  { %s6052_s6 = smov 0   ;;  %s6054_s30 = smov 0  }
  0x26   :  { %s6056_s7 = smov 0   ;;  %s6058_s3 = smov 0  }
  0x27   :  { %s6060_s26 = smov 0   ;;  %s6062_s1 = smov 0  }
  0x28   :  { %s6064_s8 = smov 0   ;;  %s6066_s27 = smov 0  }
  0x29   :  { %s6068_s4 = smov 0  }
  0x2a LB: > { %7819 = sst [smem:[#allocation22_spill]] %s5861_s2  ;;  %s6104_s28 = sadd.s32 4294967295, %s5897_s4   ;;  %s5897_s4 = sphi %s6068_s4, %s50_s4   ;;  %s5893_s27 = sphi %s6066_s27, %s8029_s27   ;;  %s5889_s8 = sphi %s6064_s8, %s8028_s8   ;;  %s5885_s1 = sphi %s6062_s1, %s8027_s1   ;;  %s5881_s26 = sphi %s6060_s26, %s8026_s26   ;;  %s5877_s3 = sphi %s6058_s3, %s8025_s3   ;;  %s5873_s7 = sphi %s6056_s7, %s8024_s7   ;;  %s5869_s30 = sphi %s6054_s30, %s8023_s30   ;;  %s5865_s6 = sphi %s6052_s6, %s8022_s6   ;;  %s5861_s2 = sphi %s6050_s2, %s8021_s2   ;;  %s5857_s29 = sphi %s6048_s29, %s8020_s29  }
  0x2b   : > { %7820 = sst [smem:[#allocation23_spill]] %s5865_s6  ;;  %s4647_s9 = sadd.s32 4294967294, %s5897_s4  }
  0x2c   : > { %7821 = sst [smem:[#allocation24_spill]] %s5869_s30  ;;  %p180_p0 = scmp.ne.s32.totalorder %s5877_s3, %s5873_s7 }
  0x2d   : > { %7822 = sst [smem:[#allocation25_spill]] %s5873_s7  ;;  %p7715_p1 = scmp.eq.s32.totalorder %s5897_s4, 0 }
  0x2e   : > { %7823 = sst [smem:[#allocation26_spill]] %s5877_s3  ;;  %p186_p2 = scmp.ne.s32.totalorder %s5873_s7, %s5869_s30 }
  0x2f   : > { %7824 = sst [smem:[#allocation27_spill]] %s5881_s26  ;;  %p7714_p3 = scmp.eq.s32.totalorder %s6104_s28, 0 }
  0x30   : > { %7825 = sst [smem:[#allocation28_spill]] %s5885_s1  ;;  %p182_p4 = por %p7715_p1, %p180_p0 }
  0x31   : > { %7826 = sst [smem:[#allocation29_spill]] %s5889_s8  ;;  %p720_p5 = scmp.eq.s32.totalorder %s6104_s28, 3 }
  0x32   : > { %7827 = sst [smem:[#allocation30_spill]] %s5893_s27  ;;  %p6120_p6 = por %p7714_p3, %p186_p2 }
  0x33   : > { %7828 = sst [smem:[#allocation31_spill]] %s5897_s4  ;;  %p726_p7 = scmp.eq.s32.totalorder %s4647_s9, 3 }
  0x34   : > { %s7829_s25 = scalar_select %p6120_p6, 1, 0 }
  0x35   : > { %p6124_p8 = por %p720_p5, %p180_p0  ;;  %p6128_p9 = por %p726_p7, %p186_p2 }
  0x36   : > { %p7713_p10 = scmp.lt.s32.totalorder %s5897_s4, 4  ;;  %s6134_s5 = sand.u32 1, %s5877_s3  }
  0x37   : > { %s7830_s24 = scalar_select %p6124_p8, 1, 0 }
  0x38   : > { %s7832_s0 = scalar_select %p6128_p9, 1, 0 }
  0x39   : > { %7831 = sst [smem:[#allocation32_spill]] %s7830_s24  ;;  %p6139_p11 = pnand %p7713_p10, %p182_p4 }
  0x3a   : > { %7833 = sst [smem:[#allocation33_spill]] %s7832_s0  ;;  %s4653_s9 = sshll.u32 %s6134_s5, 6 }
  0x3b   : > { %s7834_s23 = scalar_select %p6139_p11, 1, 0 }
  0x3c   : > { %s4806_s22 = sshll.u32 %s5893_s27, 10  ;;  %s7835_s20 = sld [smem:[#allocation95_spill]] }
  0x3d   : > { %s809_s0 = scalar_lea.vmem [#allocation7], %s4653_s9  ;;  %s7836_s16 = sand.u32 1, %s5897_s4  }
  0x3e   : > { %s816_s30 = sshll.u32 %s809_s0, 4  ;;  %s6155_s15 = scalar_lea.sflag [#allocation8], %s7836_s16  ;;  %s6150_s30 = int_to_ptr.vmem [resolvable:$true] %s816_s30 }
  0x3f   : > { %p7724_p0 = pneg %p6139_p11 }
  0x42   : > { %s6148_s18 = scalar_lea.hbm %s7835_s20, %s4806_s22  ;;  %s5584_s24 = scalar_lea.hbm %s7835_s20, 2048 }
  0x43   : > { %s5579_s14 = scalar_lea.hbm %s6148_s18, 1024  ;;  %p5585_p5 = scmp.lt.u32.totalorder %s6148_s18, %s7835_s20 }
  0x44   : > { %p5580_p13 = scmp.ne.s32.totalorder %s6148_s18, %s5579_s14  ;;  %p5586_p7 = scmp.lt.u32.totalorder %s5584_s24, %s5579_s14 }
  0x45   : > { %p5588_p3 = scmp.lt.u32.totalorder %s5579_s14, %s6148_s18 }
  0x46   : > { %p5582_p2 = pnand %p7724_p0, %p5580_p13  ;;  %p5587_p10 = por %p5586_p7, %p5585_p5 }
  0x48   : > { %p5583_p4 = pneg %p5582_p2  ;;  %p5589_p1 = por %p5588_p3, %p5587_p10 }
  0x4a   : > { %p5590_p12 = pnand %p5589_p1, %p5583_p4 }
  0x4c   : > { %5593 = shalt.err (!%p5590_p12)
}
  0x4d   : > { %s5594_s16 = scalar_lea.vmem %s6150_s30, 1024  ;;  %s5899_s21 = smov [#allocation7]  }
  0x4e   : > { %p5595_p13 = scmp.ne.s32.totalorder %s6150_s30, %s5594_s16  ;;  %s5599_s22 = sshll.u32 %s5899_s21, 4  ;;  %s5600_s22 = int_to_ptr.vmem [resolvable:$false] %s5599_s22 }
  0x4f   : > { %s5601_s9 = scalar_lea.vmem %s5600_s22, 2048  ;;  %p5602_p8 = scmp.lt.s32.totalorder %s6150_s30, %s5600_s22 }
  0x50   : > { %p5597_p2 = pnand %p5595_p13, %p7724_p0  ;;  %p5603_p5 = scmp.lt.s32.totalorder %s5601_s9, %s5594_s16 }
  0x52   : > { %p5598_p9 = pneg %p5597_p2  ;;  %p5604_p7 = por %p5603_p5, %p5602_p8 }
  0x54   : > { %p5605_p3 = pnand %p5604_p7, %p5598_p9 }
  0x56   : > { %5608 = shalt.err (!%p5605_p3)
}
  0x57   : > { %s5900_s14 = smov 128   ;;  %s5901_s24 = smov 8  }
  0x58   : > { %5270 = dma.hbm_to_vmem [thread:$0]  (!%p6139_p11), %s6148_s18, 1024, %s6150_s30, %s6155_s15, %s5900_s14, %s5900_s14, %s5901_s24  }
  0x59   : > { %p991_p1 = scmp.lt.s32.totalorder %s5897_s4, 5  ;;  %p7837_p8 = scmp.ge.s32.totalorder %s5897_s4, 1 }
  0x5a   : > { %s59_s16 = sadd.s32 1, %s5889_s8  ;;  %s355_s21 = sadd.s32 1, %s5865_s6 }
  0x5b   : > { %p6186_p9 = pnand %p7837_p8, %p991_p1  ;;  %p60_p10 = scmp.ge.s32.totalorder %s59_s16, 2 }
  0x5c   : > { %p362_p12 = scmp.ne.s32.totalorder %s5865_s6, %s5861_s2  ;;  %p368_p4 = scmp.ne.s32.totalorder %s5861_s2, %s5857_s29 }
  0x5d   : > { %s7838_s0 = scalar_select %p6186_p9, 1, 0 }
  0x5e   : > { %s8031_s16 = smov (%p60_p10, %s59_s16), 0  ;;  %s7840_s18 = sadd.s32 1, %s5893_s27 }
  0x5f   : > { %7839 = sst [smem:[#allocation34_spill]] %s8031_s16  ;;  %s8033_s18 = smov (!%p60_p10, %s7840_s18), %s5893_s27 }
  0x60   : > { %s352_s30 = ssub.s32 %s5889_s8, %s8031_s16  ;;  %p7841_p13 = scmp.eq.s32.totalorder %s5897_s4, 0 }
  0x61   : > { %p64_p5 = scmp.ge.s32.totalorder %s8033_s18, 2  ;;  %p353_p7 = scmp.eq.s32.totalorder %s352_s30, 0 }
  0x62   : > { %p364_p2 = por %p362_p12, %p7841_p13  ;;  %p7842_p3 = scmp.eq.s32.totalorder %s6104_s28, 0 }
  0x63   : > { %s8035_s18 = smov (%p64_p5, %s8033_s18), 0  ;;  %s7720_s14 = sand.u32 1, %s5865_s6  }
  0x64   : > { %p6207_p1 = por %p368_p4, %p7842_p3  ;;  %7845 = sst [smem:[#allocation36_spill]] %s8035_s18 }
  0x65   : > { %s6214_s29 = scalar_select %p353_p7, %s5865_s6, %s355_s21  }
  0x66   : > { %s7843_s22 = scalar_select %p6207_p1, 1, 0 }
  0x67   : > { %7846 = sst [smem:[#allocation37_spill]] %s6214_s29  ;;  %s170_s9 = ssub.s32 %s5893_s27, %s8035_s18 }
  0x68   : > { %7844 = sst [smem:[#allocation35_spill]] %s7843_s22  ;;  %p171_p8 = scmp.eq.s32.totalorder %s170_s9, 0 }
  0x69   : > { %s6221_s24 = sshll.u32 %s7720_s14, 6  ;;  %s6224_s20 = sshll.u32 %s5889_s8, 10 }
  0x6a   : > { %p7847_p10 = scmp.lt.s32.totalorder %s5897_s4, 4  ;;  %s7849_s16 = sadd.s32 1, %s5877_s3 }
  0x6b   : > { %s6235_s12 = scalar_select %p171_p8, %s5877_s3, %s7849_s16  }
  0x6c   : > { %p6228_p12 = pnand %p7847_p10, %p364_p2  ;;  %s7851_s13 = sld [smem:[#allocation103_spill]] }
  0x6d   : > { %7850 = sst [smem:[#allocation38_spill]] %s6235_s12  ;;  %s892_s14 = scalar_lea.vmem [#allocation10], %s6221_s24 }
  0x6e   : > { %s7848_s30 = scalar_select %p6228_p12, 1, 0 }
  0x6f   : > { %s899_s8 = sshll.u32 %s892_s14, 4  ;;  %s7852_s29 = sand.u32 1, %s5897_s4   ;;  %s6244_s8 = int_to_ptr.vmem [resolvable:$true] %s899_s8 }
  0x70   : > { %s6248_s10 = scalar_lea.sflag [#allocation11], %s7852_s29  ;;  %p6254_p13 = pneg %p6228_p12 }
  0x72   : > { %s6241_s9 = scalar_lea.hbm %s7851_s13, %s6224_s20  ;;  %s5614_s14 = scalar_lea.hbm %s7851_s13, 2048 }
  0x73   : > { %s5609_s26 = scalar_lea.hbm %s6241_s9, 1024  ;;  %p5615_p7 = scmp.lt.u32.totalorder %s6241_s9, %s7851_s13 }
  0x74   : > { %p5610_p4 = scmp.ne.s32.totalorder %s6241_s9, %s5609_s26  ;;  %p5616_p3 = scmp.lt.u32.totalorder %s5614_s14, %s5609_s26 }
  0x75   : > { %p5618_p10 = scmp.lt.u32.totalorder %s5609_s26, %s6241_s9 }
  0x76   : > { %p5612_p2 = pnand %p6254_p13, %p5610_p4  ;;  %p5617_p8 = por %p5616_p3, %p5615_p7 }
  0x78   : > { %p5613_p5 = pneg %p5612_p2  ;;  %p5619_p0 = por %p5618_p10, %p5617_p8 }
  0x7a   : > { %p5620_p1 = pnand %p5619_p0, %p5613_p5 }
  0x7c   : > { %5623 = shalt.err (!%p5620_p1)
}
  0x7d   : > { %s5624_s29 = scalar_lea.vmem %s6244_s8, 1024  ;;  %s5902_s18 = smov [#allocation10]  }
  0x7e   : > { %p5625_p4 = scmp.ne.s32.totalorder %s6244_s8, %s5624_s29  ;;  %s5629_s21 = sshll.u32 %s5902_s18, 4  ;;  %s5630_s21 = int_to_ptr.vmem [resolvable:$false] %s5629_s21 }
  0x7f   : > { %s5631_s12 = scalar_lea.vmem %s5630_s21, 2048  ;;  %p5632_p9 = scmp.lt.s32.totalorder %s6244_s8, %s5630_s21 }
  0x80   : > { %p5627_p2 = pnand %p5625_p4, %p6254_p13  ;;  %p5633_p11 = scmp.lt.s32.totalorder %s5631_s12, %s5624_s29 }
  0x82   : > { %p5628_p6 = pneg %p5627_p2  ;;  %p5634_p7 = por %p5633_p11, %p5632_p9 }
  0x84   : > { %p5635_p3 = pnand %p5634_p7, %p5628_p6 }
  0x86   : > { %5638 = shalt.err (!%p5635_p3)
}
  0x87   : > { %s5903_s3 = smov 64   ;;  %s5904_s26 = smov 4  }
  0x88   : > { %5276 = dma.hbm_to_vmem [thread:$0]  (!%p6228_p12), %s6241_s9, 1024, %s6244_s8, %s6248_s10, %s5903_s3, %s5903_s3, %s5904_s26  }
  0x89   : > { %s4650_s14 = sshll.u32 %s6134_s5, 5  ;;  %s4805_s29 = sshll.u32 %s5893_s27, 9 }
  0x8a   : > { %s7854_s12 = sld [smem:[#allocation94_spill]]  ;;  %s788_s4 = scalar_lea.vmem [#allocation4], %s4650_s14 }
  0x8b   : > { %s795_s1 = sshll.u32 %s788_s4, 4  ;;  %s785_s22 = scalar_lea.sflag [#allocation5], %s6134_s5  ;;  %s6288_s1 = int_to_ptr.vmem [resolvable:$true] %s795_s1 }
  0x8c   : > { %p7855_p11 = scmp.ne.s32.totalorder %s7834_s23, 0 }
  0x8e   : > { %p7856_p0 = pneg %p7855_p11 }
  0x90   : > { %s6286_s13 = scalar_lea.hbm %s7854_s12, %s4805_s29  ;;  %s5644_s29 = scalar_lea.hbm %s7854_s12, 1024 }
  0x91   : > { %s5639_s2 = scalar_lea.hbm %s6286_s13, 512  ;;  %p5645_p5 = scmp.lt.u32.totalorder %s6286_s13, %s7854_s12 }
  0x92   : > { %p5640_p6 = scmp.ne.s32.totalorder %s6286_s13, %s5639_s2  ;;  %p5646_p8 = scmp.lt.u32.totalorder %s5644_s29, %s5639_s2 }
  0x93   : > { %p5648_p4 = scmp.lt.u32.totalorder %s5639_s2, %s6286_s13 }
  0x94   : > { %p5642_p9 = pnand %p5640_p6, %p7856_p0  ;;  %p5647_p10 = por %p5646_p8, %p5645_p5 }
  0x96   : > { %p5643_p1 = pneg %p5642_p9  ;;  %p5649_p2 = por %p5648_p4, %p5647_p10 }
  0x98   : > { %p5650_p7 = pnand %p5649_p2, %p5643_p1 }
  0x9a   : > { %5653 = shalt.err (!%p5650_p7)
}
  0x9b   : > { %s5654_s4 = scalar_lea.vmem %s6288_s1, 512  ;;  %p7857_p6 = pmov %p7856_p0 }
  0x9c   : > { %p5655_p3 = scmp.ne.s32.totalorder %s6288_s1, %s5654_s4  ;;  %s5905_s14 = smov [#allocation4]  }
  0x9d   : > { %s5659_s8 = sshll.u32 %s5905_s14, 4  ;;  %s5660_s8 = int_to_ptr.vmem [resolvable:$false] %s5659_s8 }
  0x9e   : > { %p5657_p0 = pnand %p5655_p3, %p7857_p6  ;;  %s5661_s9 = scalar_lea.vmem %s5660_s8, 1024 }
  0x9f   : > { %p5662_p12 = scmp.lt.s32.totalorder %s6288_s1, %s5660_s8  ;;  %p5663_p5 = scmp.lt.s32.totalorder %s5661_s9, %s5654_s4 }
  0xa0   : > { %p5658_p9 = pneg %p5657_p0 }
  0xa1   : > { %p5664_p8 = por %p5663_p5, %p5662_p12 }
  0xa3   : > { %p5665_p10 = pnand %p5664_p8, %p5658_p9 }
  0xa5   : > { %5668 = shalt.err (!%p5665_p10)
}
  0xa6   : > { %5267 = dma.hbm_to_vmem [thread:$0]  (!%p7855_p11), %s6286_s13, 512, %s6288_s1, %s785_s22, %s5903_s3, %s5903_s3, %s5904_s26  }
  0xa7   : > { %s7858_s11 = sld [smem:[#allocation101_spill]]  ;;  %s865_s23 = scalar_lea.vmem [#allocation9], %s6221_s24 }
  0xa8   : > { %s872_s21 = sshll.u32 %s865_s23, 4  ;;  %s6326_s21 = int_to_ptr.vmem [resolvable:$true] %s872_s21 }
  0xad   : > { %s6323_s18 = scalar_lea.hbm %s7858_s11, %s6224_s20  ;;  %s5674_s1 = scalar_lea.hbm %s7858_s11, 2048 }
  0xae   : > { %s5669_s5 = scalar_lea.hbm %s6323_s18, 1024  ;;  %p5675_p11 = scmp.lt.u32.totalorder %s6323_s18, %s7858_s11 }
  0xaf   : > { %p5670_p12 = scmp.ne.s32.totalorder %s6323_s18, %s5669_s5  ;;  %p5676_p2 = scmp.lt.u32.totalorder %s5674_s1, %s5669_s5 }
  0xb0   : > { %p5678_p3 = scmp.lt.u32.totalorder %s5669_s5, %s6323_s18 }
  0xb1   : > { %p5672_p1 = pnand %p5670_p12, %p6254_p13  ;;  %p5677_p7 = por %p5676_p2, %p5675_p11 }
  0xb3   : > { %p5673_p4 = pneg %p5672_p1  ;;  %p5679_p6 = por %p5678_p3, %p5677_p7 }
  0xb5   : > { %p5680_p0 = pnand %p5679_p6, %p5673_p4 }
  0xb7   : > { %5683 = shalt.err (!%p5680_p0)
}
  0xb8   : > { %s5684_s8 = scalar_lea.vmem %s6326_s21, 1024  ;;  %s5906_s9 = smov [#allocation9]  }
  0xb9   : > { %p5685_p9 = scmp.ne.s32.totalorder %s6326_s21, %s5684_s8  ;;  %s5689_s2 = sshll.u32 %s5906_s9, 4  ;;  %s5690_s2 = int_to_ptr.vmem [resolvable:$false] %s5689_s2 }
  0xba   : > { %s5691_s29 = scalar_lea.vmem %s5690_s2, 2048  ;;  %p5692_p10 = scmp.lt.s32.totalorder %s6326_s21, %s5690_s2 }
  0xbb   : > { %p5687_p5 = pnand %p5685_p9, %p6254_p13  ;;  %p5693_p12 = scmp.lt.s32.totalorder %s5691_s29, %s5684_s8 }
  0xbd   : > { %p5688_p8 = pneg %p5687_p5  ;;  %p5694_p1 = por %p5693_p12, %p5692_p10 }
  0xbf   : > { %p5695_p11 = pnand %p5694_p1, %p5688_p8 }
  0xc1   : > { %5698 = shalt.err (!%p5695_p11)
}
  0xc2   : > { %p7859_p4 = scmp.ne.s32.totalorder %s7848_s30, 0  ;;  %s7860_s17 = sld [smem:[#allocation107_spill]] }
  0xc3   : > { %s931_s13 = scalar_lea.vmem [#allocation12], %s6221_s24 }
  0xc4   : > { %5273 = dma.hbm_to_vmem [thread:$0]  (!%p7859_p4), %s6323_s18, 1024, %s6326_s21, %s6155_s15, %s5903_s3, %s5903_s3, %s5904_s26  }
  0xc5   : > { %s938_s1 = sshll.u32 %s931_s13, 4  ;;  %s6360_s1 = int_to_ptr.vmem [resolvable:$true] %s938_s1 }
  0xc8   : > { %s6357_s4 = scalar_lea.hbm %s7860_s17, %s6224_s20  ;;  %s5704_s18 = scalar_lea.hbm %s7860_s17, 2048 }
  0xc9   : > { %s5699_s22 = scalar_lea.hbm %s6357_s4, 1024  ;;  %p5705_p6 = scmp.lt.u32.totalorder %s6357_s4, %s7860_s17 }
  0xca   : > { %p5700_p2 = scmp.ne.s32.totalorder %s6357_s4, %s5699_s22  ;;  %p5706_p0 = scmp.lt.u32.totalorder %s5704_s18, %s5699_s22 }
  0xcb   : > { %p5708_p5 = scmp.lt.u32.totalorder %s5699_s22, %s6357_s4 }
  0xcc   : > { %p5702_p7 = pnand %p5700_p2, %p6254_p13  ;;  %p5707_p9 = por %p5706_p0, %p5705_p6 }
  0xce   : > { %p5703_p3 = pneg %p5702_p7  ;;  %p5709_p8 = por %p5708_p5, %p5707_p9 }
  0xd0   : > { %p5710_p10 = pnand %p5709_p8, %p5703_p3 }
  0xd2   : > { %5713 = shalt.err (!%p5710_p10)
}
  0xd3   : > { %s5714_s9 = scalar_lea.vmem %s6360_s1, 1024  ;;  %s5907_s2 = smov [#allocation12]  }
  0xd4   : > { %p5715_p12 = scmp.ne.s32.totalorder %s6360_s1, %s5714_s9  ;;  %s5719_s29 = sshll.u32 %s5907_s2, 4  ;;  %s5720_s29 = int_to_ptr.vmem [resolvable:$false] %s5719_s29 }
  0xd5   : > { %s5721_s23 = scalar_lea.vmem %s5720_s29, 2048  ;;  %p5722_p2 = scmp.lt.s32.totalorder %s6360_s1, %s5720_s29 }
  0xd6   : > { %p5717_p1 = pnand %p5715_p12, %p6254_p13  ;;  %p5723_p7 = scmp.lt.s32.totalorder %s5721_s23, %s5714_s9 }
  0xd8   : > { %p5718_p11 = pneg %p5717_p1  ;;  %p5724_p6 = por %p5723_p7, %p5722_p2 }
  0xda   : > { %p5725_p0 = pnand %p5724_p6, %p5718_p11 }
  0xdc   : > { %5728 = shalt.err (!%p5725_p0)
}
  0xdd   : > { %5279 = dma.hbm_to_vmem [thread:$0]  (!%p7859_p4), %s6357_s4, 1024, %s6360_s1, %s6248_s10, %s5903_s3, %s5903_s3, %s5904_s26  }
  0xde   : > { %s7861_s19 = sld [smem:[#allocation109_spill]]  ;;  %s958_s14 = scalar_lea.vmem [#allocation13], %s6221_s24 }
  0xdf   : > { %s965_s15 = sshll.u32 %s958_s14, 4  ;;  %s7862_s18 = sand.u32 1, %s5865_s6   ;;  %s6394_s15 = int_to_ptr.vmem [resolvable:$true] %s965_s15 }
  0xe0   : > { %s6398_s21 = scalar_lea.sflag [#allocation14], %s7862_s18 }
  0xe4   : > { %s6391_s22 = scalar_lea.hbm %s7861_s19, %s6224_s20  ;;  %s5734_s20 = scalar_lea.hbm %s7861_s19, 2048 }
  0xe5   : > { %s5729_s8 = scalar_lea.hbm %s6391_s22, 1024  ;;  %p5735_p8 = scmp.lt.u32.totalorder %s6391_s22, %s7861_s19 }
  0xe6   : > { %p5730_p3 = scmp.ne.s32.totalorder %s6391_s22, %s5729_s8  ;;  %p5736_p10 = scmp.lt.u32.totalorder %s5734_s20, %s5729_s8 }
  0xe7   : > { %p5738_p1 = scmp.lt.u32.totalorder %s5729_s8, %s6391_s22 }
  0xe8   : > { %p5732_p9 = pnand %p5730_p3, %p6254_p13  ;;  %p5737_p12 = por %p5736_p10, %p5735_p8 }
  0xea   : > { %p5733_p5 = pneg %p5732_p9  ;;  %p5739_p11 = por %p5738_p1, %p5737_p12 }
  0xec   : > { %p5740_p2 = pnand %p5739_p11, %p5733_p5 }
  0xee   : > { %5743 = shalt.err (!%p5740_p2)
}
  0xef   : > { %s5744_s24 = scalar_lea.vmem %s6394_s15, 1024  ;;  %s5908_s2 = smov [#allocation13]  }
  0xf0   : > { %p5745_p7 = scmp.ne.s32.totalorder %s6394_s15, %s5744_s24  ;;  %s5749_s29 = sshll.u32 %s5908_s2, 4  ;;  %s5750_s29 = int_to_ptr.vmem [resolvable:$false] %s5749_s29 }
  0xf1   : > { %s5751_s23 = scalar_lea.vmem %s5750_s29, 2048  ;;  %p5752_p3 = scmp.lt.s32.totalorder %s6394_s15, %s5750_s29 }
  0xf2   : > { %p5747_p6 = pnand %p5745_p7, %p6254_p13  ;;  %p5753_p9 = scmp.lt.s32.totalorder %s5751_s23, %s5744_s24 }
  0xf4   : > { %p5748_p0 = pneg %p5747_p6  ;;  %p5754_p8 = por %p5753_p9, %p5752_p3 }
  0xf6   : > { %p5755_p10 = pnand %p5754_p8, %p5748_p0 }
  0xf8   : > { %5758 = shalt.err (!%p5755_p10)
}
  0xf9   : > { %5282 = dma.hbm_to_vmem [thread:$0]  (!%p7859_p4), %s6391_s22, 1024, %s6394_s15, %s6398_s21, %s5903_s3, %s5903_s3, %s5904_s26  }
  0xfa   : > { %p7863_p13 = scmp.ne.s32.totalorder %s7838_s0, 0 }
  0xfc   : > { %995 = sbr.rel (%p7863_p13) target bundleno = 2551 (0x9f7), region = 120 }
 0x103   : > { %s6428_s16 = sand.u32 1, %s5873_s7   ;;  %p7865_p5 = scmp.ne.s32.totalorder %s7829_s25, 0 }
 0x104   : > { %s4669_s5 = sshll.u32 %s6428_s16, 5  ;;  %s998_s13 = scalar_lea.sflag [#allocation5], %s6428_s16 }
 0x105   : > { %s6432_s14 = scalar_lea.vmem [#allocation4], %s4669_s5 }
 0x106   : > { %7864 = sst [smem:[#allocation39_spill]] %s6432_s14 }
 0x107   : > { %5832 = dma.done.wait (%p7865_p5), %s998_s13, 512  }
 0x108   : > { %5834 = vsyncadd (%p7865_p5), %s998_s13, 4294966784  ;;  %s1006_s0 = sand.u32 1, %s6104_s28   ;;  %s7737_s30 = sshll.u32 %s6428_s16, 6 }
 0x109   : > { %s1007_s3 = scalar_lea.sflag [#allocation8], %s1006_s0  ;;  %s6442_s26 = scalar_lea.vmem [#allocation7], %s7737_s30 }
 0x10a   : > { %7866 = sst [smem:[#allocation40_spill]] %s6442_s26 }
 0x10b   : > { %5836 = dma.done.wait (%p7865_p5), %s1007_s3, 1024  }
 0x10c   : > { %5838 = vsyncadd (%p7865_p5), %s1007_s3, 4294966272  ;;  %s7867_s22 = sld [smem:[#allocation22_spill]] }
 0x10d   : > { %s7868_s15 = sld [smem:[#allocation35_spill]] }
 0x112   : > { %s1017_s18 = sand.u32 1, %s7867_s22  }
 0x113   : > { %s4671_s21 = sshll.u32 %s1017_s18, 6  ;;  %p7870_p4 = scmp.ne.s32.totalorder %s7868_s15, 0 }
 0x114   : > { %s6449_s8 = scalar_lea.vmem [#allocation9], %s4671_s21 }
 0x115   : > { %7869 = sst [smem:[#allocation41_spill]] %s6449_s8 }
 0x116   : > { %5840 = dma.done.wait (%p7870_p4), %s1007_s3, 1024  }
 0x117   : > { %5842 = vsyncadd (%p7870_p4), %s1007_s3, 4294966272  ;;  %s1025_s28 = scalar_lea.sflag [#allocation11], %s1006_s0  ;;  %s6455_s10 = scalar_lea.vmem [#allocation10], %s4671_s21 }
 0x118   : > { %7871 = sst [smem:[#allocation42_spill]] %s6455_s10 }
 0x119   : > { %5844 = dma.done.wait (%p7870_p4), %s1025_s28, 2048  }
 0x11a   : > { %5846 = vsyncadd (%p7870_p4), %s1025_s28, 4294965248  ;;  %s6461_s25 = scalar_lea.vmem [#allocation12], %s4671_s21  ;;  %s1043_s4 = scalar_lea.sflag [#allocation14], %s1017_s18 }
 0x11b   : > { %7872 = sst [smem:[#allocation43_spill]] %s6461_s25  ;;  %s6463_s20 = scalar_lea.vmem [#allocation13], %s4671_s21 }
 0x11c   : > { %7873 = sst [smem:[#allocation44_spill]] %s6463_s20 }
 0x11d   : > { %5848 = dma.done.wait (%p7870_p4), %s1043_s4, 1024  }
 0x11e   : > { %5850 = vsyncadd (%p7870_p4), %s1043_s4, 4294966272  ;;  %s7874_s1 = sld [smem:[#allocation28_spill]]  ;;  %s7875_s9 = sld [smem:[#allocation27_spill]] }
 0x11f   : > { %s7876_s13 = sld [smem:[#allocation90_spill]]  ;;  %s7877_s15 = sld [smem:[#allocation91_spill]] }
 0x120   : > { %s7878_s4 = sld [smem:[#allocation92_spill]]  ;;  %s7879_s12 = sld [smem:[#allocation93_spill]] }
 0x121   : > { %s7880_s17 = sld [smem:[#allocation96_spill]]  ;;  %s7881_s27 = sld [smem:[#allocation97_spill]] }
 0x122   : > { %s7889_s6 = sld [smem:[#allocation106_spill]]  ;;  %s7891_s26 = sld [smem:[#allocation110_spill]] }
 0x124   : > { %p1202_p12 = scmp.lt.s32.totalorder %s7874_s1, 1  ;;  %p1227_p1 = scmp.lt.s32.totalorder %s7875_s9, 1 }
 0x125   : > { %p4689_p11 = scmp.ne.s32.totalorder %s7875_s9, 0 }
 0x126   : > { %s8037_s1 = smov (!%p1202_p12, %s7874_s1), 1  ;;  %vm1295_vm0 = vcmask (!%p4689_p11), 15360  }
 0x127   : > { %s6473_s24 = scalar_select %p1227_p1, %s7875_s9, 1 }
 0x128   : > { %s4811_s2 = sshll.u32 %s8037_s1, 6  ;;  %s4814_s29 = sshll.u32 %s8037_s1, 7 }
 0x129   : > { %s6478_s0 = scalar_lea.vmem %s7876_s13, %s4811_s2  ;;  %s6483_s18 = scalar_lea.vmem %s7877_s15, %s4811_s2 }
 0x12a   : > { %s6488_s30 = scalar_lea.vmem %s7878_s4, %s4811_s2  ;;  %s6493_s23 = scalar_lea.vmem %s7879_s12, %s4814_s29  ;;  %v1271_v0 = vld [vmem:[%s6478_s0] sm:$0xff] (!%p4689_p11)  ;;  %v1272_v1 = vld [vmem:[%s6478_s0 + $0x8] sm:$0xff] (!%p4689_p11)  ;;  %v1273_v2 = vld [vmem:[%s6478_s0 + $0x10] sm:$0xff] (!%p4689_p11) }
 0x12b   : > { %s6498_s3 = scalar_lea.vmem %s7880_s17, %s4814_s29  ;;  %s4816_s22 = sshll.u32 %s6473_s24, 8  ;;  %1279 = vst [vmem:[#allocation2] sm:$0xff] (!%p4689_p11), %v1271_v0  ;;  %1280 = vst [vmem:[#allocation2 + $0x8] sm:$0xff] (!%p4689_p11), %v1272_v1  ;;  %v1274_v3 = vld [vmem:[%s6478_s0 + $0x18] sm:$0xff] (!%p4689_p11)  ;;  %v1275_v4 = vld [vmem:[%s6478_s0 + $0x20] sm:$0xff] (!%p4689_p11) }
 0x12c   : > { %s6504_s21 = scalar_lea.vmem %s7881_s27, %s4816_s22  ;;  %s4688_s11 = sshll.u32 %s6473_s24, 1  ;;  %1281 = vst [vmem:[#allocation2 + $0x10] sm:$0xff] (!%p4689_p11), %v1273_v2  ;;  %v1276_v5 = vld [vmem:[%s6478_s0 + $0x28] sm:$0xff] (!%p4689_p11)  ;;  %1282 = vst [vmem:[#allocation2 + $0x18] sm:$0xff] (!%p4689_p11), %v1274_v3  ;;  %v1277_v6 = vld [vmem:[%s6478_s0 + $0x30] sm:$0xff] (!%p4689_p11) }
 0x12d   : > { %s7884_s13 = sld [smem:[#allocation99_spill]]  ;;  %s1253_s12 = scalar_lea.vmem %s7889_s6, %s6473_s24  ;;  %1283 = vst [vmem:[#allocation2 + $0x20] sm:$0xff] (!%p4689_p11), %v1275_v4  ;;  %1284 = vst [vmem:[#allocation2 + $0x28] sm:$0xff] (!%p4689_p11), %v1276_v5  ;;  %v1278_v7 = vld [vmem:[%s6478_s0 + $0x38] sm:$0xff] (!%p4689_p11)  ;;  %v1287_v8 = vld [vmem:[%s6483_s18] sm:$0xff] (!%p4689_p11) }
 0x12e   : > { %s1259_s14 = scalar_lea.vmem %s7891_s26, %s6473_s24  ;;  %s7892_s27 = sld [smem:[#allocation111_spill]]  ;;  %1285 = vst [vmem:[#allocation2 + $0x30] sm:$0xff] (!%p4689_p11), %v1277_v6  ;;  %1286 = vst [vmem:[#allocation2 + $0x38] sm:$0xff] (!%p4689_p11), %v1278_v7  ;;  %v1288_v9 = vld [vmem:[%s6483_s18 + $0x8] sm:$0xff] (!%p4689_p11)  ;;  %v1289_v10 = vld [vmem:[%s6483_s18 + $0x10] sm:$0xff] (!%p4689_p11) }
 0x12f   : > { %s7893_s2 = sld [smem:[#allocation112_spill]]  ;;  %s7894_s4 = sshll.u32 %s6428_s16, 6  ;;  %1296 = vst.msk [vmem:[#allocation3] sm:$0xff] (!%p4689_p11), %vm1295_vm0, %v1287_v8  ;;  %v1290_v11 = vld [vmem:[%s6483_s18 + $0x18] sm:$0xff] (!%p4689_p11)  ;;  %1297 = vst.msk [vmem:[#allocation3 + $0x8] sm:$0xff] (!%p4689_p11), %vm1295_vm0, %v1288_v9  ;;  %v1291_v12 = vld [vmem:[%s6483_s18 + $0x20] sm:$0xff] (!%p4689_p11) }
 0x130   : > { %s6554_s7 = scalar_lea.vmem [#allocation15], %s7894_s4  ;;  %1298 = vst.msk [vmem:[#allocation3 + $0x10] sm:$0xff] (!%p4689_p11), %vm1295_vm0, %v1289_v10  ;;  %1299 = vst.msk [vmem:[#allocation3 + $0x18] sm:$0xff] (!%p4689_p11), %vm1295_vm0, %v1290_v11  ;;  %v1292_v13 = vld [vmem:[%s6483_s18 + $0x28] sm:$0xff] (!%p4689_p11)  ;;  %v1293_v14 = vld [vmem:[%s6483_s18 + $0x30] sm:$0xff] (!%p4689_p11) }
 0x131   : > { %1300 = vst.msk [vmem:[#allocation3 + $0x20] sm:$0xff] (!%p4689_p11), %vm1295_vm0, %v1291_v12  ;;  %1301 = vst.msk [vmem:[#allocation3 + $0x28] sm:$0xff] (!%p4689_p11), %vm1295_vm0, %v1292_v13  ;;  %v1294_v15 = vld [vmem:[%s6483_s18 + $0x38] sm:$0xff] (!%p4689_p11) }
 0x132   : > { %1302 = vst.msk [vmem:[#allocation3 + $0x30] sm:$0xff] (!%p4689_p11), %vm1295_vm0, %v1293_v14  ;;  %1303 = vst.msk [vmem:[#allocation3 + $0x38] sm:$0xff] (!%p4689_p11), %vm1295_vm0, %v1294_v15 }
 0x133   : > { %s6518_s17 = scalar_lea.vmem %s7884_s13, %s4688_s11  ;;  %s7890_s11 = sld [smem:[#allocation108_spill]] }
 0x134   : > { %7885 = sst [smem:[#allocation45_spill]] %s6518_s17  ;;  %s1262_s22 = scalar_lea.vmem %s7892_s27, %s6473_s24 }
 0x135   : > { %s1265_s28 = scalar_lea.vmem %s7893_s2, %s6473_s24  ;;  %1270 = sbr.rel (%p4689_p11) target bundleno = 316 (0x13c), region = 148 }
 0x139   : > { %s1256_s5 = scalar_lea.vmem %s7890_s11, %s6473_s24 }
 0x13c PF: > { %v5406_v16 = vld [vmem:[%s6504_s21 + $0x4] ss:$16 sps:$4 sm:$0xff]   ;;  %v5408_v17 = vld [vmem:[%s6504_s21] ss:$16 sps:$4 sm:$0xff]   ;;  %v7748_v18 = vmov 0   ;;  %v7750_v21 = vmov 1  }
 0x13d   : > { %1548 = vmatprep.mubr.bf16.mxu0 %v7748_v18  ;;  %5389 = vset.pattern.permute.xlu1 %v7748_v18  ;;  %v5409_v19 = vld [vmem:[%s6504_s21 + $0x24] ss:$16 sps:$4 sm:$0xff]   ;;  %v5411_v20 = vld [vmem:[%s6504_s21 + $0x20] ss:$16 sps:$4 sm:$0xff]   ;;  %v5430_v33 = vld [vmem:[%s6504_s21 + $0xc] ss:$16 sps:$4 sm:$0xff]  }
 0x13e   : > { %1516 = vmatprep.subr.bf16.mxu0 %v5406_v16  ;;  %1621 = vmatprep.mubr.bf16.mxu1 %v7748_v18  ;;  %v5412_v22 = vld [vmem:[%s6504_s21 + $0x44] ss:$16 sps:$4 sm:$0xff]   ;;  %v5414_v23 = vld [vmem:[%s6504_s21 + $0x40] ss:$16 sps:$4 sm:$0xff]   ;;  %v5432_v35 = vld [vmem:[%s6504_s21 + $0x8] ss:$16 sps:$4 sm:$0xff]  }
 0x13f   : > { %1517 = vmatpush1.bf16.msra.mxu0 %v5408_v17  ;;  %5391 = vset.pattern.permute.xlu0 %v7750_v21  ;;  %v5415_v24 = vld [vmem:[%s6504_s21 + $0x64] ss:$16 sps:$4 sm:$0xff]   ;;  %v5417_v25 = vld [vmem:[%s6504_s21 + $0x60] ss:$16 sps:$4 sm:$0xff]   ;;  %v5433_v36 = vld [vmem:[%s6504_s21 + $0x2c] ss:$16 sps:$4 sm:$0xff]  }
 0x140   : > { %1518 = vmatprep.subr.bf16.mxu0 %v5409_v19  ;;  %v5418_v26 = vld [vmem:[%s6504_s21 + $0x84] ss:$16 sps:$4 sm:$0xff]   ;;  %v5420_v27 = vld [vmem:[%s6504_s21 + $0x80] ss:$16 sps:$4 sm:$0xff]   ;;  %1589 = vmatprep.subr.bf16.mxu1 %v5430_v33  ;;  %v1313_v41 = vld [vmem:[#allocation3 + $0x8] sm:$0xff]  ;;  %vm1702_vm1 = vcmask 523264  }
 0x141   : > { %v5421_v28 = vld [vmem:[%s6504_s21 + $0xa4] ss:$16 sps:$4 sm:$0xff]   ;;  %v5423_v29 = vld [vmem:[%s6504_s21 + $0xa0] ss:$16 sps:$4 sm:$0xff]   ;;  %1590 = vmatpush1.bf16.msra.mxu1 %v5432_v35  ;;  %v5435_v42 = vld [vmem:[%s6504_s21 + $0x28] ss:$16 sps:$4 sm:$0xff]  }
 0x142   : > { %v5424_v30 = vld [vmem:[%s6504_s21 + $0xc4] ss:$16 sps:$4 sm:$0xff]   ;;  %v5426_v31 = vld [vmem:[%s6504_s21 + $0xc0] ss:$16 sps:$4 sm:$0xff]   ;;  %1591 = vmatprep.subr.bf16.mxu1 %v5433_v36  ;;  %v5436_v43 = vld [vmem:[%s6504_s21 + $0x4c] ss:$16 sps:$4 sm:$0xff]  }
 0x143   : > { %1519 = vmatpush1.bf16.msra.mxu0 %v5411_v20  ;;  %v5427_v32 = vld [vmem:[%s6504_s21 + $0xe4] ss:$16 sps:$4 sm:$0xff]   ;;  %v5429_v39 = vld [vmem:[%s6504_s21 + $0xe0] ss:$16 sps:$4 sm:$0xff]   ;;  %v1305_v44 = vld [vmem:[#allocation2 + $0x8] sm:$0xff]  ;;  %s5911_s8 = smov 127  }
 0x144   : > { %1520 = vmatprep.subr.bf16.mxu0 %v5412_v22  ;;  %v2152_v34 = vld [vmem:[%s6498_s3] sm:$0xff]  ;;  %v2154_v38 = vld [vmem:[%s6498_s3 + $0x10] sm:$0xff]  ;;  %v1315_v47 = vld [vmem:[#allocation3 + $0x18] sm:$0xff]  ;;  %s7940_s10 = sld [smem:[#allocation42_spill]]  ;;  %s7943_s20 = sld [smem:[#allocation45_spill]] }
 0x145   : > { %2419 = vperm.xlu1 %5389, %v2152_v34   ;;  %v1312_v37 = vld [vmem:[#allocation3] sm:$0xff]  ;;  %v1314_v46 = vld [vmem:[#allocation3 + $0x10] sm:$0xff]  ;;  %1592 = vmatpush1.bf16.msra.mxu1 %v5435_v42  ;;  %v5438_v48 = vld [vmem:[%s6504_s21 + $0x48] ss:$16 sps:$4 sm:$0xff]   ;;  %s7944_s18 = sld [smem:[#allocation98_spill]]  ;;  %s7946_s17 = sld [smem:[#allocation100_spill]] }
 0x146   : > { %v1304_v40 = vld [vmem:[#allocation2] sm:$0xff]  ;;  %v5202_v45 = vpack.c.bf16 %v1313_v41, %v1312_v37  ;;  %1593 = vmatprep.subr.bf16.mxu1 %v5436_v43  ;;  %v5439_v50 = vld [vmem:[%s6504_s21 + $0x6c] ss:$16 sps:$4 sm:$0xff]   ;;  %v5441_v53 = vld [vmem:[%s6504_s21 + $0x68] ss:$16 sps:$4 sm:$0xff]   ;;  %v5206_v54 = vpack.c.bf16 %v1315_v47, %v1314_v46  ;;  %s7948_s25 = sld [smem:[#allocation102_spill]] }
 0x147   : > { %1521 = vmatpush1.bf16.msra.mxu0 %v5414_v23  ;;  %v6609_v49 = vpack.c.bf16 %v1305_v44, %v1304_v40  ;;  %v1316_v51 = vld [vmem:[#allocation3 + $0x20] sm:$0xff]  ;;  %v1317_v52 = vld [vmem:[#allocation3 + $0x28] sm:$0xff]  ;;  %v1306_v56 = vld [vmem:[#allocation2 + $0x10] sm:$0xff]  ;;  %s7950_s29 = sld [smem:[#allocation104_spill]]  ;;  %s7952_s4 = sld [smem:[#allocation105_spill]] }
 0x148   : > { %1522 = vmatprep.subr.bf16.mxu0 %v5415_v24  ;;  %v5442_v55 = vld [vmem:[%s6504_s21 + $0x8c] ss:$16 sps:$4 sm:$0xff]   ;;  %v1318_v58 = vld [vmem:[#allocation3 + $0x30] sm:$0xff]  ;;  %v5444_v60 = vld [vmem:[%s6504_s21 + $0x88] ss:$16 sps:$4 sm:$0xff]   ;;  %v5210_v62 = vpack.c.bf16 %v1317_v52, %v1316_v51  ;;  %s7981_s0 = sld [smem:[#allocation43_spill]] }
 0x149   : > { %2429 = vperm.xlu1 %5389, %v2154_v38   ;;  %v1307_v57 = vld [vmem:[#allocation2 + $0x18] sm:$0xff]  ;;  %1594 = vmatpush1.bf16.msra.mxu1 %v5438_v48  ;;  %v2156_v3 = vld [vmem:[%s6498_s3 + $0x20] sm:$0xff]  ;;  %v1309_v6 = vld [vmem:[#allocation2 + $0x28] sm:$0xff] }
 0x14a   : > { %1595 = vmatprep.subr.bf16.mxu1 %v5439_v50  ;;  %v1319_v59 = vld [vmem:[#allocation3 + $0x38] sm:$0xff]  ;;  %v6622_v0 = vpack.c.bf16 %v1307_v57, %v1306_v56  ;;  %v1308_v5 = vld [vmem:[#allocation2 + $0x20] sm:$0xff]  ;;  %v2158_v8 = vld [vmem:[%s6498_s3 + $0x30] sm:$0xff] }
 0x14b   : > { %1523 = vmatpush1.bf16.msra.mxu0 %v5417_v25  ;;  %v6619_v61 = vld [vmem:[%s6498_s3 + $0x18] sm:$0xff]  ;;  %v5214_v2 = vpack.c.bf16 %v1319_v59, %v1318_v58  ;;  %v6633_v9 = vpack.c.bf16 %v1309_v6, %v1308_v5  ;;  %v1310_v10 = vld [vmem:[#allocation2 + $0x30] sm:$0xff]  ;;  %v1686_v13 = vld [vmem:[%s6493_s23] sm:$0xff]  ;;  %s7947_s19 = scalar_lea.vmem %s7946_s17, %s6473_s24 }
 0x14c   : > { %1524 = vmatprep.subr.bf16.mxu0 %v5418_v26  ;;  %v5445_v63 = vld [vmem:[%s6504_s21 + $0xac] ss:$16 sps:$4 sm:$0xff]   ;;  %v5447_v1 = vld [vmem:[%s6504_s21 + $0xa8] ss:$16 sps:$4 sm:$0xff]   ;;  %v1688_v15 = vld [vmem:[%s6493_s23 + $0x10] sm:$0xff]  ;;  %s7949_s11 = scalar_lea.vmem %s7948_s25, %s6473_s24 }
 0x14d   : > { %5390 = vset.pattern.permute.xlu1 %v7750_v21  ;;  %1596 = vmatpush1.bf16.msra.mxu1 %v5441_v53  ;;  %v5448_v4 = vld [vmem:[%s6504_s21 + $0xcc] ss:$16 sps:$4 sm:$0xff]   ;;  %v5450_v7 = vld [vmem:[%s6504_s21 + $0xc8] ss:$16 sps:$4 sm:$0xff]   ;;  %v1690_v17 = vld [vmem:[%s6493_s23 + $0x20] sm:$0xff]  ;;  %s7951_s27 = scalar_lea.vmem %s7950_s29, %s6473_s24 }
 0x14e   : > { %2534 = vperm.xlu1 %5390, %v2152_v34   ;;  %1597 = vmatprep.subr.bf16.mxu1 %v5442_v55  ;;  %v1311_v11 = vld [vmem:[#allocation2 + $0x38] sm:$0xff]  ;;  %v1687_v14 = vld [vmem:[%s6493_s23 + $0x8] sm:$0xff]  ;;  %v1692_v20 = vld [vmem:[%s6493_s23 + $0x30] sm:$0xff] }
 0x14f   : > { %1525 = vmatpush1.bf16.msra.mxu0 %v5420_v27  ;;  %v1323_v12 = vpack.c.bf16 %v1311_v11, %v1310_v10  ;;  %v1689_v16 = vld [vmem:[%s6493_s23 + $0x18] sm:$0xff]  ;;  %v1691_v19 = vld [vmem:[%s6493_s23 + $0x28] sm:$0xff]  ;;  %v1694_v23 = vld [vmem:[%s6493_s23 + $0x40] sm:$0xff] }
 0x150   : > { %1526 = vmatprep.subr.bf16.mxu0 %v5421_v28  ;;  %v1693_v22 = vld [vmem:[%s6493_s23 + $0x38] sm:$0xff]  ;;  %v1695_v24 = vld [vmem:[%s6493_s23 + $0x48] sm:$0xff]  ;;  %v1696_v25 = vld [vmem:[%s6493_s23 + $0x50] sm:$0xff] }
 0x151   : > { %1598 = vmatpush1.bf16.msra.mxu1 %v5444_v60  ;;  %v1697_v26 = vld [vmem:[%s6493_s23 + $0x58] sm:$0xff]  ;;  %v1698_v27 = vld [vmem:[%s6493_s23 + $0x60] sm:$0xff]  ;;  %v1699_v28 = vld [vmem:[%s6493_s23 + $0x68] sm:$0xff] }
 0x152   : > { %2542 = vperm.xlu1 %5390, %v2154_v38   ;;  %1599 = vmatprep.subr.bf16.mxu1 %v5445_v63  ;;  %v6675_v33 = vld [vmem:[%s6498_s3 + $0x38] sm:$0xff]  ;;  %v6679_v34 = vld [vmem:[%s6498_s3 + $0x8] sm:$0xff]  ;;  %v6689_v36 = vld [vmem:[%s6498_s3 + $0x40] sm:$0xff] }
 0x153   : > { %1527 = vmatpush1.bf16.msra.mxu0 %v5423_v29  ;;  %v1700_v29 = vld [vmem:[%s6493_s23 + $0x70] sm:$0xff]  ;;  %2538 = vperm.xlu0 %5391, %v6679_v34   ;;  %v6686_v35 = vld [vmem:[%s6498_s3 + $0x28] sm:$0xff]  ;;  %v5454_v38 = vld [vmem:[%s6488_s30] sm:$0xff]  }
 0x154   : > { %1528 = vmatprep.subr.bf16.mxu0 %v5424_v30  ;;  %v1701_v30 = vld [vmem:[%s6493_s23 + $0x78] sm:$0xff]  ;;  %v6694_v37 = vld [vmem:[%s6498_s3 + $0x50] sm:$0xff]  ;;  %s7945_s23 = scalar_lea.vmem %s7944_s18, %s6473_s24  ;;  %s7986_s18 = sld [smem:[#allocation44_spill]] }
 0x155   : > { %1600 = vmatpush1.bf16.msra.mxu1 %v5447_v1 }
 0x156   : > { %2546 = vperm.xlu1 %5390, %v6619_v61   ;;  %1601 = vmatprep.subr.bf16.mxu1 %v5448_v4 }
 0x157   : > { %1529 = vmatpush1.bf16.msra.mxu0 %v5426_v31  ;;  %v5451_v31 = vld [vmem:[%s6504_s21 + $0xec] ss:$16 sps:$4 sm:$0xff]   ;;  %2554 = vperm.xlu0 %5391, %v6686_v35  }
 0x158   : > { %1530 = vmatprep.subr.bf16.mxu0 %v5427_v32  ;;  %v5453_v32 = vld [vmem:[%s6504_s21 + $0xe8] ss:$16 sps:$4 sm:$0xff]  }
 0x159   : > { %1602 = vmatpush1.bf16.msra.mxu1 %v5450_v7 }
 0x15a   : > { %5392 = vset.pattern.permute.xlu1 %v7748_v18  ;;  %1603 = vmatprep.subr.bf16.mxu1 %v5451_v31 }
 0x15b   : > { %1531 = vmatpush1.bf16.msra.mxu0 %v5429_v39  ;;  %2439 = vperm.xlu1 %5392, %v2156_v3  }
 0x15c   : > { %5203 = vmatprep.subr.bf16.mxu0 %v5202_v45 }
 0x15d   : > { %1604 = vmatpush1.bf16.msra.mxu1 %v5453_v32 }
 0x15e   : > { %1549 = vmatmul.mubr.bf16.vlgmr.msra.gmra.mrb[0].mxu0 %v6609_v49 }
 0x15f   : > { %5205 = vmatpush3.bf16.msra.mxu0 %v5202_v45  ;;  %1558 = vmatprep.mubr.bf16.mxu0 %v7748_v18 }
 0x160   : > { %5207 = vmatprep.subr.bf16.mxu0 %v5206_v54  ;;  %2449 = vperm.xlu1 %5392, %v2158_v8  }
 0x161   : > { %1622 = vmatmul.mubr.bf16.vlgmr.msra.gmra.mrb[0].mxu1 %v6609_v49 }
 0x162   : > { %1631 = vmatprep.mubr.bf16.mxu1 %v7748_v18 }
 0x163   : > { %5209 = vmatpush3.bf16.msra.mxu0 %v5206_v54 }
 0x164   : > { %5211 = vmatprep.subr.bf16.mxu0 %v5210_v62  ;;  %5393 = vset.pattern.permute.xlu1 %v7750_v21 }
 0x165   : > { %2550 = vperm.xlu1 %5393, %v2156_v3  }
 0x166   : > { %1559 = vmatmul.mubr.bf16.gmra.mrb[4].mxu0 %v6622_v0 }
 0x167   : > { %1568 = vmatprep.mubr.bf16.mxu0 %v7748_v18  ;;  %5213 = vmatpush3.bf16.msra.mxu0 %v5210_v62 }
 0x168   : > { %5215 = vmatprep.subr.bf16.mxu0 %v5214_v2 }
 0x169   : > { %2558 = vperm.xlu1 %5393, %v2158_v8   ;;  %1632 = vmatmul.mubr.bf16.gmra.mrb[4].mxu1 %v6622_v0 }
 0x16a   : > { %1641 = vmatprep.mubr.bf16.mxu1 %v7748_v18 }
 0x16b   : > { %5217 = vmatpush3.bf16.msra.mxu0 %v5214_v2 }
 0x16d   : > { %2562 = vperm.xlu1 %5393, %v6675_v33  }
 0x16e   : > { %1569 = vmatmul.mubr.bf16.gmra.mrb[8].mxu0 %v6633_v9 }
 0x16f   : > { %1578 = vmatprep.mubr.bf16.mxu0 %v7748_v18 }
 0x171   : > { %5394 = vset.pattern.permute.xlu1 %v7748_v18  ;;  %1642 = vmatmul.mubr.bf16.gmra.mrb[8].mxu1 %v6633_v9 }
 0x172   : > { %2459 = vperm.xlu1 %5394, %v6689_v36   ;;  %1651 = vmatprep.mubr.bf16.mxu1 %v7748_v18 }
 0x176   : > { %1579 = vmatmul.mubr.bf16.gmra.mrb[12].mxu0 %v1323_v12  ;;  %2469 = vperm.xlu1 %5394, %v6694_v37  }
 0x177   : > { %4966 = vmatprep.mubr.msk.f32.mxu0 %vm1702_vm1, %v1686_v13  ;;  %v5455_v13 = vld [vmem:[%s6488_s30 + $0x8] sm:$0xff]  }
 0x179   : > { %1652 = vmatmul.mubr.bf16.gmra.mrb[12].mxu1 %v1323_v12 }
 0x17a   : > { %5395 = vset.pattern.permute.xlu1 %v7750_v21  ;;  %5006 = vmatprep.mubr.bf16.mxu1 %v5454_v38 }
 0x17e   : > { %4967 = vmatmul.mubr.msk.f32.vlgmr.msra.gmra.mrb[16].mxu0 %vm1702_vm1, %v1687_v14 }
 0x17f   : > { %4969 = vmatprep.mubr.msk.f32.mxu0 %vm1702_vm1, %v1688_v15 }
 0x182   : > { %4970 = vmatmul.mubr.msk.f32.gmra.mrb[18].mxu0 %vm1702_vm1, %v1689_v16  ;;  %v5456_v16 = vld [vmem:[%s6488_s30 + $0x10] sm:$0xff]  }
 0x183   : > { %4972 = vmatprep.mubr.msk.f32.mxu0 %vm1702_vm1, %v1690_v17 }
 0x186   : > { %4973 = vmatmul.mubr.msk.f32.gmra.mrb[20].mxu0 %vm1702_vm1, %v1691_v19 }
 0x187   : > { %4975 = vmatprep.mubr.msk.f32.mxu0 %vm1702_vm1, %v1692_v20 }
 0x18a   : > { %4976 = vmatmul.mubr.msk.f32.gmra.mrb[22].mxu0 %vm1702_vm1, %v1693_v22 }
 0x18b   : > { %4978 = vmatprep.mubr.msk.f32.mxu0 %vm1702_vm1, %v1694_v23 }
 0x18e   : > { %4979 = vmatmul.mubr.msk.f32.gmra.mrb[24].mxu0 %vm1702_vm1, %v1695_v24 }
 0x18f   : > { %4981 = vmatprep.mubr.msk.f32.mxu0 %vm1702_vm1, %v1696_v25  ;;  %v5457_v25 = vld [vmem:[%s6488_s30 + $0x18] sm:$0xff]  }
 0x192   : > { %4982 = vmatmul.mubr.msk.f32.gmra.mrb[26].mxu0 %vm1702_vm1, %v1697_v26 }
 0x193   : > { %4984 = vmatprep.mubr.msk.f32.mxu0 %vm1702_vm1, %v1698_v27 }
 0x196   : > { %4985 = vmatmul.mubr.msk.f32.gmra.mrb[28].mxu0 %vm1702_vm1, %v1699_v28  ;;  %v5458_v28 = vld [vmem:[%s6488_s30 + $0x20] sm:$0xff]  }
 0x197   : > { %4987 = vmatprep.mubr.msk.f32.mxu0 %vm1702_vm1, %v1700_v29 }
 0x19a   : > { %4988 = vmatmul.mubr.msk.f32.gmra.mrb[30].mxu0 %vm1702_vm1, %v1701_v30 }
 0x231   : > { %v1550_v39 = vpop.f32.mrb[0].mxu0 }
 0x232   : > { %v1552_v40 = vpop.f32.mrb[1].mxu0 }
 0x233   : > { %v1554_v41 = vpop.f32.mrb[2].mxu0 }
 0x234   : > { %v1662_v42 = vpack.c.bf16 %v1554_v41, %v1550_v39  ;;  %v1556_v43 = vpop.f32.mrb[3].mxu0  ;;  %v2161_v39 = vld [vmem:[%s6498_s3 + $0x48] sm:$0xff] }
 0x235   : > { %v1666_v44 = vpack.c.bf16 %v1556_v43, %v1552_v40  ;;  %v5459_v41 = vld [vmem:[%s6488_s30 + $0x28] sm:$0xff]   ;;  %v5460_v43 = vld [vmem:[%s6488_s30 + $0x30] sm:$0xff]  }
 0x236   : > { %4990 = vmatprep.subr.bf16.mxu1 %v1662_v42 }
 0x237   : > { %4991 = vmatpush3.bf16.msra.mxu1 %v1662_v42 }
 0x239   : > { %v1560_v45 = vpop.f32.mrb[4].mxu0 }
 0x23a   : > { %v1562_v46 = vpop.f32.mrb[5].mxu0 }
 0x23b   : > { %v1564_v47 = vpop.f32.mrb[6].mxu0 }
 0x23c   : > { %v1663_v48 = vpack.c.bf16 %v1564_v47, %v1560_v45  ;;  %v1566_v49 = vpop.f32.mrb[7].mxu0  ;;  %v5461_v45 = vld [vmem:[%s6488_s30 + $0x38] sm:$0xff]   ;;  %s7911_s30 = sld [smem:[#allocation41_spill]] }
 0x23d   : > { %v1667_v50 = vpack.c.bf16 %v1566_v49, %v1562_v46  ;;  %v2163_v47 = vld [vmem:[%s6498_s3 + $0x58] sm:$0xff]  ;;  %v6867_v49 = vpop.f32.mrb[0].mxu1 }
 0x23e   : > { %4992 = vmatprep.subr.bf16.mxu1 %v1663_v48  ;;  %7912 = vst [vmem:[#allocation62_spill] sm:$0xff] %v6867_v49  ;;  %v7765_v49 = vlaneseq }
 0x23f   : > { %4993 = vmatpush3.bf16.msra.mxu1 %v1663_v48 }
 0x241   : > { %v1570_v51 = vpop.f32.mrb[8].mxu0 }
 0x242   : > { %v1572_v52 = vpop.f32.mrb[9].mxu0 }
 0x243   : > { %v1574_v53 = vpop.f32.mrb[10].mxu0 }
 0x244   : > { %v1664_v54 = vpack.c.bf16 %v1574_v53, %v1570_v51  ;;  %v1576_v55 = vpop.f32.mrb[11].mxu0  ;;  %v5463_v51 = vld [vmem:[%s7911_s30 + $0x8] sm:$0xff]   ;;  %v6873_v53 = vpop.f32.mrb[1].mxu1 }
 0x245   : > { %v1668_v56 = vpack.c.bf16 %v1576_v55, %v1572_v52  ;;  %7913 = vst [vmem:[#allocation63_spill] sm:$0xff] %v6873_v53 }
 0x246   : > { %4994 = vmatprep.subr.bf16.mxu1 %v1664_v54 }
 0x247   : > { %4995 = vmatpush3.bf16.msra.mxu1 %v1664_v54  ;;  %v6875_v54 = vpop.f32.mrb[2].mxu1 }
 0x248   : > { %7914 = vst [vmem:[#allocation64_spill] sm:$0xff] %v6875_v54  ;;  %v6877_v55 = vpop.f32.mrb[3].mxu1 }
 0x249   : > { %v1580_v57 = vpop.f32.mrb[12].mxu0  ;;  %7915 = vst [vmem:[#allocation65_spill] sm:$0xff] %v6877_v55 }
 0x24a   : > { %v1582_v58 = vpop.f32.mrb[13].mxu0 }
 0x24b   : > { %v1584_v59 = vpop.f32.mrb[14].mxu0 }
 0x24c   : > { %v1665_v60 = vpack.c.bf16 %v1584_v59, %v1580_v57  ;;  %v1586_v62 = vpop.f32.mrb[15].mxu0 }
 0x24d   : > { %v1669_v63 = vpack.c.bf16 %v1586_v62, %v1582_v58 }
 0x24e   : > { %4996 = vmatprep.subr.bf16.mxu1 %v1665_v60 }
 0x24f   : > { %4997 = vmatpush3.bf16.msra.mxu1 %v1665_v60 }
 0x250   : > { %4998 = vmatprep.subr.bf16.mxu1 %v1666_v44 }
 0x251   : > { %v6701_v0 = vpop.f32.mrb[16].mxu0 }
 0x252   : > { %7895 = vst [vmem:[#allocation46_spill] sm:$0xff] %v6701_v0  ;;  %v6705_v1 = vmul.f32 %v6701_v0, %v6701_v0  ;;  %v6707_v2 = vpop.f32.mrb[17].mxu0 }
 0x253   : > { %7896 = vst [vmem:[#allocation47_spill] sm:$0xff] %v6707_v2  ;;  %4999 = vmatpush3.bf16.msra.mxu1 %v1666_v44  ;;  %v6715_v4 = vmul.f32 %v6707_v2, %v6707_v2 }
 0x254   : > { %5000 = vmatprep.subr.bf16.mxu1 %v1667_v50  ;;  %1930 = vrot.lane.b32.xlu0 %v6705_v1, %s5911_s8 }
 0x255   : > { %v6711_v3 = vpop.f32.mrb[18].mxu0 }
 0x256   : > { %7897 = vst [vmem:[#allocation48_spill] sm:$0xff] %v6711_v3  ;;  %v6719_v5 = vmul.f32 %v6711_v3, %v6711_v3  ;;  %v6721_v6 = vpop.f32.mrb[19].mxu0 }
 0x257   : > { %7898 = vst [vmem:[#allocation49_spill] sm:$0xff] %v6721_v6  ;;  %5001 = vmatpush3.bf16.msra.mxu1 %v1667_v50  ;;  %v6733_v9 = vmul.f32 %v6721_v6, %v6721_v6  ;;  %v5462_v50 = vld [vmem:[%s7911_s30] sm:$0xff]  }
 0x258   : > { %5002 = vmatprep.subr.bf16.mxu1 %v1668_v56  ;;  %1928 = vrot.lane.b32.xlu0 %v6715_v4, %s5911_s8 }
 0x259   : > { %1934 = vrot.lane.b32.xlu1 %v6719_v5, %s5911_s8  ;;  %v6727_v7 = vpop.f32.mrb[20].mxu0  ;;  %5022 = vmatprep.subr.bf16.mxu0 %v5462_v50 }
 0x25a   : > { %7899 = vst [vmem:[#allocation50_spill] sm:$0xff] %v6727_v7  ;;  %v6729_v8 = vpop.f32.mrb[21].mxu0  ;;  %v6750_v14 = vmul.f32 %v6727_v7, %v6727_v7  ;;  %5023 = vmatpush3.bf16.msra.mxu0 %v5462_v50  ;;  %v2168_v7 = vld [vmem:[%s7943_s20] sm:$0x3] }
 0x25b   : > { %7900 = vst [vmem:[#allocation51_spill] sm:$0xff] %v6729_v8  ;;  %v6737_v10 = vmul.f32 %v6729_v8, %v6729_v8  ;;  %5003 = vmatpush3.bf16.msra.mxu1 %v1668_v56  ;;  %v6879_v56 = vpop.f32.mrb[4].mxu1  ;;  %5024 = vmatprep.subr.bf16.mxu0 %v5463_v51  ;;  %v7050_v8 = vld [vmem:[%s7945_s23] ss:$0 sm:$0xff] }
 0x25c   : > { %5004 = vmatprep.subr.bf16.mxu1 %v1669_v63  ;;  %7916 = vst [vmem:[#allocation66_spill] sm:$0xff] %v6879_v56  ;;  %v6881_v57 = vpop.f32.mrb[5].mxu1 }
 0x25d   : > { %1932 = vrot.lane.b32.xlu1 %v6733_v9, %s5911_s8  ;;  %1936 = vrot.lane.b32.xlu0 %v6737_v10, %s5911_s8  ;;  %v6743_v11 = vpop.f32.mrb[22].mxu0  ;;  %7917 = vst [vmem:[#allocation67_spill] sm:$0xff] %v6881_v57  ;;  %v6883_v58 = vpop.f32.mrb[6].mxu1  ;;  %v5465_v57 = vld [vmem:[%s7911_s30 + $0x18] sm:$0xff]  }
 0x25e   : > { %7901 = vst [vmem:[#allocation52_spill] sm:$0xff] %v6743_v11  ;;  %v6745_v12 = vpop.f32.mrb[23].mxu0  ;;  %v6767_v20 = vmul.f32 %v6743_v11, %v6743_v11  ;;  %7918 = vst [vmem:[#allocation68_spill] sm:$0xff] %v6883_v58  ;;  %v6887_v60 = vpop.f32.mrb[7].mxu1  ;;  %5025 = vmatpush3.bf16.msra.mxu0 %v5463_v51 }
 0x25f   : > { %7902 = vst [vmem:[#allocation53_spill] sm:$0xff] %v6745_v12  ;;  %v6754_v15 = vmul.f32 %v6745_v12, %v6745_v12  ;;  %5005 = vmatpush3.bf16.msra.mxu1 %v1669_v63  ;;  %7919 = vst [vmem:[#allocation69_spill] sm:$0xff] %v6887_v60  ;;  %v6889_v62 = vpop.f32.mrb[8].mxu1  ;;  %v6915_v51 = vpop.permute.xlu0 %2538 }
 0x260   : > { %7920 = vst [vmem:[#allocation70_spill] sm:$0xff] %v6889_v62  ;;  %v6891_v63 = vpop.f32.mrb[9].mxu1  ;;  %v5466_v62 = vld [vmem:[%s7911_s30 + $0x20] sm:$0xff]  }
 0x261   : > { %1938 = vrot.lane.b32.xlu1 %v6750_v14, %s5911_s8  ;;  %1940 = vrot.lane.b32.xlu0 %v6754_v15, %s5911_s8  ;;  %v6761_v17 = vpop.f32.mrb[24].mxu0  ;;  %7921 = vst [vmem:[#allocation71_spill] sm:$0xff] %v6891_v63 }
 0x262   : > { %7903 = vst [vmem:[#allocation54_spill] sm:$0xff] %v6761_v17  ;;  %v6763_v19 = vpop.f32.mrb[25].mxu0  ;;  %5007 = vmatmul.mubr.bf16.vlgmr.msra.gmra.mrb[16].mxu1 %v5455_v13  ;;  %v6784_v26 = vmul.f32 %v6761_v17, %v6761_v17  ;;  %v6893_v13 = vpop.f32.mrb[10].mxu1 }
 0x263   : > { %7904 = vst [vmem:[#allocation55_spill] sm:$0xff] %v6763_v19  ;;  %v6771_v22 = vmul.f32 %v6763_v19, %v6763_v19  ;;  %5010 = vmatprep.mubr.bf16.mxu1 %v5456_v16  ;;  %7922 = vst [vmem:[#allocation72_spill] sm:$0xff] %v6893_v13 }
 0x265   : > { %1942 = vrot.lane.b32.xlu1 %v6767_v20, %s5911_s8  ;;  %1944 = vrot.lane.b32.xlu0 %v6771_v22, %s5911_s8  ;;  %v6777_v23 = vpop.f32.mrb[26].mxu0 }
 0x266   : > { %7905 = vst [vmem:[#allocation56_spill] sm:$0xff] %v6777_v23  ;;  %v6779_v24 = vpop.f32.mrb[27].mxu0  ;;  %v6801_v31 = vmul.f32 %v6777_v23, %v6777_v23 }
 0x267   : > { %7906 = vst [vmem:[#allocation57_spill] sm:$0xff] %v6779_v24  ;;  %v6788_v27 = vmul.f32 %v6779_v24, %v6779_v24 }
 0x269   : > { %1946 = vrot.lane.b32.xlu1 %v6784_v26, %s5911_s8  ;;  %1948 = vrot.lane.b32.xlu0 %v6788_v27, %s5911_s8  ;;  %v6795_v29 = vpop.f32.mrb[28].mxu0 }
 0x26a   : > { %7907 = vst [vmem:[#allocation58_spill] sm:$0xff] %v6795_v29  ;;  %v6797_v30 = vpop.f32.mrb[29].mxu0  ;;  %5011 = vmatmul.mubr.bf16.gmra.mrb[20].mxu1 %v5457_v25  ;;  %v6819_v42 = vmul.f32 %v6795_v29, %v6795_v29  ;;  %v6897_v25 = vpop.f32.mrb[11].mxu1  ;;  %v2498_v29 = vshrl.u32 %v7765_v49, 7 }
 0x26b   : > { %7908 = vst [vmem:[#allocation59_spill] sm:$0xff] %v6797_v30  ;;  %v6805_v32 = vmul.f32 %v6797_v30, %v6797_v30  ;;  %5014 = vmatprep.mubr.bf16.mxu1 %v5458_v28  ;;  %7923 = vst [vmem:[#allocation73_spill] sm:$0xff] %v6897_v25  ;;  %v6899_v28 = vpop.f32.mrb[12].mxu1 }
 0x26c   : > { %7924 = vst [vmem:[#allocation74_spill] sm:$0xff] %v6899_v28  ;;  %v2499_v17 = vsub.s32 0, %v2498_v29  ;;  %v2599_v12 = vsub.s32 1, %v2498_v29 }
 0x26d   : > { %1950 = vrot.lane.b32.xlu1 %v6801_v31, %s5911_s8  ;;  %1952 = vrot.lane.b32.xlu0 %v6805_v32, %s5911_s8  ;;  %v6811_v38 = vpop.f32.mrb[30].mxu0 }
 0x26e   : > { %7909 = vst [vmem:[#allocation60_spill] sm:$0xff] %v6811_v38  ;;  %v6814_v40 = vpop.f32.mrb[31].mxu0  ;;  %v6826_v44 = vmul.f32 %v6811_v38, %v6811_v38  ;;  %v7060_v0 = vrot.slane %v2168_v7, %v2499_v17  ;;  %v7076_v17 = vld [vmem:[%s7947_s19] ss:$0 sm:$0xff] }
 0x26f   : > { %7910 = vst [vmem:[#allocation61_spill] sm:$0xff] %v6814_v40  ;;  %v6837_v46 = vmul.f32 %v6814_v40, %v6814_v40 }
 0x271   : > { %1954 = vrot.lane.b32.xlu1 %v6819_v42, %s5911_s8  ;;  %2570 = vperm.xlu0 %5391, %v2161_v39  }
 0x272   : > { %5015 = vmatmul.mubr.bf16.gmra.mrb[24].mxu1 %v5459_v41 }
 0x273   : > { %5018 = vmatprep.mubr.bf16.mxu1 %v5460_v43 }
 0x275   : > { %1958 = vrot.lane.b32.xlu1 %v6826_v44, %s5911_s8  ;;  %5396 = vset.pattern.permute.xlu0 %v7748_v18 }
 0x276   : > { %2424 = vperm.xlu0 %5396, %v6679_v34   ;;  %v2164_v34 = vld [vmem:[%s6498_s3 + $0x60] sm:$0xff] }
 0x279   : > { %2566 = vperm.xlu1 %5395, %v6689_v36   ;;  %v6845_v36 = vpop.permute.xlu1 %2419 }
 0x27a   : > { %2434 = vperm.xlu0 %5396, %v6619_v61   ;;  %5019 = vmatmul.mubr.bf16.gmra.mrb[28].mxu1 %v5461_v45  ;;  %v6850_v61 = vld [vmem:[%s6498_s3 + $0x70] sm:$0xff] }
 0x27d   : > { %2574 = vperm.xlu1 %5395, %v6694_v37   ;;  %v6853_v37 = vpop.permute.xlu1 %2429 }
 0x27e   : > { %1956 = vrot.lane.b32.xlu0 %v6837_v46, %s5911_s8  ;;  %s7953_s8 = scalar_lea.vmem %s7952_s4, %s6473_s24  ;;  %s8007_s24 = sld [smem:[#allocation27_spill]] }
 0x281   : > { %2578 = vperm.xlu1 %5395, %v2163_v47   ;;  %v6859_v48 = vpop.permute.xlu1 %2534 }
 0x282   : > { %2444 = vperm.xlu0 %5396, %v6686_v35   ;;  %v6857_v35 = vld [vmem:[%s6498_s3 + $0x68] sm:$0xff] }
 0x284   : > { %p4792_p2 = scmp.ne.s32.totalorder %s8007_s24, 1 }
 0x285   : > { %5397 = vset.pattern.permute.xlu1 %v7748_v18  ;;  %v6871_v52 = vpop.permute.xlu1 %2542  ;;  %s8008_s26 = sld [smem:[#allocation113_spill]] (!%p4792_p2) }
 0x286   : > { %2454 = vperm.xlu0 %5396, %v6675_v33   ;;  %2479 = vperm.xlu1 %5397, %v2164_v34   ;;  %v6863_v33 = vld [vmem:[%s6498_s3 + $0x78] sm:$0xff] }
 0x289   : > { %v6885_v59 = vpop.permute.xlu1 %2546 }
 0x28a   : > { %2464 = vperm.xlu0 %5396, %v2161_v39   ;;  %2489 = vperm.xlu1 %5397, %v6850_v61   ;;  %v6901_v39 = vpop.f32.mrb[13].mxu1 }
 0x28b   : > { %7925 = vst [vmem:[#allocation75_spill] sm:$0xff] %v6901_v39  ;;  %v6903_v41 = vpop.f32.mrb[14].mxu1  ;;  %v5464_v39 = vld [vmem:[%s7911_s30 + $0x10] sm:$0xff]   ;;  %s8009_s15 = smov (!%p4792_p2), %s8008_s26 }
 0x28c   : > { %7926 = vst [vmem:[#allocation76_spill] sm:$0xff] %v6903_v41  ;;  %v6905_v43 = vpop.f32.mrb[15].mxu1  ;;  %5026 = vmatprep.subr.bf16.mxu0 %v5464_v39 }
 0x28d   : > { %v6895_v16 = vpop.permute.xlu1 %2439  ;;  %7927 = vst [vmem:[#allocation77_spill] sm:$0xff] %v6905_v43  ;;  %5027 = vmatpush3.bf16.msra.mxu0 %v5464_v39 }
 0x28e   : > { %2474 = vperm.xlu0 %5396, %v2163_v47   ;;  %5398 = vset.pattern.permute.xlu1 %v7750_v21  ;;  %v6919_v21 = vpop.permute.xlu0 %2554 }
 0x28f   : > { %2582 = vperm.xlu1 %5398, %v2164_v34   ;;  %5028 = vmatprep.subr.bf16.mxu0 %v5465_v57 }
 0x291   : > { %v6907_v45 = vpop.permute.xlu1 %2449  ;;  %5029 = vmatpush3.bf16.msra.mxu0 %v5465_v57 }
 0x292   : > { %2484 = vperm.xlu0 %5396, %v6857_v35   ;;  %5030 = vmatprep.subr.bf16.mxu0 %v5466_v62 }
 0x293   : > { %5399 = vset.pattern.permute.xlu1 %v7748_v18 }
 0x295   : > { %v6909_v47 = vpop.permute.xlu1 %2550  ;;  %5031 = vmatpush3.bf16.msra.mxu0 %v5466_v62  ;;  %v5468_v62 = vld [vmem:[%s7911_s30 + $0x30] sm:$0xff]  }
 0x296   : > { %2494 = vperm.xlu0 %5396, %v6863_v33  }
 0x299   : > { %v6911_v34 = vpop.permute.xlu1 %2558 }
 0x29d   : > { %v6913_v50 = vpop.permute.xlu1 %2562 }
 0x2a1   : > { %v6917_v18 = vpop.permute.xlu1 %2459 }
 0x2a5   : > { %v6921_v25 = vpop.permute.xlu1 %2469 }
 0x2c6   : > { %v1931_v63 = vpop.permute.xlu0 %1930 }
 0x2c7   : > { %v6924_v43 = vadd.f32 %v1931_v63, %v6705_v1 }
 0x2c9   : > { %2177 = vperm.xlu1 %5399, %v6924_v43   ;;  %5498 = vrsqrt.f32 %v6924_v43  ;;  %vm2001_vm2 = vcmp.eq.f32.partialorder %v6924_v43, inf  ;;  %vm2003_vm4 = vcmp.eq.f32.partialorder %v6924_v43, 0.0 }
 0x2ca   : > { %v1929_v55 = vpop.permute.xlu0 %1928 }
 0x2cb   : > { %v6929_v60 = vadd.f32 %v1929_v55, %v6715_v4  ;;  %v1935_v53 = vpop.permute.xlu1 %1934 }
 0x2cc   : > { %v6934_v13 = vadd.f32 %v1935_v53, %v6719_v5  ;;  %v5467_v53 = vld [vmem:[%s7911_s30 + $0x28] sm:$0xff]  }
 0x2cd   : > { %2172 = vperm.xlu0 %5396, %v6929_v60   ;;  %5032 = vmatprep.subr.bf16.mxu0 %v5467_v53  ;;  %5500 = vrsqrt.f32 %v6929_v60  ;;  %vm1994_vm3 = vcmp.eq.f32.partialorder %v6929_v60, inf  ;;  %vm1996_vm5 = vcmp.eq.f32.partialorder %v6929_v60, 0.0 }
 0x2ce   : > { %5033 = vmatpush3.bf16.msra.mxu0 %v5467_v53  ;;  %vm2015_vm8 = vcmp.eq.f32.partialorder %v6934_v13, inf  ;;  %vm2017_vm9 = vcmp.eq.f32.partialorder %v6934_v13, 0.0 }
 0x2cf   : > { %v1933_v1 = vpop.permute.xlu1 %1932  ;;  %v1937_v63 = vpop.permute.xlu0 %1936  ;;  %5034 = vmatprep.subr.bf16.mxu0 %v5468_v62 }
 0x2d0   : > { %v6937_v41 = vadd.f32 %v1933_v1, %v6733_v9  ;;  %v6943_v4 = vadd.f32 %v1937_v63, %v6737_v10 }
 0x2d1   : > { %2187 = vperm.xlu0 %5396, %v6934_v13  }
 0x2d2   : > { %2182 = vperm.xlu1 %5399, %v6937_v41   ;;  %7928 = vst [vmem:[#allocation78_spill] sm:$0xff] %v6943_v4  ;;  %5035 = vmatpush3.bf16.msra.mxu0 %v5468_v62  ;;  %v7939_v62 = vmov 1   ;;  %5502 = vrsqrt.f32 %v6937_v41  ;;  %vm2008_vm6 = vcmp.eq.f32.partialorder %v6937_v41, inf  ;;  %vm2010_vm7 = vcmp.eq.f32.partialorder %v6937_v41, 0.0 }
 0x2d3   : > { %v1939_v55 = vpop.permute.xlu1 %1938  ;;  %v1941_v39 = vpop.permute.xlu0 %1940  ;;  %5504 = vrsqrt.f32 %v6934_v13 }
 0x2d4   : > { %v6946_v5 = vadd.f32 %v1939_v55, %v6750_v14  ;;  %v6952_v1 = vadd.f32 %v1941_v39, %v6754_v15  ;;  %v5469_v15 = vld [vmem:[%s7911_s30 + $0x38] sm:$0xff]   ;;  %s7954_s30 = sld [smem:[#allocation39_spill]] }
 0x2d5   : > { %2192 = vperm.xlu0 %5396, %v6943_v4   ;;  %5036 = vmatprep.subr.bf16.mxu0 %v5469_v15 }
 0x2d6   : > { %7929 = vst [vmem:[#allocation79_spill] sm:$0xff] %v6946_v5  ;;  %2197 = vperm.xlu1 %5399, %v6946_v5   ;;  %7930 = vst [vmem:[#allocation80_spill] sm:$0xff] %v6952_v1  ;;  %5037 = vmatpush3.bf16.msra.mxu0 %v5469_v15 }
 0x2d7   : > { %v1943_v9 = vpop.permute.xlu1 %1942  ;;  %v1945_v57 = vpop.permute.xlu0 %1944 }
 0x2d8   : > { %v6955_v10 = vadd.f32 %v1943_v9, %v6767_v20  ;;  %v6961_v55 = vadd.f32 %v1945_v57, %v6771_v22 }
 0x2da   : > { %7931 = vst [vmem:[#allocation81_spill] sm:$0xff] %v6955_v10  ;;  %2202 = vperm.xlu1 %5399, %v6952_v1   ;;  %2207 = vperm.xlu0 %5396, %v6955_v10   ;;  %7932 = vst [vmem:[#allocation82_spill] sm:$0xff] %v6961_v55 }
 0x2db   : > { %v1947_v14 = vpop.permute.xlu1 %1946  ;;  %v1949_v63 = vpop.permute.xlu0 %1948 }
 0x2dc   : > { %v6964_v28 = vadd.f32 %v1947_v14, %v6784_v26  ;;  %v6970_v39 = vadd.f32 %v1949_v63, %v6788_v27 }
 0x2de   : > { %7933 = vst [vmem:[#allocation83_spill] sm:$0xff] %v6964_v28  ;;  %2217 = vperm.xlu1 %5399, %v6964_v28   ;;  %2212 = vperm.xlu0 %5396, %v6961_v55   ;;  %7934 = vst [vmem:[#allocation84_spill] sm:$0xff] %v6970_v39 }
 0x2df   : > { %v1951_v20 = vpop.permute.xlu1 %1950  ;;  %v1953_v22 = vpop.permute.xlu0 %1952 }
 0x2e0   : > { %v6973_v53 = vadd.f32 %v1951_v20, %v6801_v31  ;;  %v6978_v9 = vadd.f32 %v1953_v22, %v6805_v32  ;;  %v7941_v32 = vmov 0   ;;  %v5472_v20 = vld [vmem:[%s7940_s10 + $0x10] sm:$0xff]   ;;  %v5473_v22 = vld [vmem:[%s7940_s10 + $0x18] sm:$0xff]  }
 0x2e2   : > { %7935 = vst [vmem:[#allocation85_spill] sm:$0xff] %v6973_v53  ;;  %2222 = vperm.xlu1 %5399, %v6970_v39   ;;  %2227 = vperm.xlu0 %5396, %v6973_v53   ;;  %7936 = vst [vmem:[#allocation86_spill] sm:$0xff] %v6978_v9  ;;  %v2503_v39 = vmul.f32 %v7060_v0, %v6853_v37 }
 0x2e3   : > { %v1955_v26 = vpop.permute.xlu1 %1954 }
 0x2e4   : > { %v6981_v57 = vadd.f32 %v1955_v26, %v6819_v42 }
 0x2e6   : > { %7937 = vst [vmem:[#allocation87_spill] sm:$0xff] %v6981_v57  ;;  %2237 = vperm.xlu1 %5399, %v6981_v57   ;;  %2232 = vperm.xlu0 %5396, %v6978_v9  }
 0x2e7   : > { %v1959_v27 = vpop.permute.xlu1 %1958 }
 0x2e8   : > { %v6986_v31 = vadd.f32 %v1959_v27, %v6826_v44 }
 0x2ea   : > { %7938 = vst [vmem:[#allocation88_spill] sm:$0xff] %v6986_v31  ;;  %2247 = vperm.xlu0 %5396, %v6986_v31   ;;  %5401 = vset.pattern.permute.xlu1 %v7939_v62  ;;  %v7063_v31 = vrot.slane %v2168_v7, %v2599_v12  ;;  %v2501_v7 = vmul.f32 %v7060_v0, %v6845_v36 }
 0x2eb   : > { %2590 = vperm.xlu1 %5401, %v6850_v61   ;;  %v5470_v61 = vld [vmem:[%s7940_s10] sm:$0xff]  }
 0x2ec   : > { %5054 = vmatprep.subr.bf16.mxu1 %v5470_v61  ;;  %v2602_v29 = vmul.f32 %v7063_v31, %v6915_v51  ;;  %v2603_v36 = vmul.f32 %v7063_v31, %v6871_v52  ;;  %v2605_v37 = vmul.f32 %v7063_v31, %v6909_v47  ;;  %v2607_v52 = vmul.f32 %v7063_v31, %v6911_v34 }
 0x2ed   : > { %5055 = vmatpush3.bf16.msra.mxu1 %v5470_v61  ;;  %v2509_v34 = vmul.f32 %v7060_v0, %v6917_v18 }
 0x2ee   : > { %5400 = vset.pattern.permute.xlu0 %v7939_v62 }
 0x2ef   : > { %2586 = vperm.xlu0 %5400, %v6857_v35   ;;  %5402 = vset.pattern.permute.xlu1 %v7941_v32  ;;  %v5471_v35 = vld [vmem:[%s7940_s10 + $0x8] sm:$0xff]  }
 0x2f0   : > { %v6994_v42 = vpop.permute.xlu0 %2570  ;;  %5056 = vmatprep.subr.bf16.mxu1 %v5471_v35 }
 0x2f1   : > { %5057 = vmatpush3.bf16.msra.mxu1 %v5471_v35 }
 0x2f2   : > { %5058 = vmatprep.subr.bf16.mxu1 %v5472_v20 }
 0x2f3   : > { %5405 = vset.pattern.permute.xlu0 %v7941_v32 }
 0x2f5   : > { %v2425_v44 = vpop.permute.xlu0 %2424  ;;  %5059 = vmatpush3.bf16.msra.mxu1 %v5472_v20 }
 0x2f6   : > { %5060 = vmatprep.subr.bf16.mxu1 %v5473_v22  ;;  %v2502_v57 = vmul.f32 %v7060_v0, %v2425_v44 }
 0x2f8   : > { %v7011_v26 = vpop.permute.xlu1 %2566 }
 0x2f9   : > { %v6997_v14 = vpop.permute.xlu0 %2434  ;;  %5061 = vmatpush3.bf16.msra.mxu1 %v5473_v22 }
 0x2fc   : > { %v7015_v27 = vpop.permute.xlu1 %2574 }
 0x2fd   : > { %v1957_v63 = vpop.permute.xlu0 %1956 }
 0x2fe   : > { %v7000_v15 = vadd.f32 %v1957_v63, %v6837_v46  ;;  %v5474_v46 = vld [vmem:[%s7940_s10 + $0x20] sm:$0xff]  }
 0x2ff   : > { %5062 = vmatprep.subr.bf16.mxu1 %v5474_v46 }
 0x300   : > { %7942 = vst [vmem:[#allocation89_spill] sm:$0xff] %v7000_v15  ;;  %2242 = vperm.xlu1 %5402, %v7000_v15   ;;  %5063 = vmatpush3.bf16.msra.mxu1 %v5474_v46 }
 0x304   : > { %5403 = vset.pattern.permute.xlu1 %v7939_v62 }
 0x305   : > { %2594 = vperm.xlu1 %5403, %v6863_v33   ;;  %v7013_v33 = vpop.permute.xlu0 %2444 }
 0x309   : > { %5404 = vset.pattern.permute.xlu1 %v7941_v32  ;;  %v7017_v62 = vpop.permute.xlu0 %2454  ;;  %v7019_v32 = vpop.permute.xlu1 %2578 }
 0x30d   : > { %v7021_v63 = vpop.permute.xlu0 %2464  ;;  %v7023_v35 = vpop.permute.xlu1 %2479 }
 0x311   : > { %v7025_v58 = vpop.permute.xlu0 %2474  ;;  %v7027_v46 = vpop.permute.xlu1 %2489 }
 0x315   : > { %v7038_v23 = vpop.permute.xlu0 %2484  ;;  %v7040_v24 = vpop.permute.xlu1 %2582 }
 0x319   : > { %v7054_v3 = vpop.permute.xlu0 %2494 }
 0x335   : > { %v5008_v61 = vpop.f32.mrb[16].mxu1 }
 0x336   : > { %v2354_v20 = vpop.f32.mrb[17].mxu1 }
 0x337   : > { %v5009_v22 = vpop.f32.mrb[18].mxu1 }
 0x338   : > { %v2357_v54 = vpop.f32.mrb[19].mxu1 }
 0x33d   : > { %v7029_v56 = vpop.f32.mrb[20].mxu1 }
 0x33e   : > { %v7031_v40 = vpop.f32.mrb[21].mxu1 }
 0x33f   : > { %v7033_v38 = vpop.f32.mrb[22].mxu1 }
 0x340   : > { %v7035_v30 = vpop.f32.mrb[23].mxu1 }
 0x345   : > { %v7042_v19 = vpop.f32.mrb[24].mxu1 }
 0x346   : > { %v7052_v11 = vpop.f32.mrb[25].mxu1 }
 0x347   : > { %v7056_v49 = vpop.f32.mrb[26].mxu1 }
 0x348   : > { %v2178_v6 = vpop.permute.xlu1 %2177  ;;  %v7058_v2 = vpop.f32.mrb[27].mxu1 }
 0x349   : > { %v2257_v15 = vmul.f32 %v7050_v8, %v2178_v6 }
 0x34b   : > { %v2358_v9 = vadd.f32 %v2357_v54, %v2257_v15 }
 0x34c   : > { %v2173_v53 = vpop.permute.xlu0 %2172 }
 0x34d   : > { %v2518_v28 = vadd.f32 %v2502_v57, %v2358_v9  ;;  %v2256_v55 = vmul.f32 %v7050_v8, %v2173_v53  ;;  %v7069_v5 = vpop.f32.mrb[28].mxu1  ;;  %v2601_v53 = vmul.f32 %v7063_v31, %v6859_v48  ;;  %v2505_v48 = vmul.f32 %v7060_v0, %v6895_v16 }
 0x34e   : > { %v7078_v6 = vpop.f32.mrb[29].mxu1 }
 0x34f   : > { %v2618_v12 = vadd.f32 %v2602_v29, %v2518_v28  ;;  %v2355_v54 = vadd.f32 %v2354_v20, %v2256_v55  ;;  %v7082_v44 = vpop.f32.mrb[30].mxu1  ;;  %v2604_v28 = vmul.f32 %v7063_v31, %v6885_v59  ;;  %v2504_v20 = vmul.f32 %v7060_v0, %v6997_v14 }
 0x350   : > { %v2188_v51 = vpop.permute.xlu0 %2187  ;;  %v7084_v9 = vpop.f32.mrb[31].mxu1 }
 0x351   : > { %v2641_v57 = vadd.f32 %v7076_v17, %v2618_v12  ;;  %v2517_v15 = vadd.f32 %v2501_v7, %v2355_v54  ;;  %v2183_v10 = vpop.permute.xlu1 %2182  ;;  %v2259_v4 = vmul.f32 %v7050_v8, %v2188_v51  ;;  %v2507_v12 = vmul.f32 %v7060_v0, %v6907_v45 }
 0x352   : > { %v2258_v55 = vmul.f32 %v7050_v8, %v2183_v10  ;;  %v2606_v45 = vmul.f32 %v7063_v31, %v6919_v21 }
 0x353   : > { %v2617_v29 = vadd.f32 %v2601_v53, %v2517_v15  ;;  %v2366_v7 = vadd.f32 %v5009_v22, %v2259_v4  ;;  %v2657_v14 = vmul.f32 0.01, %v2641_v57  ;;  %v2608_v4 = vmul.f32 %v7063_v31, %v6913_v50 }
 0x354   : > { %v2363_v59 = vadd.f32 %v5008_v61, %v2258_v55  ;;  %v2193_v54 = vpop.permute.xlu0 %2192  ;;  %v7119_v55 = vmul.f32 %v7060_v0, %v6921_v25  ;;  %v2506_v50 = vmul.f32 %v7060_v0, %v7013_v33  ;;  %v2508_v33 = vmul.f32 %v7060_v0, %v7017_v62 }
 0x355   : > { %v2520_v10 = vadd.f32 %v2504_v20, %v2366_v7  ;;  %v2198_v51 = vpop.permute.xlu1 %2197  ;;  %v2260_v16 = vmul.f32 %v7050_v8, %v2193_v54  ;;  %v2640_v1 = vadd.f32 %v7076_v17, %v2617_v29 }
 0x356   : > { %v2519_v22 = vadd.f32 %v2503_v39, %v2363_v59  ;;  %v2261_v47 = vmul.f32 %v7050_v8, %v2198_v51 }
 0x357   : > { %v2620_v61 = vadd.f32 %v2604_v28, %v2520_v10  ;;  %v2371_v53 = vadd.f32 %v7031_v40, %v2260_v16  ;;  %v2656_v15 = vmul.f32 0.01, %v2640_v1  ;;  %v2673_v28 = vmax.f32 %v2641_v57, %v2657_v14 }
 0x358   : > { %v2619_v20 = vadd.f32 %v2603_v36, %v2519_v22  ;;  %v2374_v21 = vadd.f32 %v7035_v30, %v2261_v47  ;;  %v2610_v57 = vmul.f32 %v7063_v31, %v6994_v42  ;;  %v2609_v14 = vmul.f32 %v7063_v31, %v7011_v26 }
 0x359   : > { %v2643_v39 = vadd.f32 %v7076_v17, %v2620_v61  ;;  %v2521_v29 = vadd.f32 %v2505_v48, %v2371_v53  ;;  %v2203_v7 = vpop.permute.xlu1 %2202  ;;  %v2208_v59 = vpop.permute.xlu0 %2207  ;;  %v2672_v18 = vmax.f32 %v2640_v1, %v2656_v15 }
 0x35a   : > { %v2642_v40 = vadd.f32 %v7076_v17, %v2619_v20  ;;  %v2522_v54 = vadd.f32 %v2506_v50, %v2374_v21  ;;  %v2262_v10 = vmul.f32 %v7050_v8, %v2203_v7  ;;  %v2263_v25 = vmul.f32 %v7050_v8, %v2208_v59 }
 0x35b   : > { %v2659_v36 = vmul.f32 0.01, %v2643_v39  ;;  %v2621_v51 = vadd.f32 %v2605_v37, %v2521_v29  ;;  %v2688_v30 = vpack.c.bf16 %v2673_v28, %v2672_v18  ;;  %v2510_v7 = vmul.f32 %v7060_v0, %v7021_v63 }
 0x35c   : > { %v2658_v16 = vmul.f32 0.01, %v2642_v40  ;;  %v2622_v22 = vadd.f32 %v2606_v45, %v2522_v54  ;;  %v2379_v48 = vadd.f32 %v7029_v56, %v2262_v10  ;;  %v2382_v1 = vadd.f32 %v7033_v38, %v2263_v25 }
 0x35d   : > { %v2675_v47 = vmax.f32 %v2643_v39, %v2659_v36  ;;  %v2644_v61 = vadd.f32 %v7076_v17, %v2621_v51  ;;  %v2218_v53 = vpop.permute.xlu1 %2217  ;;  %v2213_v62 = vpop.permute.xlu0 %2212  ;;  %5038 = vmatprep.mubr.bf16.mxu0 %v2688_v30  ;;  %v2611_v38 = vmul.f32 %v7063_v31, %v7015_v27  ;;  %v2612_v30 = vmul.f32 %v7063_v31, %v7019_v32 }
 0x35e   : > { %v2674_v37 = vmax.f32 %v2642_v40, %v2658_v16  ;;  %v2645_v15 = vadd.f32 %v7076_v17, %v2622_v22  ;;  %v2523_v45 = vadd.f32 %v2507_v12, %v2379_v48  ;;  %v2524_v50 = vadd.f32 %v2508_v33, %v2382_v1 }
 0x35f   : > { %v2265_v56 = vmul.f32 %v7050_v8, %v2218_v53  ;;  %v2264_v42 = vmul.f32 %v7050_v8, %v2213_v62  ;;  %v2660_v20 = vmul.f32 0.01, %v2644_v61  ;;  %v2513_v32 = vmul.f32 %v7060_v0, %v7023_v35 }
 0x360   : > { %v2623_v26 = vadd.f32 %v2607_v52, %v2523_v45  ;;  %v2624_v21 = vadd.f32 %v2608_v4, %v2524_v50  ;;  %v2689_v39 = vpack.c.bf16 %v2675_v47, %v2674_v37  ;;  %v2661_v29 = vmul.f32 0.01, %v2645_v15 }
 0x361   : > { %v2387_v59 = vadd.f32 %v7052_v11, %v2264_v42  ;;  %v2390_v12 = vadd.f32 %v7058_v2, %v2265_v56  ;;  %v2223_v18 = vpop.permute.xlu1 %2222  ;;  %v2228_v28 = vpop.permute.xlu0 %2227  ;;  %v2676_v40 = vmax.f32 %v2644_v61, %v2660_v20  ;;  %v2512_v4 = vmul.f32 %v7060_v0, %v7025_v58 }
 0x362   : > { %v2266_v27 = vmul.f32 %v7050_v8, %v2223_v18  ;;  %v2267_v54 = vmul.f32 %v7050_v8, %v2228_v28  ;;  %5039 = vmatmul.mubr.bf16.vlgmr.msra.gmra.mrb[32].mxu0 %v2689_v39  ;;  %v2677_v10 = vmax.f32 %v2645_v15, %v2661_v29  ;;  %v2646_v52 = vadd.f32 %v7076_v17, %v2623_v26 }
 0x363   : > { %v2525_v25 = vadd.f32 %v2509_v34, %v2387_v59  ;;  %v2526_v63 = vadd.f32 %v2510_v7, %v2390_v12  ;;  %v2647_v11 = vadd.f32 %v7076_v17, %v2624_v21  ;;  %v2613_v42 = vmul.f32 %v7063_v31, %v7040_v24 }
 0x364   : > { %v2395_v2 = vadd.f32 %v7042_v19, %v2266_v27  ;;  %v2398_v33 = vadd.f32 %v7056_v49, %v2267_v54  ;;  %v2690_v36 = vpack.c.bf16 %v2677_v10, %v2676_v40  ;;  %v2662_v51 = vmul.f32 0.01, %v2646_v52 }
 0x365   : > { %v2625_v16 = vadd.f32 %v2609_v14, %v2525_v25  ;;  %v2626_v22 = vadd.f32 %v2610_v57, %v2526_v63  ;;  %v2238_v48 = vpop.permute.xlu1 %2237  ;;  %v2233_v1 = vpop.permute.xlu0 %2232  ;;  %v2663_v47 = vmul.f32 0.01, %v2647_v11 }
 0x366   : > { %v2527_v58 = vadd.f32 %v7119_v55, %v2395_v2  ;;  %v2528_v34 = vadd.f32 %v2512_v4, %v2398_v33  ;;  %v2269_v61 = vmul.f32 %v7050_v8, %v2238_v48  ;;  %v2268_v53 = vmul.f32 %v7050_v8, %v2233_v1  ;;  %5042 = vmatprep.mubr.bf16.mxu0 %v2690_v36 }
 0x367   : > { %v2648_v19 = vadd.f32 %v7076_v17, %v2625_v16  ;;  %v2649_v49 = vadd.f32 %v7076_v17, %v2626_v22  ;;  %v2678_v62 = vmax.f32 %v2646_v52, %v2662_v51  ;;  %v2679_v37 = vmax.f32 %v2647_v11, %v2663_v47 }
 0x368   : > { %v2627_v57 = vadd.f32 %v2611_v38, %v2527_v58  ;;  %v2628_v14 = vadd.f32 %v2612_v30, %v2528_v34  ;;  %v2403_v15 = vadd.f32 %v7078_v6, %v2268_v53  ;;  %v2406_v21 = vadd.f32 %v7084_v9, %v2269_v61 }
 0x369   : > { %v2248_v55 = vpop.permute.xlu0 %2247  ;;  %v2691_v45 = vpack.c.bf16 %v2679_v37, %v2678_v62  ;;  %v2664_v50 = vmul.f32 0.01, %v2648_v19  ;;  %v2665_v56 = vmul.f32 0.01, %v2649_v49  ;;  %v2514_v6 = vmul.f32 %v7060_v0, %v7038_v23  ;;  %v5475_v62 = vld [vmem:[%s7940_s10 + $0x28] sm:$0xff]   ;;  %v5476_v37 = vld [vmem:[%s7940_s10 + $0x30] sm:$0xff]  }
 0x36a   : > { %v2529_v20 = vadd.f32 %v2513_v32, %v2403_v15  ;;  %v2650_v26 = vadd.f32 %v7076_v17, %v2627_v57  ;;  %v2651_v35 = vadd.f32 %v7076_v17, %v2628_v14  ;;  %v2591_v2 = vpop.permute.xlu1 %2590  ;;  %v2271_v33 = vmul.f32 %v7050_v8, %v2248_v55  ;;  %5064 = vmatprep.subr.bf16.mxu1 %v5475_v62 }
 0x36b   : > { %5043 = vmatmul.mubr.bf16.gmra.mrb[36].mxu0 %v2691_v45  ;;  %v2680_v39 = vmax.f32 %v2648_v19, %v2664_v50  ;;  %v2681_v29 = vmax.f32 %v2649_v49, %v2665_v56  ;;  %v2530_v40 = vadd.f32 %v2514_v6, %v2406_v21  ;;  %v2515_v16 = vmul.f32 %v7060_v0, %v7027_v46 }
 0x36c   : > { %v2629_v38 = vadd.f32 %v2613_v42, %v2529_v20  ;;  %v2666_v7 = vmul.f32 0.01, %v2650_v26  ;;  %v2667_v12 = vmul.f32 0.01, %v2651_v35  ;;  %v2414_v30 = vadd.f32 %v7082_v44, %v2271_v33  ;;  %5065 = vmatpush3.bf16.msra.mxu1 %v5475_v62 }
 0x36d   : > { %v2692_v59 = vpack.c.bf16 %v2681_v29, %v2680_v39  ;;  %v2516_v48 = vmul.f32 %v7060_v0, %v7054_v3  ;;  %v2615_v1 = vmul.f32 %v7063_v31, %v2591_v2  ;;  %5066 = vmatprep.subr.bf16.mxu1 %v5476_v37 }
 0x36e   : > { %v2587_v18 = vpop.permute.xlu0 %2586  ;;  %v2682_v28 = vmax.f32 %v2650_v26, %v2666_v7  ;;  %v2652_v24 = vadd.f32 %v7076_v17, %v2629_v38  ;;  %v2683_v9 = vmax.f32 %v2651_v35, %v2667_v12 }
 0x36f   : > { %v2614_v27 = vmul.f32 %v7063_v31, %v2587_v18  ;;  %5046 = vmatprep.mubr.bf16.mxu0 %v2692_v59  ;;  %v2532_v34 = vadd.f32 %v2516_v48, %v2414_v30 }
 0x370   : > { %v2693_v10 = vpack.c.bf16 %v2683_v9, %v2682_v28  ;;  %v2668_v4 = vmul.f32 0.01, %v2652_v24  ;;  %5067 = vmatpush3.bf16.msra.mxu1 %v5476_v37 }
 0x371   : > { %v2630_v54 = vadd.f32 %v2614_v27, %v2530_v40 }
 0x372   : > { %v2684_v63 = vmax.f32 %v2652_v24, %v2668_v4 }
 0x373   : > { %v2653_v52 = vadd.f32 %v7076_v17, %v2630_v54  ;;  %5047 = vmatmul.mubr.bf16.gmra.mrb[40].mxu0 %v2693_v10 }
 0x375   : > { %v2669_v25 = vmul.f32 0.01, %v2653_v52 }
 0x377   : > { %v2685_v23 = vmax.f32 %v2653_v52, %v2669_v25 }
 0x379   : > { %v2694_v11 = vpack.c.bf16 %v2685_v23, %v2684_v63 }
 0x37b   : > { %5050 = vmatprep.mubr.bf16.mxu0 %v2694_v11 }
 0x37f   : > { %v2243_v36 = vpop.permute.xlu1 %2242 }
 0x380   : > { %v2270_v51 = vmul.f32 %v7050_v8, %v2243_v36 }
 0x382   : > { %v2411_v22 = vadd.f32 %v7069_v5, %v2270_v51 }
 0x384   : > { %v2531_v47 = vadd.f32 %v2515_v16, %v2411_v22  ;;  %v2595_v58 = vpop.permute.xlu1 %2594 }
 0x385   : > { %v2616_v61 = vmul.f32 %v7063_v31, %v2595_v58  ;;  %v5477_v31 = vld [vmem:[%s7940_s10 + $0x38] sm:$0xff]  }
 0x386   : > { %v2631_v8 = vadd.f32 %v2615_v1, %v2531_v47  ;;  %5068 = vmatprep.subr.bf16.mxu1 %v5477_v31 }
 0x387   : > { %v2632_v44 = vadd.f32 %v2616_v61, %v2532_v34  ;;  %5069 = vmatpush3.bf16.msra.mxu1 %v5477_v31 }
 0x388   : > { %v2654_v53 = vadd.f32 %v7076_v17, %v2631_v8 }
 0x389   : > { %v2655_v46 = vadd.f32 %v7076_v17, %v2632_v44  ;;  %v7194_v17 = vld [vmem:[%s7949_s11] ss:$0 sm:$0xff] }
 0x38a   : > { %v2670_v5 = vmul.f32 0.01, %v2654_v53 }
 0x38b   : > { %v2671_v19 = vmul.f32 0.01, %v2655_v46 }
 0x38c   : > { %v2686_v0 = vmax.f32 %v2654_v53, %v2670_v5 }
 0x38d   : > { %v2687_v3 = vmax.f32 %v2655_v46, %v2671_v19 }
 0x38f   : > { %v2695_v49 = vpack.c.bf16 %v2687_v3, %v2686_v0 }
 0x391   : > { %5051 = vmatmul.mubr.bf16.gmra.mrb[44].mxu0 %v2695_v49 }
 0x435   : > { %v5040_v32 = vpop.f32.mrb[32].mxu0 }
 0x436   : > { %v2810_v57 = vadd.f32 %v5040_v32, %v7194_v17  ;;  %v2801_v14 = vpop.f32.mrb[33].mxu0 }
 0x437   : > { %v2802_v15 = vadd.f32 %v7194_v17, %v2801_v14  ;;  %v5041_v55 = vpop.f32.mrb[34].mxu0 }
 0x438   : > { %v2866_v45 = vmul.f32 0.01, %v2810_v57  ;;  %v2813_v50 = vadd.f32 %v5041_v55, %v7194_v17  ;;  %v2804_v56 = vpop.f32.mrb[35].mxu0 }
 0x439   : > { %v2864_v42 = vmul.f32 0.01, %v2802_v15  ;;  %v2805_v20 = vadd.f32 %v7194_v17, %v2804_v56 }
 0x43a   : > { %v2867_v26 = vmul.f32 0.01, %v2813_v50  ;;  %v2882_v39 = vmax.f32 %v2810_v57, %v2866_v45 }
 0x43b   : > { %v2865_v21 = vmul.f32 0.01, %v2805_v20  ;;  %v2880_v35 = vmax.f32 %v2802_v15, %v2864_v42 }
 0x43c   : > { %v2883_v29 = vmax.f32 %v2813_v50, %v2867_v26 }
 0x43d   : > { %v2881_v38 = vmax.f32 %v2805_v20, %v2865_v21 }
 0x43e   : > { %v2897_v7 = vpack.c.bf16 %v2883_v29, %v2882_v39  ;;  %v5044_v6 = vpop.f32.mrb[36].mxu0 }
 0x43f   : > { %v2826_v59 = vadd.f32 %v5044_v6, %v7194_v17  ;;  %v2817_v12 = vpop.f32.mrb[37].mxu0  ;;  %v2896_v18 = vpack.c.bf16 %v2881_v38, %v2880_v35 }
 0x440   : > { %v2818_v28 = vadd.f32 %v7194_v17, %v2817_v12  ;;  %v5045_v24 = vpop.f32.mrb[38].mxu0 }
 0x441   : > { %v2870_v40 = vmul.f32 0.01, %v2826_v59  ;;  %v2829_v27 = vadd.f32 %v5045_v24, %v7194_v17  ;;  %v2820_v9 = vpop.f32.mrb[39].mxu0  ;;  %5070 = vmatprep.mubr.bf16.mxu1 %v2896_v18  ;;  %5130 = vmatprep.subr.bf16.mxu1 %v2896_v18 }
 0x442   : > { %v2868_v54 = vmul.f32 0.01, %v2818_v28  ;;  %v2821_v10 = vadd.f32 %v7194_v17, %v2820_v9  ;;  %5071 = vmatmul.mubr.bf16.vlgmr.msra.gmra.mrb[32].mxu1 %v2897_v7 }
 0x443   : > { %v2871_v52 = vmul.f32 0.01, %v2829_v27  ;;  %5131 = vmatpush3.bf16.msra.mxu1 %v2896_v18  ;;  %v2886_v25 = vmax.f32 %v2826_v59, %v2870_v40  ;;  %v7228_v40 = vld [vmem:[%s7953_s8] ss:$0 sm:$0xff]  ;;  %s8010_s8 = sld [smem:[#allocation114_spill]] (!%p4792_p2) }
 0x444   : > { %v2869_v4 = vmul.f32 0.01, %v2821_v10  ;;  %5132 = vmatprep.subr.bf16.mxu1 %v2897_v7  ;;  %v2884_v23 = vmax.f32 %v2818_v28, %v2868_v54 }
 0x445   : > { %v2887_v63 = vmax.f32 %v2829_v27, %v2871_v52 }
 0x446   : > { %v2885_v11 = vmax.f32 %v2821_v10, %v2869_v4  ;;  %v5048_v2 = vpop.f32.mrb[40].mxu0 }
 0x447   : > { %v2842_v33 = vadd.f32 %v5048_v2, %v7194_v17  ;;  %v2833_v36 = vpop.f32.mrb[41].mxu0  ;;  %5133 = vmatpush3.bf16.msra.mxu1 %v2897_v7  ;;  %v2899_v51 = vpack.c.bf16 %v2887_v63, %v2886_v25 }
 0x448   : > { %v2834_v30 = vadd.f32 %v7194_v17, %v2833_v36  ;;  %v5049_v16 = vpop.f32.mrb[42].mxu0  ;;  %v2898_v22 = vpack.c.bf16 %v2885_v11, %v2884_v23 }
 0x449   : > { %v2874_v48 = vmul.f32 0.01, %v2842_v33  ;;  %v2845_v1 = vadd.f32 %v5049_v16, %v7194_v17  ;;  %v2836_v47 = vpop.f32.mrb[43].mxu0 }
 0x44a   : > { %v2872_v58 = vmul.f32 0.01, %v2834_v30  ;;  %v2837_v34 = vadd.f32 %v7194_v17, %v2836_v47  ;;  %5074 = vmatprep.mubr.bf16.mxu1 %v2898_v22  ;;  %5134 = vmatprep.subr.bf16.mxu1 %v2898_v22 }
 0x44b   : > { %v2875_v61 = vmul.f32 0.01, %v2845_v1  ;;  %5075 = vmatmul.mubr.bf16.gmra.mrb[36].mxu1 %v2899_v51  ;;  %v2890_v44 = vmax.f32 %v2842_v33, %v2874_v48 }
 0x44c   : > { %v2873_v8 = vmul.f32 0.01, %v2837_v34  ;;  %5135 = vmatpush3.bf16.msra.mxu1 %v2898_v22  ;;  %v2888_v46 = vmax.f32 %v2834_v30, %v2872_v58 }
 0x44d   : > { %v2891_v53 = vmax.f32 %v2845_v1, %v2875_v61  ;;  %5136 = vmatprep.subr.bf16.mxu1 %v2899_v51 }
 0x44e   : > { %v2889_v5 = vmax.f32 %v2837_v34, %v2873_v8 }
 0x44f   : > { %v2901_v19 = vpack.c.bf16 %v2891_v53, %v2890_v44 }
 0x450   : > { %5137 = vmatpush3.bf16.msra.mxu1 %v2899_v51  ;;  %v2900_v0 = vpack.c.bf16 %v2889_v5, %v2888_v46 }
 0x452   : > { %5078 = vmatprep.mubr.bf16.mxu1 %v2900_v0  ;;  %5138 = vmatprep.subr.bf16.mxu1 %v2900_v0 }
 0x453   : > { %5079 = vmatmul.mubr.bf16.gmra.mrb[40].mxu1 %v2901_v19 }
 0x454   : > { %5139 = vmatpush3.bf16.msra.mxu1 %v2900_v0 }
 0x455   : > { %5140 = vmatprep.subr.bf16.mxu1 %v2901_v19 }
 0x458   : > { %5141 = vmatpush3.bf16.msra.mxu1 %v2901_v19 }
 0x464   : > { %v5052_v3 = vpop.f32.mrb[44].mxu0 }
 0x465   : > { %v2858_v49 = vadd.f32 %v5052_v3, %v7194_v17  ;;  %v2849_v62 = vpop.f32.mrb[45].mxu0 }
 0x466   : > { %v2850_v37 = vadd.f32 %v7194_v17, %v2849_v62  ;;  %v5053_v31 = vpop.f32.mrb[46].mxu0 }
 0x467   : > { %v2878_v32 = vmul.f32 0.01, %v2858_v49  ;;  %v2861_v57 = vadd.f32 %v5053_v31, %v7194_v17  ;;  %v2852_v14 = vpop.f32.mrb[47].mxu0 }
 0x468   : > { %v2876_v15 = vmul.f32 0.01, %v2850_v37  ;;  %v2853_v55 = vadd.f32 %v7194_v17, %v2852_v14  ;;  %v7217_v17 = vld [vmem:[%s7951_s27] ss:$0 sm:$0xff] }
 0x469   : > { %v2879_v45 = vmul.f32 0.01, %v2861_v57  ;;  %v2894_v56 = vmax.f32 %v2858_v49, %v2878_v32 }
 0x46a   : > { %v2877_v50 = vmul.f32 0.01, %v2853_v55  ;;  %v2892_v20 = vmax.f32 %v2850_v37, %v2876_v15 }
 0x46b   : > { %v2895_v42 = vmax.f32 %v2861_v57, %v2879_v45 }
 0x46c   : > { %v2893_v26 = vmax.f32 %v2853_v55, %v2877_v50 }
 0x46d   : > { %v2903_v21 = vpack.c.bf16 %v2895_v42, %v2894_v56 }
 0x46e   : > { %v2902_v39 = vpack.c.bf16 %v2893_v26, %v2892_v20 }
 0x470   : > { %5082 = vmatprep.mubr.bf16.mxu1 %v2902_v39  ;;  %5142 = vmatprep.subr.bf16.mxu1 %v2902_v39 }
 0x471   : > { %5083 = vmatmul.mubr.bf16.gmra.mrb[44].mxu1 %v2903_v21 }
 0x472   : > { %5143 = vmatpush3.bf16.msra.mxu1 %v2902_v39 }
 0x473   : > { %5144 = vmatprep.subr.bf16.mxu1 %v2903_v21 }
 0x476   : > { %5145 = vmatpush3.bf16.msra.mxu1 %v2903_v21 }
 0x515   : > { %v5072_v29 = vpop.f32.mrb[32].mxu1 }
 0x516   : > { %v3018_v35 = vadd.f32 %v5072_v29, %v7217_v17  ;;  %v3009_v38 = vpop.f32.mrb[33].mxu1 }
 0x517   : > { %v3010_v7 = vadd.f32 %v7217_v17, %v3009_v38  ;;  %v5073_v6 = vpop.f32.mrb[34].mxu1  ;;  %v5479_v38 = vld [vmem:[%s7954_s30 + $0x8] sm:$0xff]  }
 0x518   : > { %v3074_v59 = vmul.f32 0.01, %v3018_v35  ;;  %v3021_v12 = vadd.f32 %v5073_v6, %v7217_v17  ;;  %v3012_v18 = vpop.f32.mrb[35].mxu1  ;;  %v5480_v6 = vld [vmem:[%s7954_s30 + $0x10] sm:$0xff]  }
 0x519   : > { %v3072_v28 = vmul.f32 0.01, %v3010_v7  ;;  %v3013_v24 = vadd.f32 %v7217_v17, %v3012_v18 }
 0x51a   : > { %v3090_v27 = vmax.f32 %v3018_v35, %v3074_v59  ;;  %v3075_v10 = vmul.f32 0.01, %v3021_v12  ;;  %v5478_v35 = vld [vmem:[%s7954_s30] sm:$0xff]   ;;  %v5481_v59 = vld [vmem:[%s7954_s30 + $0x18] sm:$0xff]  }
 0x51b   : > { %v3073_v9 = vmul.f32 0.01, %v3013_v24  ;;  %v3088_v54 = vmax.f32 %v3010_v7, %v3072_v28  ;;  %5146 = vmatprep.mubr.bf16.mxu1 %v5478_v35 }
 0x51c   : > { %v3113_v52 = vmul.f32 %v7228_v40, %v3090_v27  ;;  %v3091_v2 = vmax.f32 %v3021_v12, %v3075_v10  ;;  %5147 = vmatmul.mubr.bf16.vlgmr.msra.gmra.mrb[48].mxu1 %v5479_v38 }
 0x51d   : > { %v3089_v4 = vmax.f32 %v3013_v24, %v3073_v9  ;;  %v3111_v51 = vmul.f32 %v7228_v40, %v3088_v54  ;;  %5150 = vmatprep.mubr.bf16.mxu1 %v5480_v6 }
 0x51e   : > { %v5076_v25 = vpop.f32.mrb[36].mxu1  ;;  %3131 = vadd.xlane.f32.xlu0 %v3113_v52  ;;  %v3114_v61 = vmul.f32 %v7228_v40, %v3091_v2 }
 0x51f   : > { %v3034_v63 = vadd.f32 %v5076_v25, %v7217_v17  ;;  %v3025_v23 = vpop.f32.mrb[37].mxu1  ;;  %v3112_v11 = vmul.f32 %v7228_v40, %v3089_v4 }
 0x520   : > { %v3026_v33 = vadd.f32 %v7217_v17, %v3025_v23  ;;  %v5077_v36 = vpop.f32.mrb[38].mxu1 }
 0x521   : > { %v3078_v30 = vmul.f32 0.01, %v3034_v63  ;;  %v3037_v16 = vadd.f32 %v5077_v36, %v7217_v17  ;;  %v3028_v22 = vpop.f32.mrb[39].mxu1  ;;  %3129 = vadd.xlane.f32.xlu1 %v3112_v11 }
 0x522   : > { %v3076_v48 = vmul.f32 0.01, %v3026_v33  ;;  %v3029_v1 = vadd.f32 %v7217_v17, %v3028_v22  ;;  %3127 = vadd.xlane.f32.xlu0 %v3111_v51 }
 0x523   : > { %v3094_v47 = vmax.f32 %v3034_v63, %v3078_v30  ;;  %v3079_v58 = vmul.f32 0.01, %v3037_v16 }
 0x524   : > { %v3077_v34 = vmul.f32 0.01, %v3029_v1  ;;  %v3092_v8 = vmax.f32 %v3026_v33, %v3076_v48  ;;  %5151 = vmatmul.mubr.bf16.gmra.mrb[52].mxu1 %v5481_v59  ;;  %v7955_v48 = vld [vmem:[#allocation80_spill] sm:$0xff]  ;;  %v7961_v59 = vld [vmem:[#allocation83_spill] sm:$0xff] }
 0x525   : > { %v3117_v44 = vmul.f32 %v7228_v40, %v3094_v47  ;;  %v3095_v0 = vmax.f32 %v3037_v16, %v3079_v58  ;;  %5506 = vrsqrt.f32 %v7955_v48  ;;  %v7956_v47 = vld [vmem:[#allocation84_spill] sm:$0xff]  ;;  %vm2036_vm10 = vcmp.eq.f32.partialorder %v7955_v48, inf }
 0x526   : > { %v3093_v53 = vmax.f32 %v3029_v1, %v3077_v34  ;;  %v5080_v46 = vpop.f32.mrb[40].mxu1  ;;  %3133 = vadd.xlane.f32.xlu0 %v3114_v61  ;;  %v3115_v57 = vmul.f32 %v7228_v40, %v3092_v8  ;;  %5508 = vrsqrt.f32 %v7956_v47  ;;  %v7957_v34 = vld [vmem:[#allocation78_spill] sm:$0xff]  ;;  %vm2064_vm11 = vcmp.eq.f32.partialorder %v7956_v47, inf }
 0x527   : > { %v3050_v5 = vadd.f32 %v5080_v46, %v7217_v17  ;;  %v3041_v19 = vpop.f32.mrb[41].mxu1  ;;  %3139 = vadd.xlane.f32.xlu1 %v3117_v44  ;;  %v3118_v56 = vmul.f32 %v7228_v40, %v3095_v0  ;;  %5510 = vrsqrt.f32 %v7957_v34  ;;  %v2004_v44 = vand.u32 2147483648, %v6924_v43  ;;  %v7958_v0 = vld [vmem:[#allocation81_spill] sm:$0xff] }
 0x528   : > { %v3042_v3 = vadd.f32 %v7217_v17, %v3041_v19  ;;  %v5081_v49 = vpop.f32.mrb[42].mxu1  ;;  %v3116_v62 = vmul.f32 %v7228_v40, %v3093_v53  ;;  %5512 = vrsqrt.f32 %v7958_v0  ;;  %vm2038_vm12 = vcmp.eq.f32.partialorder %v7955_v48, 0.0 }
 0x529   : > { %v3082_v37 = vmul.f32 0.01, %v3050_v5  ;;  %v3053_v31 = vadd.f32 %v5081_v49, %v7217_v17  ;;  %v3044_v32 = vpop.f32.mrb[43].mxu1  ;;  %vm2022_vm13 = vcmp.eq.f32.partialorder %v7957_v34, inf  ;;  %vm2066_vm14 = vcmp.eq.f32.partialorder %v7956_v47, 0.0 }
 0x52a   : > { %v3080_v14 = vmul.f32 0.01, %v3042_v3  ;;  %v3045_v15 = vadd.f32 %v7217_v17, %v3044_v32  ;;  %3137 = vadd.xlane.f32.xlu0 %v3116_v62  ;;  %v2011_v32 = vand.u32 2147483648, %v6937_v41  ;;  %vm2024_vm15 = vcmp.eq.f32.partialorder %v7957_v34, 0.0 }
 0x52b   : > { %v3098_v55 = vmax.f32 %v3050_v5, %v3082_v37  ;;  %3135 = vadd.xlane.f32.xlu1 %v3115_v57  ;;  %v3083_v45 = vmul.f32 0.01, %v3053_v31  ;;  %v1997_v5 = vand.u32 2147483648, %v6929_v60  ;;  %vm2043_vm0 = vcmp.eq.f32.partialorder %v7958_v0, inf }
 0x52c   : > { %v3081_v50 = vmul.f32 0.01, %v3045_v15  ;;  %v3096_v42 = vmax.f32 %v3042_v3, %v3080_v14 }
 0x52d   : > { %v3121_v20 = vmul.f32 %v7228_v40, %v3098_v55  ;;  %v3099_v21 = vmax.f32 %v3053_v31, %v3083_v45  ;;  %v7959_v31 = vld [vmem:[#allocation79_spill] sm:$0xff] }
 0x52e   : > { %v3097_v26 = vmax.f32 %v3045_v15, %v3081_v50  ;;  %3141 = vadd.xlane.f32.xlu0 %v3118_v56  ;;  %v3119_v29 = vmul.f32 %v7228_v40, %v3096_v42  ;;  %5514 = vrsqrt.f32 %v7959_v31  ;;  %v2018_v50 = vand.u32 2147483648, %v6934_v13 }
 0x52f   : > { %3147 = vadd.xlane.f32.xlu1 %v3121_v20  ;;  %v3122_v7 = vmul.f32 %v7228_v40, %v3099_v21  ;;  %v7960_v20 = vld [vmem:[#allocation82_spill] sm:$0xff]  ;;  %vm2029_vm1 = vcmp.eq.f32.partialorder %v7959_v31, inf }
 0x530   : > { %v3120_v39 = vmul.f32 %v7228_v40, %v3097_v26 }
 0x532   : > { %3145 = vadd.xlane.f32.xlu0 %v3120_v39 }
 0x533   : > { %3143 = vadd.xlane.f32.xlu1 %v3119_v29  ;;  %v2039_v29 = vand.u32 2147483648, %v7955_v48 }
 0x536   : > { %3149 = vadd.xlane.f32.xlu0 %v3122_v7  ;;  %v2067_v7 = vand.u32 2147483648, %v7956_v47 }
 0x544   : > { %v5084_v12 = vpop.f32.mrb[44].mxu1 }
 0x545   : > { %v3066_v18 = vadd.f32 %v5084_v12, %v7217_v17  ;;  %v3057_v28 = vpop.f32.mrb[45].mxu1 }
 0x546   : > { %v3058_v24 = vadd.f32 %v7217_v17, %v3057_v28  ;;  %v5085_v27 = vpop.f32.mrb[46].mxu1 }
 0x547   : > { %v3086_v9 = vmul.f32 0.01, %v3066_v18  ;;  %v3069_v54 = vadd.f32 %v5085_v27, %v7217_v17  ;;  %v3060_v10 = vpop.f32.mrb[47].mxu1  ;;  %v7312_v27 = vld [vmem:[%s1253_s12] ss:$0 sm:$0xff]  ;;  %s7968_s12 = sld [smem:[#allocation40_spill]] }
 0x548   : > { %v3084_v52 = vmul.f32 0.01, %v3058_v24  ;;  %v3061_v4 = vadd.f32 %v7217_v17, %v3060_v10  ;;  %v5499_v17 = vpop.eup %5498 }
 0x549   : > { %v3102_v25 = vmax.f32 %v3066_v18, %v3086_v9  ;;  %v3087_v63 = vmul.f32 0.01, %v3069_v54  ;;  %v5501_v22 = vpop.eup %5500  ;;  %v2000_v1 = vmul.f32 %v5499_v17, %v6924_v43 }
 0x54a   : > { %v3085_v23 = vmul.f32 0.01, %v3061_v4  ;;  %v3100_v11 = vmax.f32 %v3058_v24, %v3084_v52  ;;  %v1993_v58 = vmul.f32 %v5501_v22, %v6929_v60 }
 0x54b   : > { %v3125_v2 = vmul.f32 %v7228_v40, %v3102_v25  ;;  %v3103_v36 = vmax.f32 %v3069_v54, %v3087_v63  ;;  %v2002_v61 = vsel %vm2001_vm2, %v6924_v43, %v2000_v1  ;;  %v2025_v54 = vand.u32 2147483648, %v7957_v34 }
 0x54c   : > { %v3101_v33 = vmax.f32 %v3061_v4, %v3085_v23  ;;  %v3123_v30 = vmul.f32 %v7228_v40, %v3100_v11  ;;  %v1995_v53 = vsel %vm1994_vm3, %v6929_v60, %v1993_v58  ;;  %v2005_v19 = vsel %vm2003_vm4, %v2004_v44, %v2002_v61  ;;  %v7963_v23 = vld [vmem:[#allocation85_spill] sm:$0xff] }
 0x54d   : > { %3155 = vadd.xlane.f32.xlu1 %v3125_v2  ;;  %v3126_v16 = vmul.f32 %v7228_v40, %v3103_v36  ;;  %v1998_v3 = vsel %vm1996_vm5, %v1997_v5, %v1995_v53  ;;  %v2105_v43 = vadd.f32 1.0, %v2005_v19  ;;  %vm2045_vm2 = vcmp.eq.f32.partialorder %v7958_v0, 0.0 }
 0x54e   : > { %v3124_v51 = vmul.f32 %v7228_v40, %v3101_v33  ;;  %v5503_v40 = vpop.eup %5502  ;;  %v2104_v14 = vadd.f32 1.0, %v1998_v3  ;;  %vm2031_vm3 = vcmp.eq.f32.partialorder %v7959_v31, 0.0  ;;  %vm2050_vm4 = vcmp.eq.f32.partialorder %v7960_v20, inf }
 0x54f   : > { %v2007_v8 = vmul.f32 %v5503_v40, %v6937_v41  ;;  %v5505_v46 = vpop.eup %5504  ;;  %5516 = vrcp.f32 %v2105_v43  ;;  %vm2052_vm5 = vcmp.eq.f32.partialorder %v7960_v20, 0.0 }
 0x550   : > { %3153 = vadd.xlane.f32.xlu0 %v3124_v51  ;;  %v2014_v62 = vmul.f32 %v5505_v46, %v6934_v13  ;;  %v5507_v37 = vpop.eup %5506  ;;  %5518 = vrcp.f32 %v2104_v14  ;;  %v7965_v14 = vld [vmem:[#allocation87_spill] sm:$0xff] }
 0x551   : > { %3151 = vadd.xlane.f32.xlu1 %v3123_v30  ;;  %v2009_v49 = vsel %vm2008_vm6, %v6937_v41, %v2007_v8  ;;  %v5509_v57 = vpop.eup %5508  ;;  %v2035_v15 = vmul.f32 %v5507_v37, %v7955_v48  ;;  %5520 = vrsqrt.f32 %v7960_v20  ;;  %vm2057_vm6 = vcmp.eq.f32.partialorder %v7961_v59, inf }
 0x552   : > { %v2012_v60 = vsel %vm2010_vm7, %v2011_v32, %v2009_v49  ;;  %v2016_v55 = vsel %vm2015_vm8, %v6934_v13, %v2014_v62  ;;  %v5511_v45 = vpop.eup %5510  ;;  %v2063_v56 = vmul.f32 %v5509_v57, %v7956_v47  ;;  %v7964_v62 = vld [vmem:[#allocation86_spill] sm:$0xff]  ;;  %vm2059_vm7 = vcmp.eq.f32.partialorder %v7961_v59, 0.0 }
 0x553   : > { %v2106_v42 = vadd.f32 1.0, %v2012_v60  ;;  %v2019_v41 = vsel %vm2017_vm9, %v2018_v50, %v2016_v55  ;;  %v2037_v26 = vsel %vm2036_vm10, %v7955_v48, %v2035_v15  ;;  %v2021_v21 = vmul.f32 %v5511_v45, %v7957_v34  ;;  %v5513_v39 = vpop.eup %5512 }
 0x554   : > { %3157 = vadd.xlane.f32.xlu0 %v3126_v16  ;;  %v2065_v35 = vsel %vm2064_vm11, %v7956_v47, %v2063_v56  ;;  %v2107_v13 = vadd.f32 1.0, %v2019_v41  ;;  %v5515_v6 = vpop.eup %5514  ;;  %v2040_v12 = vsel %vm2038_vm12, %v2039_v29, %v2037_v26  ;;  %v2042_v24 = vmul.f32 %v5513_v39, %v7958_v0  ;;  %v7966_v39 = vld [vmem:[#allocation88_spill] sm:$0xff] }
 0x555   : > { %5522 = vrcp.f32 %v2106_v42  ;;  %v2023_v18 = vsel %vm2022_vm13, %v7957_v34, %v2021_v21  ;;  %v2068_v28 = vsel %vm2066_vm14, %v2067_v7, %v2065_v35  ;;  %v2110_v4 = vadd.f32 1.0, %v2040_v12 }
 0x556   : > { %5524 = vrsqrt.f32 %v7961_v59  ;;  %v2028_v25 = vmul.f32 %v5515_v6, %v7959_v31  ;;  %v2026_v2 = vsel %vm2024_vm15, %v2025_v54, %v2023_v18  ;;  %v2114_v33 = vadd.f32 1.0, %v2068_v28 }
 0x557   : > { %5526 = vrcp.f32 %v2107_v13  ;;  %v2044_v30 = vsel %vm2043_vm0, %v7958_v0, %v2042_v24  ;;  %v2046_v48 = vand.u32 2147483648, %v7958_v0  ;;  %v2108_v47 = vadd.f32 1.0, %v2026_v2 }
 0x558   : > { %5528 = vrsqrt.f32 %v7963_v23  ;;  %v2030_v58 = vsel %vm2029_vm1, %v7959_v31, %v2028_v25  ;;  %v2032_v34 = vand.u32 2147483648, %v7959_v31  ;;  %v2053_v55 = vand.u32 2147483648, %v7960_v20 }
 0x559   : > { %v5517_v63 = vpop.eup %5516  ;;  %5530 = vrcp.f32 %v2110_v4  ;;  %v2047_v61 = vsel %vm2045_vm2, %v2046_v48, %v2044_v30  ;;  %vm2071_vm8 = vcmp.eq.f32.partialorder %v7963_v23, inf  ;;  %v2074_v54 = vand.u32 2147483648, %v7963_v23 }
 0x55a   : > { %v5519_v36 = vpop.eup %5518  ;;  %5532 = vrcp.f32 %v2114_v33  ;;  %v2033_v19 = vsel %vm2031_vm3, %v2032_v34, %v2030_v58  ;;  %v2111_v3 = vadd.f32 1.0, %v2047_v61  ;;  %vm2073_vm9 = vcmp.eq.f32.partialorder %v7963_v23, 0.0 }
 0x55b   : > { %v5521_v16 = vpop.eup %5520  ;;  %5534 = vrcp.f32 %v2108_v47  ;;  %v2109_v37 = vadd.f32 1.0, %v2033_v19  ;;  %vm2085_vm10 = vcmp.eq.f32.partialorder %v7965_v14, inf  ;;  %vm2078_vm11 = vcmp.eq.f32.partialorder %v7964_v62, inf }
 0x55c   : > { %v2049_v44 = vmul.f32 %v5521_v16, %v7960_v20  ;;  %5536 = vrsqrt.f32 %v7964_v62  ;;  %v2088_v34 = vand.u32 2147483648, %v7965_v14  ;;  %v2081_v61 = vand.u32 2147483648, %v7964_v62 }
 0x55d   : > { %5538 = vrsqrt.f32 %v7965_v14  ;;  %vm2087_vm12 = vcmp.eq.f32.partialorder %v7965_v14, 0.0  ;;  %vm2080_vm13 = vcmp.eq.f32.partialorder %v7964_v62, 0.0  ;;  %vm2099_vm14 = vcmp.eq.f32.partialorder %v7966_v39, inf }
 0x55e   : > { %v2051_v31 = vsel %vm2050_vm4, %v7960_v20, %v2049_v44  ;;  %5540 = vrcp.f32 %v2111_v3  ;;  %v2060_v20 = vand.u32 2147483648, %v7961_v59  ;;  %vm2101_vm0 = vcmp.eq.f32.partialorder %v7966_v39, 0.0 }
 0x55f   : > { %v5523_v8 = vpop.eup %5522  ;;  %v2054_v50 = vsel %vm2052_vm5, %v2053_v55, %v2051_v31  ;;  %5542 = vrcp.f32 %v2109_v37  ;;  %vm3415_vm2 = vcmask 15360  }
 0x560   : > { %v5525_v53 = vpop.eup %5524  ;;  %5544 = vrsqrt.f32 %v7966_v39  ;;  %v2112_v6 = vadd.f32 1.0, %v2054_v50 }
 0x561   : > { %v5527_v0 = vpop.eup %5526  ;;  %v2056_v43 = vmul.f32 %v5525_v53, %v7961_v59 }
 0x562   : > { %v5529_v57 = vpop.eup %5528 }
 0x563   : > { %v5531_v56 = vpop.eup %5530  ;;  %v2058_v41 = vsel %vm2057_vm6, %v7961_v59, %v2056_v43  ;;  %v2070_v26 = vmul.f32 %v5529_v57, %v7963_v23 }
 0x564   : > { %v5533_v21 = vpop.eup %5532  ;;  %v2061_v12 = vsel %vm2059_vm7, %v2060_v20, %v2058_v41 }
 0x565   : > { %v5535_v18 = vpop.eup %5534  ;;  %v2072_v28 = vsel %vm2071_vm8, %v7963_v23, %v2070_v26 }
 0x566   : > { %v2075_v59 = vsel %vm2073_vm9, %v2074_v54, %v2072_v28 }
 0x5ab   : > { %v3132_v38 = vpop.xlane.xlu0 %3131 }
 0x5ac   : > { %v3168_v17 = vadd.f32 %v7312_v27, %v3132_v38  ;;  %v7967_v38 = vld [vmem:[#allocation89_spill] sm:$0xff] }
 0x5ad   : > { %5546 = vrsqrt.f32 %v7967_v38  ;;  %vm2092_vm15 = vcmp.eq.f32.partialorder %v7967_v38, inf  ;;  %vm2094_vm1 = vcmp.eq.f32.partialorder %v7967_v38, 0.0 }
 0x5ae   : > { %v3130_v9 = vpop.xlane.xlu1 %3129  ;;  %v3184_v46 = vmul.f32 %v5523_v8, %v3168_v17  ;;  %5548 = vrcp.f32 %v2112_v6 }
 0x5af   : > { %v3167_v10 = vadd.f32 %v7312_v27, %v3130_v9  ;;  %v3128_v52 = vpop.xlane.xlu0 %3127 }
 0x5b0   : > { %v3166_v11 = vadd.f32 %v7312_v27, %v3128_v52  ;;  %v2113_v52 = vadd.f32 1.0, %v2061_v12 }
 0x5b1   : > { %v3183_v51 = vmul.f32 %v5517_v63, %v3167_v10  ;;  %v5537_v10 = vpop.eup %5536 }
 0x5b2   : > { %v3182_v22 = vmul.f32 %v5519_v36, %v3166_v11  ;;  %v5539_v4 = vpop.eup %5538  ;;  %5550 = vrcp.f32 %v2113_v52  ;;  %v2115_v36 = vadd.f32 1.0, %v2075_v59  ;;  %v2077_v30 = vmul.f32 %v5537_v10, %v7964_v62 }
 0x5b3   : > { %3205 = vperm.xlu0 %5405, %v3183_v51   ;;  %v3134_v1 = vpop.xlane.xlu0 %3133  ;;  %v5541_v25 = vpop.eup %5540  ;;  %v2084_v51 = vmul.f32 %v5539_v4, %v7965_v14 }
 0x5b4   : > { %v3140_v40 = vpop.xlane.xlu1 %3139  ;;  %3200 = vperm.xlu1 %5404, %v3182_v22   ;;  %v3169_v5 = vadd.f32 %v7312_v27, %v3134_v1  ;;  %v5543_v2 = vpop.eup %5542  ;;  %5552 = vrcp.f32 %v2115_v36  ;;  %v2079_v47 = vsel %vm2078_vm11, %v7964_v62, %v2077_v30  ;;  %v2095_v62 = vand.u32 2147483648, %v7967_v38 }
 0x5b5   : > { %v3172_v60 = vadd.f32 %v7312_v27, %v3140_v40  ;;  %v5545_v16 = vpop.eup %5544  ;;  %v2086_v1 = vsel %vm2085_vm10, %v7965_v14, %v2084_v51  ;;  %v7969_v51 = vld [vmem:[#allocation46_spill] sm:$0xff] }
 0x5b6   : > { %v3185_v15 = vmul.f32 %v5527_v0, %v3169_v5  ;;  %v2098_v58 = vmul.f32 %v5545_v16, %v7966_v39  ;;  %v2082_v5 = vsel %vm2080_vm13, %v2081_v61, %v2079_v47  ;;  %v2102_v0 = vand.u32 2147483648, %v7966_v39  ;;  %v7971_v47 = vld [vmem:[#allocation49_spill] sm:$0xff] }
 0x5b7   : > { %v3138_v32 = vpop.xlane.xlu0 %3137  ;;  %v3188_v29 = vmul.f32 %v5531_v56, %v3172_v60  ;;  %v5547_v17 = vpop.eup %5546  ;;  %v2116_v31 = vadd.f32 1.0, %v2082_v5 }
 0x5b8   : > { %v3136_v49 = vpop.xlane.xlu1 %3135  ;;  %3210 = vperm.xlu1 %5404, %v3184_v46   ;;  %v3171_v63 = vadd.f32 %v7312_v27, %v3138_v32  ;;  %v2091_v40 = vmul.f32 %v5547_v17, %v7967_v38  ;;  %v5549_v8 = vpop.eup %5548  ;;  %v2089_v46 = vsel %vm2087_vm12, %v2088_v34, %v2086_v1  ;;  %v2100_v3 = vsel %vm2099_vm14, %v7966_v39, %v2098_v58  ;;  %v7970_v17 = vld [vmem:[#allocation47_spill] sm:$0xff] }
 0x5b9   : > { %v3170_v35 = vadd.f32 %v7312_v27, %v3136_v49  ;;  %v2117_v32 = vadd.f32 1.0, %v2089_v46  ;;  %v2103_v14 = vsel %vm2101_vm0, %v2102_v0, %v2100_v3  ;;  %v7973_v46 = vld [vmem:[#allocation53_spill] sm:$0xff] }
 0x5ba   : > { %v3187_v23 = vmul.f32 %v5543_v2, %v3171_v63  ;;  %v2093_v49 = vsel %vm2092_vm15, %v7967_v38, %v2091_v40  ;;  %v2119_v55 = vadd.f32 1.0, %v2103_v14  ;;  %v7972_v40 = vld [vmem:[#allocation48_spill] sm:$0xff] }
 0x5bb   : > { %v3142_v7 = vpop.xlane.xlu0 %3141  ;;  %v3186_v24 = vmul.f32 %v5535_v18, %v3170_v35  ;;  %v2096_v60 = vsel %vm2094_vm1, %v2095_v62, %v2093_v49  ;;  %5554 = vrcp.f32 %v2117_v32  ;;  %v7976_v32 = vld [vmem:[#allocation50_spill] sm:$0xff] }
 0x5bc   : > { %v3148_v45 = vpop.xlane.xlu1 %3147  ;;  %3215 = vperm.xlu1 %5404, %v3185_v15   ;;  %v3173_v9 = vadd.f32 %v7312_v27, %v3142_v7  ;;  %v5551_v37 = vpop.eup %5550  ;;  %v2118_v50 = vadd.f32 1.0, %v2096_v60  ;;  %5556 = vrcp.f32 %v2116_v31  ;;  %v7977_v60 = vld [vmem:[#allocation55_spill] sm:$0xff] }
 0x5bd   : > { %v3176_v42 = vadd.f32 %v7312_v27, %v3148_v45  ;;  %5558 = vrcp.f32 %v2119_v55  ;;  %v7978_v55 = vld [vmem:[#allocation54_spill] sm:$0xff] }
 0x5be   : > { %v3189_v11 = vmul.f32 %v5541_v25, %v3173_v9  ;;  %v5553_v15 = vpop.eup %5552  ;;  %5560 = vrcp.f32 %v2118_v50 }
 0x5bf   : > { %v3192_v13 = vmul.f32 %v5533_v21, %v3176_v42  ;;  %v3146_v22 = vpop.xlane.xlu0 %3145 }
 0x5c0   : > { %3230 = vperm.xlu1 %5404, %v3188_v29   ;;  %v3144_v33 = vpop.xlane.xlu1 %3143  ;;  %v3175_v53 = vadd.f32 %v7312_v27, %v3146_v22 }
 0x5c1   : > { %3250 = vperm.xlu0 %5405, %v3192_v13   ;;  %v3174_v48 = vadd.f32 %v7312_v27, %v3144_v33 }
 0x5c2   : > { %v3191_v43 = vmul.f32 %v5551_v37, %v3175_v53  ;;  %v7975_v37 = vld [vmem:[#allocation51_spill] sm:$0xff] }
 0x5c3   : > { %v3190_v44 = vmul.f32 %v5549_v8, %v3174_v48  ;;  %v3150_v19 = vpop.xlane.xlu0 %3149 }
 0x5c4   : > { %3220 = vperm.xlu1 %5404, %v3186_v24   ;;  %v3177_v57 = vadd.f32 %v7312_v27, %v3150_v19  ;;  %v3294_v24 = vld [vmem:[%s7968_s12] sm:$0xff]  ;;  %v7974_v19 = vld [vmem:[#allocation52_spill] sm:$0xff] }
 0x5c5   : > { %v5555_v21 = vpop.eup %5554  ;;  %5118 = vmatprep.mubr.f32.mxu0 %v3294_v24 }
 0x5c6   : > { %v3193_v45 = vmul.f32 %v5553_v15, %v3177_v57  ;;  %v5557_v29 = vpop.eup %5556 }
 0x5c7   : > { %v5559_v6 = vpop.eup %5558 }
 0x5c8   : > { %3235 = vperm.xlu1 %5404, %v3189_v11   ;;  %v5561_v12 = vpop.eup %5560 }
 0x5cc   : > { %3225 = vperm.xlu1 %5404, %v3187_v23  }
 0x5d0   : > { %3240 = vperm.xlu1 %5404, %v3190_v44  }
 0x5d4   : > { %3245 = vperm.xlu1 %5404, %v3191_v43  }
 0x5d8   : > { %3255 = vperm.xlu1 %5404, %v3193_v45  }
 0x5da   : > { %v3156_v56 = vpop.xlane.xlu1 %3155 }
 0x5db   : > { %v3180_v20 = vadd.f32 %v7312_v27, %v3156_v56 }
 0x5dd   : > { %v3154_v42 = vpop.xlane.xlu0 %3153  ;;  %v3196_v28 = vmul.f32 %v5561_v12, %v3180_v20  ;;  %v7982_v20 = vld [vmem:[#allocation58_spill] sm:$0xff] }
 0x5de   : > { %v3179_v41 = vadd.f32 %v7312_v27, %v3154_v42  ;;  %v3152_v26 = vpop.xlane.xlu1 %3151 }
 0x5df   : > { %v3178_v39 = vadd.f32 %v7312_v27, %v3152_v26 }
 0x5e0   : > { %v3195_v35 = vmul.f32 %v5555_v21, %v3179_v41  ;;  %v7979_v41 = vld [vmem:[#allocation57_spill] sm:$0xff]  ;;  %v7980_v21 = vld [vmem:[#allocation56_spill] sm:$0xff] }
 0x5e1   : > { %v3194_v38 = vmul.f32 %v5557_v29, %v3178_v39  ;;  %v3158_v13 = vpop.xlane.xlu0 %3157 }
 0x5e2   : > { %v3181_v7 = vadd.f32 %v7312_v27, %v3158_v13  ;;  %3265 = vperm.xlu1 %5404, %v3195_v35  }
 0x5e3   : > { %3260 = vperm.xlu0 %5405, %v3194_v38  }
 0x5e4   : > { %v3197_v18 = vmul.f32 %v5559_v6, %v3181_v7  ;;  %v7983_v7 = vld [vmem:[#allocation59_spill] sm:$0xff] }
 0x5e6   : > { %3275 = vperm.xlu1 %5404, %v3197_v18  }
 0x5e7   : > { %3270 = vperm.xlu0 %5405, %v3196_v28   ;;  %v7984_v28 = vld [vmem:[#allocation60_spill] sm:$0xff] }
 0x5ef   : > { %v7382_v9 = vpop.f32.mrb[48].mxu1 }
 0x5f0   : > { %v7384_v54 = vpop.f32.mrb[49].mxu1 }
 0x5f1   : > { %v7386_v10 = vpop.f32.mrb[50].mxu1 }
 0x5f2   : > { %v3522_v52 = vpack.c.bf16 %v7386_v10, %v7382_v9  ;;  %v7390_v27 = vpop.f32.mrb[51].mxu1  ;;  %v5493_v9 = vld [vmem:[%s7986_s18 + $0x18] sm:$0xff]   ;;  %v5494_v10 = vld [vmem:[%s7986_s18 + $0x20] sm:$0xff]  }
 0x5f3   : > { %v3521_v4 = vpack.c.bf16 %v7390_v27, %v7384_v54  ;;  %v5490_v54 = vld [vmem:[%s7986_s18] sm:$0xff]   ;;  %v5491_v27 = vld [vmem:[%s7986_s18 + $0x8] sm:$0xff]  }
 0x5f4   : > { %5178 = vmatprep.subr.bf16.mxu1 %v5490_v54 }
 0x5f5   : > { %5179 = vmatpush3.bf16.msra.mxu1 %v5490_v54 }
 0x5f6   : > { %5180 = vmatprep.subr.bf16.mxu1 %v5491_v27 }
 0x5f7   : > { %v7394_v59 = vpop.f32.mrb[52].mxu1 }
 0x5f8   : > { %v7396_v25 = vpop.f32.mrb[53].mxu1 }
 0x5f9   : > { %v7398_v63 = vpop.f32.mrb[54].mxu1  ;;  %5181 = vmatpush3.bf16.msra.mxu1 %v5491_v27 }
 0x5fa   : > { %v3524_v11 = vpack.c.bf16 %v7398_v63, %v7394_v59  ;;  %v7402_v2 = vpop.f32.mrb[55].mxu1  ;;  %v5496_v59 = vld [vmem:[%s7986_s18 + $0x30] sm:$0xff]  }
 0x5fb   : > { %v3523_v33 = vpack.c.bf16 %v7402_v2, %v7396_v25  ;;  %v5497_v25 = vld [vmem:[%s7986_s18 + $0x38] sm:$0xff]  }
 0x632   : > { %v3206_v36 = vpop.permute.xlu0 %3205 }
 0x633   : > { %v3279_v30 = vmul.f32 %v7969_v51, %v3206_v36  ;;  %v3201_v16 = vpop.permute.xlu1 %3200  ;;  %v7985_v51 = vld [vmem:[#allocation61_spill] sm:$0xff] }
 0x634   : > { %v3278_v22 = vmul.f32 %v3201_v16, %v7970_v17  ;;  %v5482_v17 = vld [vmem:[%s7981_s0] sm:$0xff]  }
 0x636   : > { %v5218_v23 = vpack.c.bf16 %v3279_v30, %v3278_v22  ;;  %v3295_v22 = vld [vmem:[%s7968_s12 + $0x8] sm:$0xff] }
 0x637   : > { %v3211_v48 = vpop.permute.xlu1 %3210 }
 0x638   : > { %5219 = vmatprep.subr.bf16.mxu0 %v5218_v23  ;;  %v3280_v58 = vmul.f32 %v3211_v48, %v7971_v47  ;;  %v3296_v48 = vld [vmem:[%s7968_s12 + $0x10] sm:$0xff] }
 0x639   : > { %5221 = vmatpush3.bf16.msra.mxu0 %v5218_v23  ;;  %v5483_v23 = vld [vmem:[%s7981_s0 + $0x8] sm:$0xff]   ;;  %v5484_v47 = vld [vmem:[%s7981_s0 + $0x10] sm:$0xff]  }
 0x63b   : > { %v3216_v1 = vpop.permute.xlu1 %3215 }
 0x63c   : > { %v3281_v34 = vmul.f32 %v7972_v40, %v3216_v1  ;;  %v3297_v1 = vld [vmem:[%s7968_s12 + $0x18] sm:$0xff]  ;;  %v3299_v40 = vld [vmem:[%s7968_s12 + $0x28] sm:$0xff] }
 0x63e   : > { %v5222_v61 = vpack.c.bf16 %v3281_v34, %v3280_v58  ;;  %v3298_v58 = vld [vmem:[%s7968_s12 + $0x20] sm:$0xff]  ;;  %v5485_v34 = vld [vmem:[%s7981_s0 + $0x18] sm:$0xff]  }
 0x63f   : > { %v3231_v8 = vpop.permute.xlu1 %3230 }
 0x640   : > { %5223 = vmatprep.subr.bf16.mxu0 %v5222_v61  ;;  %v3284_v5 = vmul.f32 %v3231_v8, %v7973_v46  ;;  %v3251_v50 = vpop.permute.xlu0 %3250  ;;  %v3301_v8 = vld [vmem:[%s7968_s12 + $0x38] sm:$0xff]  ;;  %v5488_v46 = vld [vmem:[%s7981_s0 + $0x30] sm:$0xff]  }
 0x641   : > { %5225 = vmatpush3.bf16.msra.mxu0 %v5222_v61  ;;  %v3288_v26 = vmul.f32 %v3251_v50, %v7979_v41  ;;  %v3300_v61 = vld [vmem:[%s7968_s12 + $0x30] sm:$0xff]  ;;  %v5570_v50 = vld [vmem:[#allocation3 + $0x38] sm:$0xff] }
 0x642   : > { %v5571_v41 = vld [vmem:[#allocation3 + $0x30] sm:$0xff] }
 0x643   : > { %v3221_v44 = vpop.permute.xlu1 %3220 }
 0x644   : > { %v3282_v62 = vmul.f32 %v3221_v44, %v7975_v37  ;;  %v5486_v44 = vld [vmem:[%s7981_s0 + $0x20] sm:$0xff]  }
 0x647   : > { %v3236_v53 = vpop.permute.xlu1 %3235 }
 0x648   : > { %v3285_v3 = vmul.f32 %v7974_v19, %v3236_v53  ;;  %v5487_v53 = vld [vmem:[%s7981_s0 + $0x28] sm:$0xff]   ;;  %v5565_v19 = vld [vmem:[#allocation3] sm:$0xff] }
 0x64a   : > { %v5230_v49 = vpack.c.bf16 %v3285_v3, %v3284_v5  ;;  %v5489_v5 = vld [vmem:[%s7981_s0 + $0x38] sm:$0xff]  }
 0x64b   : > { %v3226_v0 = vpop.permute.xlu1 %3225 }
 0x64c   : > { %v3283_v31 = vmul.f32 %v7976_v32, %v3226_v0  ;;  %v5566_v0 = vld [vmem:[#allocation3 + $0x18] sm:$0xff]  ;;  %v5567_v32 = vld [vmem:[#allocation3 + $0x10] sm:$0xff] }
 0x64e   : > { %v5226_v43 = vpack.c.bf16 %v3283_v31, %v3282_v62 }
 0x64f   : > { %v3241_v57 = vpop.permute.xlu1 %3240 }
 0x650   : > { %5227 = vmatprep.subr.bf16.mxu0 %v5226_v43  ;;  %v3286_v15 = vmul.f32 %v3241_v57, %v7977_v60  ;;  %v5568_v57 = vld [vmem:[#allocation3 + $0x28] sm:$0xff] }
 0x651   : > { %5229 = vmatpush3.bf16.msra.mxu0 %v5226_v43 }
 0x652   : > { %5231 = vmatprep.subr.bf16.mxu0 %v5230_v49 }
 0x653   : > { %v3246_v14 = vpop.permute.xlu1 %3245 }
 0x654   : > { %v3287_v45 = vmul.f32 %v7978_v55, %v3246_v14 }
 0x655   : > { %5233 = vmatpush3.bf16.msra.mxu0 %v5230_v49 }
 0x656   : > { %v5234_v56 = vpack.c.bf16 %v3287_v45, %v3286_v15  ;;  %v5569_v15 = vld [vmem:[#allocation3 + $0x20] sm:$0xff] }
 0x657   : > { %v3256_v42 = vpop.permute.xlu1 %3255 }
 0x658   : > { %v3289_v39 = vmul.f32 %v7980_v21, %v3256_v42  ;;  %5235 = vmatprep.subr.bf16.mxu0 %v5234_v56 }
 0x659   : > { %5237 = vmatpush3.bf16.msra.mxu0 %v5234_v56 }
 0x65a   : > { %v5238_v29 = vpack.c.bf16 %v3289_v39, %v3288_v26  ;;  %v4780_v39 = vld [vmem:[%s1256_s5] ss:$0 sm:$0xff] }
 0x65c   : > { %5239 = vmatprep.subr.bf16.mxu0 %v5238_v29 }
 0x65d   : > { %5241 = vmatpush3.bf16.msra.mxu0 %v5238_v29  ;;  %v7988_v29 = vld [vmem:[#allocation66_spill] sm:$0xff] }
 0x661   : > { %v3266_v35 = vpop.permute.xlu1 %3265 }
 0x662   : > { %v3291_v38 = vmul.f32 %v7982_v20, %v3266_v35  ;;  %v3261_v13 = vpop.permute.xlu0 %3260 }
 0x663   : > { %v3290_v6 = vmul.f32 %v3261_v13, %v7983_v7 }
 0x665   : > { %v5242_v12 = vpack.c.bf16 %v3291_v38, %v3290_v6  ;;  %v3276_v18 = vpop.permute.xlu1 %3275  ;;  %v7989_v38 = vld [vmem:[#allocation62_spill] sm:$0xff] }
 0x666   : > { %v3293_v24 = vmul.f32 %v7984_v28, %v3276_v18  ;;  %v3271_v36 = vpop.permute.xlu0 %3270 }
 0x667   : > { %v3292_v30 = vmul.f32 %v3271_v36, %v7985_v51  ;;  %5243 = vmatprep.subr.bf16.mxu0 %v5242_v12  ;;  %v7991_v36 = vld [vmem:[#allocation64_spill] sm:$0xff] }
 0x668   : > { %5245 = vmatpush3.bf16.msra.mxu0 %v5242_v12  ;;  %v7990_v12 = vld [vmem:[#allocation68_spill] sm:$0xff] }
 0x669   : > { %v5246_v16 = vpack.c.bf16 %v3293_v24, %v3292_v30 }
 0x66b   : > { %5247 = vmatprep.subr.bf16.mxu0 %v5246_v16 }
 0x66c   : > { %5249 = vmatpush3.bf16.msra.mxu0 %v5246_v16 }
 0x66d   : > { %5154 = vmatprep.subr.bf16.mxu0 %v5482_v17 }
 0x66f   : > { %5119 = vmatmul.mubr.f32.vlgmr.msra.gmra.mrb[48].mxu0 %v3295_v22 }
 0x670   : > { %5155 = vmatpush3.bf16.msra.mxu0 %v5482_v17  ;;  %5121 = vmatprep.mubr.f32.mxu0 %v3296_v48 }
 0x671   : > { %5156 = vmatprep.subr.bf16.mxu0 %v5483_v23 }
 0x673   : > { %5122 = vmatmul.mubr.f32.gmra.mrb[50].mxu0 %v3297_v1 }
 0x674   : > { %5157 = vmatpush3.bf16.msra.mxu0 %v5483_v23  ;;  %5124 = vmatprep.mubr.f32.mxu0 %v3298_v58 }
 0x675   : > { %5158 = vmatprep.subr.bf16.mxu0 %v5484_v47 }
 0x677   : > { %5125 = vmatmul.mubr.f32.gmra.mrb[52].mxu0 %v3299_v40  ;;  %v7992_v40 = vld [vmem:[#allocation74_spill] sm:$0xff] }
 0x678   : > { %5159 = vmatpush3.bf16.msra.mxu0 %v5484_v47  ;;  %5127 = vmatprep.mubr.f32.mxu0 %v3300_v61 }
 0x679   : > { %5160 = vmatprep.subr.bf16.mxu0 %v5485_v34 }
 0x67b   : > { %5128 = vmatmul.mubr.f32.gmra.mrb[54].mxu0 %v3301_v8 }
 0x67c   : > { %5161 = vmatpush3.bf16.msra.mxu0 %v5485_v34  ;;  %5170 = vmatprep.mubr.bf16.mxu0 %v3521_v4  ;;  %v5492_v4 = vld [vmem:[%s7986_s18 + $0x10] sm:$0xff]  }
 0x67d   : > { %5162 = vmatprep.subr.bf16.mxu0 %v5486_v44  ;;  %5182 = vmatprep.subr.bf16.mxu1 %v5492_v4 }
 0x67e   : > { %5183 = vmatpush3.bf16.msra.mxu1 %v5492_v4  ;;  %v7994_v4 = vld [vmem:[#allocation76_spill] sm:$0xff] }
 0x67f   : > { %5184 = vmatprep.subr.bf16.mxu1 %v5493_v9 }
 0x680   : > { %5163 = vmatpush3.bf16.msra.mxu0 %v5486_v44 }
 0x681   : > { %5164 = vmatprep.subr.bf16.mxu0 %v5487_v53 }
 0x682   : > { %5185 = vmatpush3.bf16.msra.mxu1 %v5493_v9 }
 0x683   : > { %5186 = vmatprep.subr.bf16.mxu1 %v5494_v10 }
 0x684   : > { %5165 = vmatpush3.bf16.msra.mxu0 %v5487_v53  ;;  %v7993_v53 = vld [vmem:[#allocation70_spill] sm:$0xff] }
 0x685   : > { %5166 = vmatprep.subr.bf16.mxu0 %v5488_v46 }
 0x686   : > { %5187 = vmatpush3.bf16.msra.mxu1 %v5494_v10 }
 0x688   : > { %5167 = vmatpush3.bf16.msra.mxu0 %v5488_v46 }
 0x689   : > { %5168 = vmatprep.subr.bf16.mxu0 %v5489_v5 }
 0x68c   : > { %5169 = vmatpush3.bf16.msra.mxu0 %v5489_v5 }
 0x68f   : > { %5171 = vmatmul.mubr.bf16.vlgmr.msra.gmra.mrb[56].mxu0 %v3522_v52  ;;  %v5495_v52 = vld [vmem:[%s7986_s18 + $0x28] sm:$0xff]  }
 0x690   : > { %5174 = vmatprep.mubr.bf16.mxu0 %v3523_v33  ;;  %5188 = vmatprep.subr.bf16.mxu1 %v5495_v52 }
 0x691   : > { %5189 = vmatpush3.bf16.msra.mxu1 %v5495_v52 }
 0x692   : > { %5190 = vmatprep.subr.bf16.mxu1 %v5496_v59 }
 0x695   : > { %5191 = vmatpush3.bf16.msra.mxu1 %v5496_v59  ;;  %v7995_v59 = vld [vmem:[#allocation72_spill] sm:$0xff] }
 0x696   : > { %5192 = vmatprep.subr.bf16.mxu1 %v5497_v25 }
 0x697   : > { %5175 = vmatmul.mubr.bf16.gmra.mrb[60].mxu0 %v3524_v11  ;;  %v5564_v11 = vld [vmem:[#allocation3 + $0x8] sm:$0xff] }
 0x699   : > { %5193 = vmatpush3.bf16.msra.mxu1 %v5497_v25 }
 0x742   : > { %v5120_v63 = vpop.f32.mrb[48].mxu0 }
 0x743   : > { %v7457_v2 = vadd.f32 %v5564_v11, %v5120_v63  ;;  %v3368_v33 = vpop.f32.mrb[49].mxu0 }
 0x744   : > { %v7459_v3 = vadd.f32 %v5565_v19, %v3368_v33 }
 0x745   : > { %3417 = vst.msk [vmem:[#allocation3 + $0x8] sm:$0xff] %vm3415_vm2, %v7457_v2 }
 0x746   : > { %3416 = vst.msk [vmem:[#allocation3] sm:$0xff] %vm3415_vm2, %v7459_v3  ;;  %v5123_v49 = vpop.f32.mrb[50].mxu0 }
 0x747   : > { %v7465_v37 = vadd.f32 %v5566_v0, %v5123_v49  ;;  %v3378_v62 = vpop.f32.mrb[51].mxu0 }
 0x748   : > { %v7467_v31 = vadd.f32 %v5567_v32, %v3378_v62 }
 0x749   : > { %3419 = vst.msk [vmem:[#allocation3 + $0x18] sm:$0xff] %vm3415_vm2, %v7465_v37 }
 0x74a   : > { %3418 = vst.msk [vmem:[#allocation3 + $0x10] sm:$0xff] %vm3415_vm2, %v7467_v31  ;;  %v5126_v43 = vpop.f32.mrb[52].mxu0 }
 0x74b   : > { %v7473_v14 = vadd.f32 %v5568_v57, %v5126_v43  ;;  %v3388_v60 = vpop.f32.mrb[53].mxu0 }
 0x74c   : > { %v7475_v55 = vadd.f32 %v5569_v15, %v3388_v60 }
 0x74d   : > { %3421 = vst.msk [vmem:[#allocation3 + $0x28] sm:$0xff] %vm3415_vm2, %v7473_v14 }
 0x74e   : > { %3420 = vst.msk [vmem:[#allocation3 + $0x20] sm:$0xff] %vm3415_vm2, %v7475_v55  ;;  %v5129_v45 = vpop.f32.mrb[54].mxu0 }
 0x74f   : > { %v7481_v56 = vadd.f32 %v5570_v50, %v5129_v45  ;;  %v3398_v42 = vpop.f32.mrb[55].mxu0  ;;  %v4781_v50 = vld [vmem:[%s1259_s14] ss:$0 sm:$0xff] }
 0x750   : > { %v7483_v26 = vadd.f32 %v5571_v41, %v3398_v42 }
 0x751   : > { %3423 = vst.msk [vmem:[#allocation3 + $0x38] sm:$0xff] %vm3415_vm2, %v7481_v56 }
 0x752   : > { %3422 = vst.msk [vmem:[#allocation3 + $0x30] sm:$0xff] %vm3415_vm2, %v7483_v26 }
 0x762   : > { %v5172_v21 = vpop.f32.mrb[56].mxu0 }
 0x763   : > { %v3656_v35 = vadd.f32 %v5172_v21, %v7988_v29  ;;  %v3623_v20 = vpop.f32.mrb[57].mxu0 }
 0x764   : > { %v3654_v13 = vadd.f32 %v3623_v20, %v7989_v38  ;;  %v5173_v7 = vpop.f32.mrb[58].mxu0 }
 0x765   : > { %v3671_v6 = vadd.f32 %v4780_v39, %v3656_v35  ;;  %v3657_v18 = vadd.f32 %v5173_v7, %v7990_v12  ;;  %v3626_v28 = vpop.f32.mrb[59].mxu0  ;;  %v7997_v35 = vld [vmem:[#allocation67_spill] sm:$0xff] }
 0x766   : > { %v3669_v24 = vadd.f32 %v4780_v39, %v3654_v13  ;;  %v3655_v51 = vadd.f32 %v3626_v28, %v7991_v36  ;;  %v7998_v7 = vld [vmem:[#allocation63_spill] sm:$0xff] }
 0x767   : > { %v3679_v30 = vmul.f32 0.01, %v3671_v6  ;;  %v3672_v16 = vadd.f32 %v4780_v39, %v3657_v18  ;;  %v7999_v18 = vld [vmem:[#allocation69_spill] sm:$0xff] }
 0x768   : > { %v3677_v17 = vmul.f32 0.01, %v3669_v24  ;;  %v3670_v22 = vadd.f32 %v4780_v39, %v3655_v51 }
 0x769   : > { %v3680_v23 = vmul.f32 0.01, %v3672_v16  ;;  %v3687_v47 = vmax.f32 %v3671_v6, %v3679_v30 }
 0x76a   : > { %v3678_v48 = vmul.f32 0.01, %v3670_v22  ;;  %v5176_v1 = vpop.f32.mrb[60].mxu0  ;;  %v3685_v8 = vmax.f32 %v3669_v24, %v3677_v17  ;;  %v8000_v24 = vld [vmem:[#allocation65_spill] sm:$0xff] }
 0x76b   : > { %v3688_v58 = vmax.f32 %v3672_v16, %v3680_v23  ;;  %v3660_v34 = vadd.f32 %v5176_v1, %v7992_v40  ;;  %v3639_v61 = vpop.f32.mrb[61].mxu0  ;;  %v8001_v1 = vld [vmem:[#allocation75_spill] sm:$0xff] }
 0x76c   : > { %v3686_v44 = vmax.f32 %v3670_v22, %v3678_v48  ;;  %v3658_v46 = vadd.f32 %v3639_v61, %v7993_v53  ;;  %v5177_v5 = vpop.f32.mrb[62].mxu0  ;;  %v8003_v53 = vld [vmem:[#allocation77_spill] sm:$0xff] }
 0x76d   : > { %v3694_v54 = vpack.c.bf16 %v3688_v58, %v3687_v47  ;;  %v3675_v27 = vadd.f32 %v4780_v39, %v3660_v34  ;;  %v3661_v9 = vadd.f32 %v5177_v5, %v7994_v4  ;;  %v3642_v10 = vpop.f32.mrb[63].mxu0  ;;  %v8002_v34 = vld [vmem:[#allocation71_spill] sm:$0xff] }
 0x76e   : > { %v3673_v52 = vadd.f32 %v4780_v39, %v3658_v46  ;;  %v3659_v25 = vadd.f32 %v3642_v10, %v7995_v59  ;;  %v3693_v63 = vpack.c.bf16 %v3686_v44, %v3685_v8 }
 0x76f   : > { %v3683_v11 = vmul.f32 0.01, %v3675_v27  ;;  %v3676_v33 = vadd.f32 %v4780_v39, %v3661_v9 }
 0x770   : > { %v3681_v19 = vmul.f32 0.01, %v3673_v52  ;;  %v3674_v49 = vadd.f32 %v4780_v39, %v3659_v25  ;;  %5194 = vmatprep.mubr.bf16.mxu1 %v3693_v63 }
 0x771   : > { %v3684_v0 = vmul.f32 0.01, %v3676_v33  ;;  %5195 = vmatmul.mubr.bf16.vlgmr.msra.gmra.mrb[56].mxu1 %v3694_v54  ;;  %v3691_v32 = vmax.f32 %v3675_v27, %v3683_v11  ;;  %v8004_v54 = vld [vmem:[#allocation73_spill] sm:$0xff] }
 0x772   : > { %v3682_v62 = vmul.f32 0.01, %v3674_v49  ;;  %v3689_v57 = vmax.f32 %v3673_v52, %v3681_v19 }
 0x773   : > { %v3692_v43 = vmax.f32 %v3676_v33, %v3684_v0 }
 0x774   : > { %v3690_v60 = vmax.f32 %v3674_v49, %v3682_v62 }
 0x775   : > { %v3696_v15 = vpack.c.bf16 %v3692_v43, %v3691_v32 }
 0x776   : > { %v3695_v45 = vpack.c.bf16 %v3690_v60, %v3689_v57 }
 0x778   : > { %5198 = vmatprep.mubr.bf16.mxu1 %v3695_v45 }
 0x779   : > { %5199 = vmatmul.mubr.bf16.gmra.mrb[60].mxu1 %v3696_v15 }
 0x844   : > { %v5196_v42 = vpop.f32.mrb[56].mxu1 }
 0x845   : > { %v3811_v41 = vadd.f32 %v5196_v42, %v4781_v50  ;;  %v3802_v21 = vpop.f32.mrb[57].mxu1 }
 0x846   : > { %v3803_v39 = vadd.f32 %v4781_v50, %v3802_v21  ;;  %v5197_v29 = vpop.f32.mrb[58].mxu1 }
 0x847   : > { %v3835_v20 = vadd.f32 %v3811_v41, %v7997_v35  ;;  %v3814_v38 = vadd.f32 %v5197_v29, %v4781_v50  ;;  %v3805_v13 = vpop.f32.mrb[59].mxu1 }
 0x848   : > { %v3833_v6 = vadd.f32 %v3803_v39, %v7998_v7  ;;  %v3806_v12 = vadd.f32 %v4781_v50, %v3805_v13 }
 0x849   : > { %v3836_v28 = vadd.f32 %v3814_v38, %v7999_v18 }
 0x84a   : > { %v3834_v36 = vadd.f32 %v3806_v12, %v8000_v24 }
 0x84c   : > { %v3841_v51 = vadd.f32 %v3834_v36, %v3833_v6  ;;  %v5200_v30 = vpop.f32.mrb[60].mxu1 }
 0x84d   : > { %v3827_v16 = vadd.f32 %v5200_v30, %v4781_v50  ;;  %v3818_v17 = vpop.f32.mrb[61].mxu1 }
 0x84e   : > { %v3842_v22 = vadd.f32 %v3841_v51, %v3835_v20  ;;  %v3819_v23 = vadd.f32 %v4781_v50, %v3818_v17  ;;  %v5201_v48 = vpop.f32.mrb[62].mxu1 }
 0x84f   : > { %v3839_v47 = vadd.f32 %v3827_v16, %v8001_v1  ;;  %v3830_v58 = vadd.f32 %v5201_v48, %v4781_v50  ;;  %v3821_v40 = vpop.f32.mrb[63].mxu1  ;;  %v4790_v48 = vld [vmem:[%s1262_s22] ss:$0 sm:$0xff] }
 0x850   : > { %v3837_v61 = vadd.f32 %v3819_v23, %v8002_v34  ;;  %v3843_v8 = vadd.f32 %v3842_v22, %v3836_v28  ;;  %v3822_v44 = vadd.f32 %v4781_v50, %v3821_v40 }
 0x851   : > { %v3840_v46 = vadd.f32 %v3830_v58, %v8003_v53  ;;  %v4791_v53 = vld [vmem:[%s1265_s28] ss:$0 sm:$0xff] }
 0x852   : > { %v3844_v5 = vadd.f32 %v3843_v8, %v3837_v61  ;;  %v3838_v27 = vadd.f32 %v3822_v44, %v8004_v54 }
 0x854   : > { %v3845_v4 = vadd.f32 %v3844_v5, %v3838_v27 }
 0x856   : > { %v3846_v9 = vadd.f32 %v3845_v4, %v3839_v47 }
 0x858   : > { %v3847_v10 = vadd.f32 %v3846_v9, %v3840_v46 }
 0x85a   : > { %v3848_v52 = vrot.slane %v3847_v10, 4 }
 0x85c   : > { %v3849_v59 = vadd.f32 %v3848_v52, %v3847_v10 }
 0x85e   : > { %v3850_v25 = vrot.slane %v3849_v59, 2 }
 0x860   : > { %v3851_v63 = vadd.f32 %v3850_v25, %v3849_v59 }
 0x862   : > { %v3852_v11 = vrot.slane %v3851_v63, 1 }
 0x864   : > { %v3853_v33 = vadd.f32 %v3852_v11, %v3851_v63 }
 0x866   : > { %v3855_v19 = vmul.f32 0.015625, %v3853_v33 }
 0x868   : > { %v3856_v49 = vsub.f32 %v3833_v6, %v3855_v19  ;;  %v3857_v0 = vsub.f32 %v3834_v36, %v3855_v19  ;;  %v3858_v62 = vsub.f32 %v3835_v20, %v3855_v19  ;;  %v3859_v32 = vsub.f32 %v3836_v28, %v3855_v19 }
 0x869   : > { %v3860_v43 = vsub.f32 %v3837_v61, %v3855_v19  ;;  %v3861_v57 = vsub.f32 %v3838_v27, %v3855_v19  ;;  %v3862_v60 = vsub.f32 %v3839_v47, %v3855_v19  ;;  %v3863_v15 = vsub.f32 %v3840_v46, %v3855_v19 }
 0x86a   : > { %v3864_v45 = vmul.f32 %v3856_v49, %v3856_v49  ;;  %v3865_v50 = vmul.f32 %v3857_v0, %v3857_v0  ;;  %v3866_v42 = vmul.f32 %v3858_v62, %v3858_v62  ;;  %v3867_v21 = vmul.f32 %v3859_v32, %v3859_v32 }
 0x86b   : > { %v3868_v29 = vmul.f32 %v3860_v43, %v3860_v43  ;;  %v3869_v38 = vmul.f32 %v3861_v57, %v3861_v57  ;;  %v3870_v7 = vmul.f32 %v3862_v60, %v3862_v60  ;;  %v3871_v12 = vmul.f32 %v3863_v15, %v3863_v15 }
 0x86c   : > { %v3872_v41 = vadd.f32 %v3865_v50, %v3864_v45 }
 0x86e   : > { %v3873_v39 = vadd.f32 %v3872_v41, %v3866_v42 }
 0x870   : > { %v3874_v35 = vadd.f32 %v3873_v39, %v3867_v21 }
 0x872   : > { %v3875_v13 = vadd.f32 %v3874_v35, %v3868_v29 }
 0x874   : > { %v3876_v6 = vadd.f32 %v3875_v13, %v3869_v38 }
 0x876   : > { %v3877_v20 = vadd.f32 %v3876_v6, %v3870_v7  ;;  %v4793_v7 = vld [vmem:[%s8008_s26] ss:$0 sm:$0xff] (!%p4792_p2) }
 0x878   : > { %v3878_v18 = vadd.f32 %v3877_v20, %v3871_v12  ;;  %v5912_v20 = vmov (!%p4792_p2), 0  }
 0x879   : > { %5572 = vset.pattern.permute.xlu1 (!%p4792_p2), %v5912_v20 }
 0x87a   : > { %v3879_v28 = vrot.slane %v3878_v18, 4 }
 0x87c   : > { %v3880_v24 = vadd.f32 %v3879_v28, %v3878_v18  ;;  %v5913_v18 = vmov (!%p4792_p2), 1  }
 0x87d   : > { %5574 = vset.pattern.permute.xlu0 (!%p4792_p2), %v5913_v18 }
 0x87e   : > { %v3881_v36 = vrot.slane %v3880_v24, 2 }
 0x880   : > { %v3882_v51 = vadd.f32 %v3881_v36, %v3880_v24 }
 0x882   : > { %v3883_v30 = vrot.slane %v3882_v51, 1 }
 0x884   : > { %v3884_v16 = vadd.f32 %v3883_v30, %v3882_v51 }
 0x886   : > { %v3885_v17 = vmul.f32 0.015625, %v3884_v16 }
 0x888   : > { %v3886_v22 = vadd.f32 1e-05, %v3885_v17  ;;  %v4795_v17 = vld [vmem:[%s8009_s15 + $0x1] ss:$0 sm:$0xff] (!%p4792_p2) }
 0x88a   : > { %5562 = vrsqrt.f32 %v3886_v22 }
 0x894   : > { %v5563_v23 = vpop.eup %5562 }
 0x895   : > { %v3888_v1 = vmul.f32 %v5563_v23, %v3856_v49  ;;  %v3889_v47 = vmul.f32 %v5563_v23, %v3857_v0  ;;  %v3890_v58 = vmul.f32 %v5563_v23, %v3858_v62  ;;  %v3891_v40 = vmul.f32 %v5563_v23, %v3859_v32 }
 0x896   : > { %v3892_v34 = vmul.f32 %v5563_v23, %v3860_v43  ;;  %v3893_v61 = vmul.f32 %v5563_v23, %v3861_v57  ;;  %v3894_v8 = vmul.f32 %v5563_v23, %v3862_v60  ;;  %v3895_v44 = vmul.f32 %v5563_v23, %v3863_v15 }
 0x897   : > { %v3903_v46 = vmul.f32 %v4790_v48, %v3888_v1  ;;  %v3904_v5 = vmul.f32 %v4790_v48, %v3889_v47  ;;  %v3905_v54 = vmul.f32 %v4790_v48, %v3890_v58  ;;  %v3906_v27 = vmul.f32 %v4790_v48, %v3891_v40 }
 0x898   : > { %v3907_v4 = vmul.f32 %v4790_v48, %v3892_v34  ;;  %v3908_v9 = vmul.f32 %v4790_v48, %v3893_v61  ;;  %v3909_v10 = vmul.f32 %v4790_v48, %v3894_v8  ;;  %v3910_v52 = vmul.f32 %v4790_v48, %v3895_v44 }
 0x899   : > { %v3918_v59 = vadd.f32 %v4791_v53, %v3903_v46  ;;  %v3919_v25 = vadd.f32 %v4791_v53, %v3904_v5  ;;  %v3920_v63 = vadd.f32 %v4791_v53, %v3905_v54  ;;  %v3921_v11 = vadd.f32 %v4791_v53, %v3906_v27 }
 0x89a   : > { %v3922_v33 = vadd.f32 %v4791_v53, %v3907_v4  ;;  %v3923_v19 = vadd.f32 %v4791_v53, %v3908_v9  ;;  %v3924_v49 = vadd.f32 %v4791_v53, %v3909_v10  ;;  %v3925_v0 = vadd.f32 %v4791_v53, %v3910_v52 }
 0x89b   : > { %v3926_v62 = vmul.f32 0.01, %v3918_v59  ;;  %v3927_v32 = vmul.f32 0.01, %v3919_v25  ;;  %v3928_v43 = vmul.f32 0.01, %v3920_v63 }
 0x89c   : > { %v3929_v57 = vmul.f32 0.01, %v3921_v11  ;;  %v3930_v60 = vmul.f32 0.01, %v3922_v33  ;;  %v3931_v15 = vmul.f32 0.01, %v3923_v19 }
 0x89d   : > { %v3932_v45 = vmul.f32 0.01, %v3924_v49  ;;  %v3933_v50 = vmul.f32 0.01, %v3925_v0  ;;  %v3934_v42 = vmax.f32 %v3918_v59, %v3926_v62  ;;  %v3935_v41 = vmax.f32 %v3919_v25, %v3927_v32  ;;  %3953 = sbr.rel (%p4792_p2) target bundleno = 2523 (0x9db), region = 152 }
 0x89e   : > { %v3936_v21 = vmax.f32 %v3920_v63, %v3928_v43  ;;  %v3937_v39 = vmax.f32 %v3921_v11, %v3929_v57  ;;  %v3938_v29 = vmax.f32 %v3922_v33, %v3930_v60  ;;  %v3939_v35 = vmax.f32 %v3923_v19, %v3931_v15 }
 0x89f   : > { %v3940_v38 = vmax.f32 %v3924_v49, %v3932_v45  ;;  %v3941_v13 = vmax.f32 %v3925_v0, %v3933_v50  ;;  %3942 = vst [vmem:[#allocation2] sm:$0xff] %v3934_v42  ;;  %3943 = vst [vmem:[#allocation2 + $0x8] sm:$0xff] %v3935_v41  ;;  %v3959_v12 = vmul.f32 (!%p4792_p2), %v4793_v7, %v3934_v42 }
 0x8a0   : > { %3944 = vst [vmem:[#allocation2 + $0x10] sm:$0xff] %v3936_v21  ;;  %3945 = vst [vmem:[#allocation2 + $0x18] sm:$0xff] %v3937_v39  ;;  %v3961_v6 = vmul.f32 (!%p4792_p2), %v4793_v7, %v3936_v21  ;;  %v3962_v28 = vmul.f32 (!%p4792_p2), %v4793_v7, %v3937_v39  ;;  %v3960_v24 = vmul.f32 (!%p4792_p2), %v4793_v7, %v3935_v41 }
 0x8a1   : > { %3946 = vst [vmem:[#allocation2 + $0x20] sm:$0xff] %v3938_v29  ;;  %3947 = vst [vmem:[#allocation2 + $0x28] sm:$0xff] %v3939_v35  ;;  %3967 = vadd.xlane.f32.xlu0 (!%p4792_p2), %v3959_v12  ;;  %v3964_v36 = vmul.f32 (!%p4792_p2), %v4793_v7, %v3939_v35  ;;  %v3963_v51 = vmul.f32 (!%p4792_p2), %v4793_v7, %v3938_v29  ;;  %v3966_v30 = vmul.f32 (!%p4792_p2), %v4793_v7, %v3941_v13 }
 0x8a2   : > { %3948 = vst [vmem:[#allocation2 + $0x30] sm:$0xff] %v3940_v38  ;;  %3949 = vst [vmem:[#allocation2 + $0x38] sm:$0xff] %v3941_v13  ;;  %3971 = vadd.xlane.f32.xlu1 (!%p4792_p2), %v3961_v6  ;;  %v3965_v16 = vmul.f32 (!%p4792_p2), %v4793_v7, %v3940_v38  ;;  %v4003_v22 = vmul.f32 (!%p4792_p2), %v4795_v17, %v3934_v42  ;;  %v4004_v23 = vmul.f32 (!%p4792_p2), %v4795_v17, %v3935_v41 }
 0x8a3   : > { %v4005_v48 = vmul.f32 (!%p4792_p2), %v4795_v17, %v3936_v21  ;;  %v4006_v1 = vmul.f32 (!%p4792_p2), %v4795_v17, %v3937_v39  ;;  %v4007_v47 = vmul.f32 (!%p4792_p2), %v4795_v17, %v3938_v29  ;;  %v4008_v58 = vmul.f32 (!%p4792_p2), %v4795_v17, %v3939_v35 }
 0x8a4   : > { %v4009_v40 = vmul.f32 %v4795_v17, %v3940_v38  ;;  %v4010_v34 = vmul.f32 %v4795_v17, %v3941_v13 }
 0x8a5   : > { %3969 = vadd.xlane.f32.xlu0 %v3960_v24  ;;  %v8011_v24 = vlaneseq }
 0x8a6   : > { %3973 = vadd.xlane.f32.xlu1 %v3962_v28 }
 0x8a9   : > { %3975 = vadd.xlane.f32.xlu0 %v3963_v51 }
 0x8aa   : > { %3977 = vadd.xlane.f32.xlu1 %v3964_v36  ;;  %v4036_v36 = vand.u32 127, %v8011_v24 }
 0x8ac   : > { %vm4037_vm3 = vcmp.eq.s32.totalorder %v4036_v36, 0  ;;  %vm4088_vm4 = vcmp.eq.s32.totalorder %v4036_v36, 1  ;;  %vm4139_vm5 = vcmp.eq.s32.totalorder %v4036_v36, 2  ;;  %vm4198_vm6 = vcmp.eq.s32.totalorder %v4036_v36, 3 }
 0x8ad   : > { %3979 = vadd.xlane.f32.xlu0 %v3965_v16 }
 0x8ae   : > { %3981 = vadd.xlane.f32.xlu1 %v3966_v30 }
 0x8b1   : > { %4011 = vadd.xlane.f32.xlu0 %v4003_v22  ;;  %v5914_v22 = vmov 0.0  }
 0x8b2   : > { %4013 = vadd.xlane.f32.xlu1 %v4004_v23  ;;  %v7564_v23 = vsel %vm4037_vm3, 1.0, %v5914_v22 }
 0x8b5   : > { %4015 = vadd.xlane.f32.xlu0 %v4005_v48  ;;  %v7566_v48 = vsel %vm4088_vm4, 1.0, %v5914_v22 }
 0x8b6   : > { %4017 = vadd.xlane.f32.xlu1 %v4006_v1 }
 0x8b9   : > { %4019 = vadd.xlane.f32.xlu0 %v4007_v47 }
 0x8ba   : > { %4021 = vadd.xlane.f32.xlu1 %v4008_v58 }
 0x8bd   : > { %4023 = vadd.xlane.f32.xlu0 %v4009_v40 }
 0x8be   : > { %4025 = vadd.xlane.f32.xlu1 %v4010_v34  ;;  %v4798_v34 = vsel %vm4139_vm5, 1.0, %v5914_v22 }
 0x8cf   : > { %4047 = vperm.xlu1 %5572, %v7457_v2  }
 0x8d3   : > { %4052 = vperm.xlu1 %5572, %v7467_v31   ;;  %4096 = vperm.xlu0 %5574, %v7457_v2   ;;  %v4794_v2 = vld [vmem:[%s8010_s8] ss:$0 sm:$0xff] }
 0x8d7   : > { %4057 = vperm.xlu1 %5572, %v7465_v37   ;;  %4108 = vperm.xlu0 %5574, %v7475_v55  }
 0x8db   : > { %4062 = vperm.xlu1 %5572, %v7475_v55   ;;  %4116 = vperm.xlu0 %5574, %v7483_v26  }
 0x8df   : > { %4067 = vperm.xlu1 %5572, %v7473_v14   ;;  %5575 = vset.pattern.permute.xlu0 %v5912_v20 }
 0x8e0   : > { %4042 = vperm.xlu0 %5575, %v7459_v3  }
 0x8e3   : > { %4072 = vperm.xlu1 %5572, %v7483_v26  }
 0x8e7   : > { %4077 = vperm.xlu1 %5572, %v7481_v56  }
 0x8eb   : > { %5573 = vset.pattern.permute.xlu1 %v5913_v18 }
 0x8ec   : > { %4092 = vperm.xlu1 %5573, %v7459_v3  }
 0x8f0   : > { %4100 = vperm.xlu1 %5573, %v7467_v31  }
 0x8f4   : > { %4104 = vperm.xlu1 %5573, %v7465_v37  }
 0x8f8   : > { %4112 = vperm.xlu1 %5573, %v7473_v14  }
 0x8fc   : > { %4120 = vperm.xlu1 %5573, %v7481_v56  }
 0x900   : > { %5576 = vset.pattern.permute.xlu1 %v5912_v20 }
 0x92e   : > { %v3968_v26 = vpop.xlane.xlu0 %3967 }
 0x92f   : > { %v3972_v55 = vpop.xlane.xlu1 %3971  ;;  %v3990_v61 = vadd.f32 %v4794_v2, %v3968_v26 }
 0x930   : > { %v3992_v31 = vadd.f32 %v4794_v2, %v3972_v55  ;;  %v7572_v55 = vsel %vm4198_vm6, 1.0, %v5914_v22 }
 0x931   : > { %4144 = vperm.xlu0 %5575, %v3990_v61  }
 0x932   : > { %v3970_v44 = vpop.xlane.xlu0 %3969 }
 0x933   : > { %v3974_v8 = vpop.xlane.xlu1 %3973  ;;  %v3991_v53 = vadd.f32 %v4794_v2, %v3970_v44 }
 0x934   : > { %v3993_v3 = vadd.f32 %v4794_v2, %v3974_v8 }
 0x935   : > { %4149 = vperm.xlu1 %5576, %v3991_v53  }
 0x936   : > { %4159 = vperm.xlu0 %5575, %v3993_v3   ;;  %v3976_v14 = vpop.xlane.xlu0 %3975 }
 0x937   : > { %v3978_v37 = vpop.xlane.xlu1 %3977  ;;  %v3994_v56 = vadd.f32 %v4794_v2, %v3976_v14 }
 0x938   : > { %v3995_v46 = vadd.f32 %v4794_v2, %v3978_v37 }
 0x939   : > { %4154 = vperm.xlu1 %5576, %v3992_v31  }
 0x93a   : > { %4169 = vperm.xlu0 %5575, %v3995_v46   ;;  %v3980_v54 = vpop.xlane.xlu0 %3979 }
 0x93b   : > { %v3982_v5 = vpop.xlane.xlu1 %3981  ;;  %v3996_v4 = vadd.f32 %v4794_v2, %v3980_v54 }
 0x93c   : > { %v3997_v27 = vadd.f32 %v4794_v2, %v3982_v5 }
 0x93d   : > { %4164 = vperm.xlu1 %5576, %v3994_v56  }
 0x93e   : > { %4179 = vperm.xlu0 %5575, %v3997_v27   ;;  %v4012_v9 = vpop.xlane.xlu0 %4011 }
 0x93f   : > { %v4014_v10 = vpop.xlane.xlu1 %4013  ;;  %v4027_v59 = vadd.f32 %v4794_v2, %v4012_v9 }
 0x940   : > { %v4028_v52 = vadd.f32 %v4794_v2, %v4014_v10 }
 0x941   : > { %4174 = vperm.xlu1 %5576, %v3996_v4  }
 0x942   : > { %5578 = vset.pattern.permute.xlu0 %v5913_v18  ;;  %v4016_v25 = vpop.xlane.xlu0 %4015 }
 0x943   : > { %4208 = vperm.xlu0 %5578, %v4028_v52   ;;  %v4018_v63 = vpop.xlane.xlu1 %4017  ;;  %v4029_v11 = vadd.f32 %v4794_v2, %v4016_v25 }
 0x944   : > { %v4030_v0 = vadd.f32 %v4794_v2, %v4018_v63 }
 0x945   : > { %5577 = vset.pattern.permute.xlu1 %v5913_v18 }
 0x946   : > { %4203 = vperm.xlu1 %5577, %v4027_v59   ;;  %v4020_v33 = vpop.xlane.xlu0 %4019 }
 0x947   : > { %v4031_v19 = vadd.f32 %v4794_v2, %v4020_v33  ;;  %v4022_v49 = vpop.xlane.xlu1 %4021 }
 0x948   : > { %v4032_v43 = vadd.f32 %v4794_v2, %v4022_v49 }
 0x949   : > { %4223 = vperm.xlu0 %5578, %v4031_v19  }
 0x94a   : > { %4213 = vperm.xlu1 %5577, %v4029_v11   ;;  %v4024_v62 = vpop.xlane.xlu0 %4023 }
 0x94b   : > { %v4033_v32 = vadd.f32 %v4794_v2, %v4024_v62  ;;  %v4026_v57 = vpop.xlane.xlu1 %4025 }
 0x94c   : > { %v4034_v60 = vadd.f32 %v4794_v2, %v4026_v57 }
 0x94d   : > { %4233 = vperm.xlu0 %5578, %v4033_v32  }
 0x94e   : > { %4218 = vperm.xlu1 %5577, %v4030_v0  }
 0x94f   : > { %v4048_v15 = vpop.permute.xlu1 %4047 }
 0x950   : > { %v4081_v1 = vmul.f32 %v7564_v23, %v4048_v15 }
 0x952   : > { %4228 = vperm.xlu1 %5577, %v4032_v43   ;;  %v4097_v35 = vpop.permute.xlu0 %4096 }
 0x953   : > { %v4053_v45 = vpop.permute.xlu1 %4052  ;;  %v4124_v47 = vmul.f32 %v7566_v48, %v4097_v35 }
 0x954   : > { %v4082_v56 = vmul.f32 %v7564_v23, %v4053_v45 }
 0x955   : > { %v4132_v61 = vadd.f32 %v4124_v47, %v4081_v1 }
 0x956   : > { %4238 = vperm.xlu1 %5577, %v4034_v60   ;;  %v4109_v13 = vpop.permute.xlu0 %4108 }
 0x957   : > { %v4058_v50 = vpop.permute.xlu1 %4057  ;;  %v4127_v46 = vmul.f32 %v7566_v48, %v4109_v13 }
 0x958   : > { %v4083_v33 = vmul.f32 %v7564_v23, %v4058_v50 }
 0x95a   : > { %v4117_v6 = vpop.permute.xlu0 %4116 }
 0x95b   : > { %v4063_v42 = vpop.permute.xlu1 %4062  ;;  %v4129_v11 = vmul.f32 %v7566_v48, %v4117_v6 }
 0x95c   : > { %v4084_v14 = vmul.f32 %v7564_v23, %v4063_v42 }
 0x95e   : > { %v4135_v63 = vadd.f32 %v4127_v46, %v4084_v14 }
 0x95f   : > { %v7555_v41 = vpop.permute.xlu1 %4067  ;;  %v4043_v20 = vpop.permute.xlu0 %4042 }
 0x960   : > { %v4080_v8 = vmul.f32 %v7564_v23, %v4043_v20  ;;  %v4085_v50 = vmul.f32 %v7564_v23, %v7555_v41 }
 0x963   : > { %v4073_v21 = vpop.permute.xlu1 %4072 }
 0x964   : > { %v4086_v25 = vmul.f32 %v7564_v23, %v4073_v21 }
 0x966   : > { %v4137_v21 = vadd.f32 %v4129_v11, %v4086_v25 }
 0x967   : > { %v7557_v39 = vpop.permute.xlu1 %4077 }
 0x96b   : > { %v4093_v29 = vpop.permute.xlu1 %4092 }
 0x96c   : > { %v4123_v26 = vmul.f32 %v7566_v48, %v4093_v29 }
 0x96e   : > { %v4131_v54 = vadd.f32 %v4123_v26, %v4080_v8 }
 0x96f   : > { %v4101_v38 = vpop.permute.xlu1 %4100 }
 0x970   : > { %v4125_v5 = vmul.f32 %v7566_v48, %v4101_v38 }
 0x972   : > { %v4133_v19 = vadd.f32 %v4125_v5, %v4082_v56 }
 0x973   : > { %v4105_v7 = vpop.permute.xlu1 %4104 }
 0x974   : > { %v4126_v49 = vmul.f32 %v7566_v48, %v4105_v7 }
 0x976   : > { %v4134_v35 = vadd.f32 %v4126_v49, %v4083_v33 }
 0x977   : > { %v7559_v12 = vpop.permute.xlu1 %4112 }
 0x978   : > { %v4128_v38 = vmul.f32 %v7566_v48, %v7559_v12 }
 0x97a   : > { %v4136_v12 = vadd.f32 %v4128_v38, %v4085_v50 }
 0x97b   : > { %v7561_v18 = vpop.permute.xlu1 %4120 }
 0x9b0   : > { %v4145_v28 = vpop.permute.xlu0 %4144 }
 0x9b1   : > { %v4182_v53 = vmul.f32 %v4798_v34, %v4145_v28 }
 0x9b3   : > { %v4190_v10 = vadd.f32 %v4182_v53, %v4131_v54 }
 0x9b4   : > { %v4150_v51 = vpop.permute.xlu1 %4149 }
 0x9b5   : > { %v4160_v30 = vpop.permute.xlu0 %4159  ;;  %v4183_v2 = vmul.f32 %v4798_v34, %v4150_v51 }
 0x9b6   : > { %v4185_v15 = vmul.f32 %v4798_v34, %v4160_v30  ;;  %v4087_v30 = vmul.f32 %v7564_v23, %v7557_v39 }
 0x9b7   : > { %v4191_v31 = vadd.f32 %v4183_v2, %v4132_v61 }
 0x9b8   : > { %v4155_v16 = vpop.permute.xlu1 %4154  ;;  %v4193_v24 = vadd.f32 %v4185_v15, %v4134_v35 }
 0x9b9   : > { %v4170_v17 = vpop.permute.xlu0 %4169  ;;  %v4184_v52 = vmul.f32 %v4798_v34, %v4155_v16  ;;  %v4130_v16 = vmul.f32 %v7566_v48, %v7561_v18 }
 0x9ba   : > { %v4187_v36 = vmul.f32 %v4798_v34, %v4170_v17 }
 0x9bb   : > { %v4192_v45 = vadd.f32 %v4184_v52, %v4133_v19  ;;  %v4138_v2 = vadd.f32 %v4130_v16, %v4087_v30 }
 0x9bc   : > { %v4165_v58 = vpop.permute.xlu1 %4164  ;;  %v4195_v47 = vadd.f32 %v4187_v36, %v4136_v12 }
 0x9bd   : > { %v7570_v40 = vpop.permute.xlu0 %4179  ;;  %v4186_v4 = vmul.f32 %v4798_v34, %v4165_v58 }
 0x9be   : > { %v4189_v58 = vmul.f32 %v4798_v34, %v7570_v40 }
 0x9bf   : > { %v4194_v32 = vadd.f32 %v4186_v4, %v4135_v63 }
 0x9c0   : > { %v4175_v44 = vpop.permute.xlu1 %4174  ;;  %v4197_v8 = vadd.f32 %v4189_v58, %v4138_v2 }
 0x9c1   : > { %v4188_v43 = vmul.f32 %v4798_v34, %v4175_v44 }
 0x9c2   : > { %v4209_v3 = vpop.permute.xlu0 %4208 }
 0x9c3   : > { %v4242_v37 = vmul.f32 %v7572_v55, %v4209_v3  ;;  %v4196_v6 = vadd.f32 %v4188_v43, %v4137_v21 }
 0x9c5   : > { %v4250_v27 = vadd.f32 %v4242_v37, %v4191_v31  ;;  %v4204_v9 = vpop.permute.xlu1 %4203 }
 0x9c6   : > { %v4241_v59 = vmul.f32 %v7572_v55, %v4204_v9 }
 0x9c7   : > { %4258 = vst [vmem:[%s6554_s7 + $0x8] sm:$0xff] %v4250_v27 }
 0x9c8   : > { %v4249_v0 = vadd.f32 %v4241_v59, %v4190_v10  ;;  %v4224_v62 = vpop.permute.xlu0 %4223 }
 0x9c9   : > { %v4245_v57 = vmul.f32 %v7572_v55, %v4224_v62  ;;  %v4214_v60 = vpop.permute.xlu1 %4213 }
 0x9ca   : > { %4257 = vst [vmem:[%s6554_s7] sm:$0xff] %v4249_v0  ;;  %v4243_v42 = vmul.f32 %v7572_v55, %v4214_v60 }
 0x9cb   : > { %v4253_v29 = vadd.f32 %v4245_v57, %v4194_v32 }
 0x9cc   : > { %v4251_v13 = vadd.f32 %v4243_v42, %v4192_v45  ;;  %v4234_v7 = vpop.permute.xlu0 %4233 }
 0x9cd   : > { %4261 = vst [vmem:[%s6554_s7 + $0x20] sm:$0xff] %v4253_v29  ;;  %v4247_v20 = vmul.f32 %v7572_v55, %v4234_v7  ;;  %v4219_v28 = vpop.permute.xlu1 %4218 }
 0x9ce   : > { %4259 = vst [vmem:[%s6554_s7 + $0x10] sm:$0xff] %v4251_v13  ;;  %v4244_v51 = vmul.f32 %v7572_v55, %v4219_v28 }
 0x9cf   : > { %v4255_v41 = vadd.f32 %v4247_v20, %v4196_v6 }
 0x9d0   : > { %v4252_v22 = vadd.f32 %v4244_v51, %v4193_v24 }
 0x9d1   : > { %4263 = vst [vmem:[%s6554_s7 + $0x30] sm:$0xff] %v4255_v41  ;;  %v4229_v1 = vpop.permute.xlu1 %4228 }
 0x9d2   : > { %4260 = vst [vmem:[%s6554_s7 + $0x18] sm:$0xff] %v4252_v22  ;;  %v4246_v17 = vmul.f32 %v7572_v55, %v4229_v1 }
 0x9d4   : > { %v4254_v26 = vadd.f32 %v4246_v17, %v4195_v47 }
 0x9d5   : > { %v4239_v61 = vpop.permute.xlu1 %4238 }
 0x9d6   : > { %4262 = vst [vmem:[%s6554_s7 + $0x28] sm:$0xff] %v4254_v26  ;;  %v4248_v39 = vmul.f32 %v7572_v55, %v4239_v61 }
 0x9d8   : > { %v4256_v23 = vadd.f32 %v4248_v39, %v4197_v8 }
 0x9da   : > { %4264 = vst [vmem:[%s6554_s7 + $0x38] sm:$0xff] %v4256_v23 }
 0x9db PF: > { %s8012_s30 = sld [smem:[#allocation28_spill]]  ;;  %s8013_s10 = sld [smem:[#allocation32_spill]] }
 0x9dc   : > { %s8014_s0 = sld [smem:[#allocation115_spill]]  ;;  %s4279_s23 = sshll.u32 %s6554_s7, 4  ;;  %s7616_s23 = int_to_ptr.vmem [resolvable:$true] %s4279_s23 }
 0x9dd   : > { %s4266_s3 = scalar_lea.sflag [#allocation6], %s6428_s16  ;;  %s5759_s21 = scalar_lea.vmem %s7616_s23, 1024 }
 0x9de   : > { %p5760_p7 = scmp.ne.s32.totalorder %s7616_s23, %s5759_s21  ;;  %s5915_s5 = smov [#allocation15]  }
 0x9df   : > { %s5763_s17 = sshll.u32 %s5915_s5, 4  ;;  %s5764_s17 = int_to_ptr.vmem [resolvable:$false] %s5763_s17 }
 0x9e0   : > { %s5765_s19 = scalar_lea.vmem %s5764_s17, 2048  ;;  %p5766_p9 = scmp.lt.s32.totalorder %s7616_s23, %s5764_s17 }
 0x9e1   : > { %s4817_s20 = sshll.u32 %s8012_s30, 10  ;;  %p8015_p6 = scmp.ne.s32.totalorder %s8013_s10, 0 }
 0x9e2   : > { %s7613_s18 = scalar_lea.hbm %s8014_s0, %s4817_s20  ;;  %p5767_p8 = scmp.lt.s32.totalorder %s5765_s19, %s5759_s21 }
 0x9e3   : > { %p5761_p0 = pnand %p5760_p7, %p8015_p6 }
 0x9e4   : > { %p5768_p10 = por %p5767_p8, %p5766_p9 }
 0x9e5   : > { %p5762_p3 = pneg %p5761_p0 }
 0x9e7   : > { %p5769_p13 = pnand %p5768_p10, %p5762_p3 }
 0x9e9   : > { %5772 = shalt.err (!%p5769_p13)
}
 0x9ea   : > { %s5773_s7 = scalar_lea.hbm %s7613_s18, 1024  ;;  %s5777_s6 = scalar_lea.hbm %s8014_s0, 2048 }
 0x9eb   : > { %p5774_p5 = scmp.ne.s32.totalorder %s7613_s18, %s5773_s7  ;;  %p5778_p1 = scmp.lt.u32.totalorder %s7613_s18, %s8014_s0 }
 0x9ec   : > { %p5779_p11 = scmp.lt.u32.totalorder %s5777_s6, %s5773_s7  ;;  %p5781_p7 = scmp.lt.u32.totalorder %s5773_s7, %s7613_s18 }
 0x9ed   : > { %p5775_p4 = pnand %p5774_p5, %p8015_p6 }
 0x9ee   : > { %p5780_p2 = por %p5779_p11, %p5778_p1 }
 0x9ef   : > { %p5776_p12 = pneg %p5775_p4 }
 0x9f0   : > { %p5782_p0 = por %p5781_p7, %p5780_p2 }
 0x9f2   : > { %p5783_p3 = pnand %p5782_p0, %p5776_p12 }
 0x9f4   : > { %5786 = shalt.err (!%p5783_p3)
}
 0x9f5   : > { %s5916_s13 = smov 128   ;;  %s5917_s24 = smov 8  }
 0x9f6   : > { %5262 = dma.vmem_to_hbm [thread:$0]  (%p8015_p6), %s7616_s23, 1024, %s7613_s18, %s4266_s3, %s5916_s13, %s5916_s13, %s5917_s24  }
 0x9f7 PF: > { %s8016_s22 = sld [smem:[#allocation31_spill]]  ;;  %s8017_s28 = sld [smem:[#allocation24_spill]] }
 0x9f8   : > { %s8018_s26 = sld [smem:[#allocation33_spill]] }
 0x9fd   : > { %p5288_p9 = scmp.ge.s32.totalorder %s8016_s22, 2  ;;  %s4294_s29 = sand.u32 1, %s8017_s28  }
 0x9fe   : > { %p8019_p8 = scmp.ne.s32.totalorder %s8018_s26, 0  ;;  %s4295_s27 = scalar_lea.sflag [#allocation6], %s4294_s29 }
 0xa00   : > { %p5284_p10 = pnand %p5288_p9, %p8019_p8 }
 0xa02   : > { %5852 = dma.done.wait (!%p5284_p10), %s4295_s27, 1024  }
 0xa03   : > { %5854 = vsyncadd (!%p5284_p10), %s4295_s27, 4294966272  ;;  %s50_s4 = sadd.s32 1, %s8016_s22   ;;  %s8020_s29 = sld [smem:[#allocation22_spill]] }
 0xa04   : > { %p47_p13 = scmp.ge.s32.totalorder %s50_s4, 6   ;;  %s8021_s2 = sld [smem:[#allocation23_spill]] }
 0xa05   : > { %s8022_s6 = sld [smem:[#allocation37_spill]]  ;;  %s8023_s30 = sld [smem:[#allocation25_spill]] }
 0xa06   : > { %s8024_s7 = sld [smem:[#allocation26_spill]]  ;;  %s8025_s3 = sld [smem:[#allocation38_spill]] }
 0xa07   : > { %s8026_s26 = sld [smem:[#allocation29_spill]]  ;;  %s8027_s1 = sld [smem:[#allocation30_spill]] }
 0xa08   : > { %s8028_s8 = sld [smem:[#allocation34_spill]]  ;;  %s8029_s27 = sld [smem:[#allocation36_spill]] }
 0xa09   :  { %49 = sbr.rel (!%p47_p13) target bundleno = 42 (0x2a), region = 285 }
 0xa10   :  { %4300 = vsyncpa [#allocation5], 1 }
 0xa11   :  { %4302 = vsyncpa [#allocation5 + $0x1], 1 }
 0xa12   :  { %4303 = vsyncpa [#allocation8], 1 }
 0xa13   :  { %4305 = vsyncpa [#allocation8 + $0x1], 1 }
 0xa14   :  { %4306 = vsyncpa [#allocation11], 1 }
 0xa15   :  { %4308 = vsyncpa [#allocation11 + $0x1], 1 }
 0xa16   :  { %4309 = vsyncpa [#allocation14], 1 }
 0xa17   :  { %4311 = vsyncpa [#allocation14 + $0x1], 1 }
 0xa18   :  { %4312 = vsyncpa [#allocation6], 1 }
 0xa19   :  { %4314 = vsyncpa [#allocation6 + $0x1], 1 }

</bundles_post_ra>
